<compile_context>
chip_gen: v6e
topology: v6e:2x2x1
jax: 0.10.0
libtpu: 0.0.40
codegen_flags: <defaults>
</compile_context>

<pallas_src>
import jax
import jax.numpy as jnp
from jax.experimental import pallas as pl
from jax.experimental.pallas import tpu as pltpu

IN_CH = 3
OUT_CH = 3
K = 5
PAD = 2


def bayar_conv_kernel(w_ref, x_ref, o_ref, xp_ref):
    """One (batch, H-tile) step of the constrained 5x5 conv.

    w_ref  : SMEM, flat (OUT_CH*IN_CH*K*K,) f32        -- constrained weights
    x_ref  : VMEM, (1, IN_CH, H, W) f32                -- full unpadded image
    o_ref  : VMEM, (1, OUT_CH, H_TILE, W) f32          -- output H-tile
    xp_ref : VMEM scratch, (IN_CH, H_TILE+4, W+4) f32  -- zero-padded tile
    """
    W = x_ref.shape[3]
    T = xp_ref.shape[1] - 2 * PAD          # H_TILE

    h_idx = pl.program_id(1)
    num_h = pl.num_programs(1)
    row0 = pl.multiple_of(h_idx * T, T)

    # ---- Build the zero-padded (T+4, W+4) tile in VMEM (no HBM pad pass). --
    xp_ref[...] = jnp.zeros_like(xp_ref)
    xp_ref[:, PAD:PAD + T, PAD:PAD + W] = x_ref[0, :, pl.ds(row0, T), :]

    @pl.when(h_idx > 0)
    def _top_halo():
        xp_ref[:, 0:PAD, PAD:PAD + W] = x_ref[0, :, pl.ds(row0 - PAD, PAD), :]

    @pl.when(h_idx < num_h - 1)
    def _bottom_halo():
        xp_ref[:, PAD + T:PAD + T + PAD, PAD:PAD + W] = (
            x_ref[0, :, pl.ds(row0 + T, PAD), :])

    # ---- 25-tap-per-input-channel shift-and-accumulate (VPU path). ---------
    # Each shifted window is materialized once and feeds all three output
    # channel accumulators (oc innermost).
    accs = [jnp.zeros((T, W), jnp.float32) for _ in range(OUT_CH)]
    for ic in range(IN_CH):
        for kh in range(K):
            for kw in range(K):
                tap = xp_ref[ic, kh:kh + T, kw:kw + W]
                for oc in range(OUT_CH):
                    wv = w_ref[((oc * IN_CH + ic) * K + kh) * K + kw]
                    accs[oc] = accs[oc] + wv * tap

    for oc in range(OUT_CH):
        o_ref[0, oc] = accs[oc].astype(o_ref.dtype)


def constrain_weights(w):
    """Reproduce the in-place Bayar constraint from the PyTorch forward().

    Note: dividing by the per-(oc, ic) masked weight sum (`** -1`) mirrors the
    PyTorch module and assumes the masked sum is not (near-)zero.
    """
    bayar_mask = jnp.ones((K, K), jnp.float32).at[2, 2].set(0.0)
    bayar_final = jnp.zeros((K, K), jnp.float32).at[2, 2].set(-1.0)
    w = w * bayar_mask[None, None, :, :]
    w = w * (w.sum(axis=(2, 3)).reshape(OUT_CH, IN_CH, 1, 1) ** -1)
    w = w + bayar_final[None, None, :, :]
    return w


def _pick_h_tile(H, max_h_tile=32):
    """Largest H tile t <= max_h_tile with H % t == 0 and t % 8 == 0 (so the
    output block's second-minor dim obeys the (8,128) rule); fall back to a
    single full-H tile otherwise."""
    for t in range(min(max_h_tile, H), PAD - 1, -1):
        if H % t == 0 and t % 8 == 0:
            return t
    return H


def bayar_conv_forward(x, weight, max_h_tile=32):
    """x: (N, 3, H, W) f32, weight: (3, 3, 5, 5) f32 (unconstrained)."""
    N, C, H, W = x.shape
    assert C == IN_CH

    # Parameter setup (glue, plain JAX): apply the Bayar constraint.
    w_c = constrain_weights(weight.astype(jnp.float32))
    w_flat = w_c.reshape(-1)  # (OUT_CH*IN_CH*K*K,) -> SMEM, scalar-indexed

    h_tile = _pick_h_tile(H, max_h_tile)
    num_h = H // h_tile

    # Raise the scoped VMEM limit so larger tiles are available, while staying
    # within physical VMEM on v7x (64 MiB).
    try:
        cap = pltpu.get_tpu_info().vmem_capacity_bytes
        vmem_limit = int(min(64 << 20, cap * 3 // 4))
    except Exception:
        vmem_limit = 48 << 20

    out = pl.pallas_call(
        bayar_conv_kernel,
        out_shape=jax.ShapeDtypeStruct((N, OUT_CH, H, W), jnp.float32),
        grid=(N, num_h),
        in_specs=[
            # constrained weights: small flat f32 vector, scalar-indexed -> SMEM
            pl.BlockSpec(memory_space=pltpu.MemorySpace.SMEM),
            # full unpadded image per batch element; the block index only
            # depends on n, so consecutive H-tile steps reuse the same buffer.
            pl.BlockSpec((1, IN_CH, H, W), lambda n, h: (n, 0, 0, 0)),
        ],
        out_specs=pl.BlockSpec((1, OUT_CH, h_tile, W),
                               lambda n, h: (n, 0, h, 0)),
        scratch_shapes=[
            pltpu.VMEM((IN_CH, h_tile + 2 * PAD, W + 2 * PAD), jnp.float32),
        ],
        compiler_params=pltpu.CompilerParams(
            dimension_semantics=("parallel", "parallel"),
            vmem_limit_bytes=vmem_limit),
    )(w_flat, x.astype(jnp.float32))
    return out


def reference_forward(x, weight):
    """Pure-JAX reference (lax conv) for validation."""
    w_c = constrain_weights(weight.astype(jnp.float32))
    return jax.lax.conv_general_dilated(
        x.astype(jnp.float32), w_c,
        window_strides=(1, 1),
        padding=((PAD, PAD), (PAD, PAD)),
        dimension_numbers=("NCHW", "OIHW", "NCHW"),
        precision=jax.lax.Precision.HIGHEST,
    )


if __name__ == "__main__":
    key = jax.random.PRNGKey(0)
    kx, kw = jax.random.split(key)

    # Small shapes consistent with the module (in_channel=3).
    N, C, H, W = 2, IN_CH, 16, 16
    x = jax.random.normal(kx, (N, C, H, W), dtype=jnp.float32)
    # Deterministic synthetic conv weight (module would use kaiming init).
    weight = jax.random.normal(kw, (OUT_CH, IN_CH, K, K), dtype=jnp.float32) * 0.1

    out = jax.block_until_ready(bayar_conv_forward(x, weight))
    ref = jax.block_until_ready(reference_forward(x, weight))
    assert out.shape == (N, OUT_CH, H, W)
    assert jnp.allclose(out, ref, atol=1e-3, rtol=1e-3), "mismatch vs reference"

    # Extra shape checks:
    #   * H=32 with max_h_tile=8 -> 4 H-tiles, exercising interior tiles with
    #     both halos active.
    #   * W=128 -> lane-dense full-vreg path.
    x2 = jax.random.normal(jax.random.PRNGKey(1), (1, C, 32, 16), jnp.float32)
    o2 = jax.block_until_ready(bayar_conv_forward(x2, weight, max_h_tile=8))
    r2 = jax.block_until_ready(reference_forward(x2, weight))
    assert jnp.allclose(o2, r2, atol=1e-3, rtol=1e-3), "mismatch vs reference"

    x3 = jax.random.normal(jax.random.PRNGKey(2), (1, C, 16, 128), jnp.float32)
    o3 = jax.block_until_ready(bayar_conv_forward(x3, weight))
    r3 = jax.block_until_ready(reference_forward(x3, weight))
    assert jnp.allclose(o3, r3, atol=1e-3, rtol=1e-3), "mismatch vs reference"

    print("KERNEL_OK")
</pallas_src>

<mosaic_0001>
module attributes {stable_mosaic.version = 11 : i64} {
  func.func @bayar_conv_kernel(%arg0: i32, %arg1: i32, %arg2: memref<225xf32, #tpu.memory_space<smem>>, %arg3: memref<1x3x16x16xf32, #tpu.memory_space<vmem>>, %arg4: memref<1x3x16x16xf32, #tpu.memory_space<vmem>>, %arg5: memref<3x20x20xf32, #tpu.memory_space<vmem>>) attributes {dimension_semantics = [#tpu.dimension_semantics<parallel>, #tpu.dimension_semantics<parallel>], iteration_bounds = array<i64: 2, 1>, scalar_prefetch = 0 : i64, scratch_operands = 1 : i64, tpu.core_type = #tpu.core_type<tc>, window_params = [{transform_indices = @transform_0, window_bounds = array<i64: 225>}, {transform_indices = @transform_1, window_bounds = array<i64: 1, 3, 16, 16>}, {transform_indices = @transform_2, window_bounds = array<i64: 1, 3, 16, 16>}]} {
    %c16_i32 = arith.constant 16 : i32
    %0 = arith.muli %arg1, %c16_i32 : i32
    %1 = tpu.assume_multiple %0, 16 : i32
    %cst = arith.constant 0.000000e+00 : f32
    %2 = vector.broadcast %cst : f32 to vector<3x20x20xf32>
    %c0 = arith.constant 0 : index
    %c0_0 = arith.constant 0 : index
    %c0_1 = arith.constant 0 : index
    %3 = vector.load %arg5[%c0, %c0_0, %c0_1] : memref<3x20x20xf32, #tpu.memory_space<vmem>>, vector<3x20x20xf32>
    tpu.vector_store %arg5[%c0, %c0_0, %c0_1], %2 {strides = array<i32>} : memref<3x20x20xf32, #tpu.memory_space<vmem>>, vector<3x20x20xf32>,
    %c0_2 = arith.constant 0 : index
    %c0_3 = arith.constant 0 : index
    %4 = arith.index_cast %1 : i32 to index
    %c0_4 = arith.constant 0 : index
    %5 = vector.load %arg3[%c0_2, %c0_3, %4, %c0_4] : memref<1x3x16x16xf32, #tpu.memory_space<vmem>>, vector<1x3x16x16xf32>
    %6 = vector.shape_cast %5 : vector<1x3x16x16xf32> to vector<3x16x16xf32>
    %c0_5 = arith.constant 0 : index
    %c2 = arith.constant 2 : index
    %c2_6 = arith.constant 2 : index
    %7 = vector.load %arg5[%c0_5, %c2, %c2_6] : memref<3x20x20xf32, #tpu.memory_space<vmem>>, vector<3x16x16xf32>
    tpu.vector_store %arg5[%c0_5, %c2, %c2_6], %6 {strides = array<i32>} : memref<3x20x20xf32, #tpu.memory_space<vmem>>, vector<3x16x16xf32>,
    %c0_i32 = arith.constant 0 : i32
    %8 = arith.cmpi sgt, %arg1, %c0_i32 : i32
    %9 = arith.extui %8 : i1 to i32
    %c0_i32_7 = arith.constant 0 : i32
    %10 = arith.cmpi ne, %9, %c0_i32_7 : i32
    scf.if %10 {
      %c2_i32 = arith.constant 2 : i32
      %1076 = arith.subi %1, %c2_i32 : i32
      %c0_252 = arith.constant 0 : index
      %c0_253 = arith.constant 0 : index
      %1077 = arith.index_cast %1076 : i32 to index
      %c0_254 = arith.constant 0 : index
      %1078 = vector.load %arg3[%c0_252, %c0_253, %1077, %c0_254] : memref<1x3x16x16xf32, #tpu.memory_space<vmem>>, vector<1x3x2x16xf32>
      %1079 = vector.shape_cast %1078 : vector<1x3x2x16xf32> to vector<3x2x16xf32>
      %c0_255 = arith.constant 0 : index
      %c0_256 = arith.constant 0 : index
      %c2_257 = arith.constant 2 : index
      %1080 = vector.load %arg5[%c0_255, %c0_256, %c2_257] : memref<3x20x20xf32, #tpu.memory_space<vmem>>, vector<3x2x16xf32>
      tpu.vector_store %arg5[%c0_255, %c0_256, %c2_257], %1079 {strides = array<i32>} : memref<3x20x20xf32, #tpu.memory_space<vmem>>, vector<3x2x16xf32>,
    } else {
    }
    %c0_i32_8 = arith.constant 0 : i32
    %11 = arith.cmpi slt, %arg1, %c0_i32_8 : i32
    %12 = arith.extui %11 : i1 to i32
    %c0_i32_9 = arith.constant 0 : i32
    %13 = arith.cmpi ne, %12, %c0_i32_9 : i32
    scf.if %13 {
      %c16_i32_252 = arith.constant 16 : i32
      %1076 = arith.addi %1, %c16_i32_252 : i32
      %c0_253 = arith.constant 0 : index
      %c0_254 = arith.constant 0 : index
      %1077 = arith.index_cast %1076 : i32 to index
      %c0_255 = arith.constant 0 : index
      %1078 = vector.load %arg3[%c0_253, %c0_254, %1077, %c0_255] : memref<1x3x16x16xf32, #tpu.memory_space<vmem>>, vector<1x3x2x16xf32>
      %1079 = vector.shape_cast %1078 : vector<1x3x2x16xf32> to vector<3x2x16xf32>
      %c0_256 = arith.constant 0 : index
      %c18_257 = arith.constant 18 : index
      %c2_258 = arith.constant 2 : index
      %1080 = vector.load %arg5[%c0_256, %c18_257, %c2_258] : memref<3x20x20xf32, #tpu.memory_space<vmem>>, vector<3x2x16xf32>
      tpu.vector_store %arg5[%c0_256, %c18_257, %c2_258], %1079 {strides = array<i32>} : memref<3x20x20xf32, #tpu.memory_space<vmem>>, vector<3x2x16xf32>,
    } else {
    }
    %cst_10 = arith.constant 0.000000e+00 : f32
    %14 = vector.broadcast %cst_10 : f32 to vector<16x16xf32>
    %cst_11 = arith.constant 0.000000e+00 : f32
    %15 = vector.broadcast %cst_11 : f32 to vector<16x16xf32>
    %cst_12 = arith.constant 0.000000e+00 : f32
    %16 = vector.broadcast %cst_12 : f32 to vector<16x16xf32>
    %c0_13 = arith.constant 0 : index
    %c0_14 = arith.constant 0 : index
    %c0_15 = arith.constant 0 : index
    %17 = vector.load %arg5[%c0_13, %c0_14, %c0_15] : memref<3x20x20xf32, #tpu.memory_space<vmem>>, vector<1x16x16xf32>
    %18 = vector.shape_cast %17 : vector<1x16x16xf32> to vector<16x16xf32>
    %c0_16 = arith.constant 0 : index
    %19 = memref.load %arg2[%c0_16] : memref<225xf32, #tpu.memory_space<smem>>
    %20 = vector.broadcast %19 : f32 to vector<16x16xf32>
    %21 = arith.mulf %20, %18 : vector<16x16xf32>
    %22 = arith.addf %14, %21 : vector<16x16xf32>
    %c75 = arith.constant 75 : index
    %23 = memref.load %arg2[%c75] : memref<225xf32, #tpu.memory_space<smem>>
    %24 = vector.broadcast %23 : f32 to vector<16x16xf32>
    %25 = arith.mulf %24, %18 : vector<16x16xf32>
    %26 = arith.addf %15, %25 : vector<16x16xf32>
    %c150 = arith.constant 150 : index
    %27 = memref.load %arg2[%c150] : memref<225xf32, #tpu.memory_space<smem>>
    %28 = vector.broadcast %27 : f32 to vector<16x16xf32>
    %29 = arith.mulf %28, %18 : vector<16x16xf32>
    %30 = arith.addf %16, %29 : vector<16x16xf32>
    %c0_17 = arith.constant 0 : index
    %c0_18 = arith.constant 0 : index
    %c1 = arith.constant 1 : index
    %31 = vector.load %arg5[%c0_17, %c0_18, %c1] : memref<3x20x20xf32, #tpu.memory_space<vmem>>, vector<1x16x16xf32>
    %32 = vector.shape_cast %31 : vector<1x16x16xf32> to vector<16x16xf32>
    %c1_19 = arith.constant 1 : index
    %33 = memref.load %arg2[%c1_19] : memref<225xf32, #tpu.memory_space<smem>>
    %34 = vector.broadcast %33 : f32 to vector<16x16xf32>
    %35 = arith.mulf %34, %32 : vector<16x16xf32>
    %36 = arith.addf %22, %35 : vector<16x16xf32>
    %c76 = arith.constant 76 : index
    %37 = memref.load %arg2[%c76] : memref<225xf32, #tpu.memory_space<smem>>
    %38 = vector.broadcast %37 : f32 to vector<16x16xf32>
    %39 = arith.mulf %38, %32 : vector<16x16xf32>
    %40 = arith.addf %26, %39 : vector<16x16xf32>
    %c151 = arith.constant 151 : index
    %41 = memref.load %arg2[%c151] : memref<225xf32, #tpu.memory_space<smem>>
    %42 = vector.broadcast %41 : f32 to vector<16x16xf32>
    %43 = arith.mulf %42, %32 : vector<16x16xf32>
    %44 = arith.addf %30, %43 : vector<16x16xf32>
    %c0_20 = arith.constant 0 : index
    %c0_21 = arith.constant 0 : index
    %c2_22 = arith.constant 2 : index
    %45 = vector.load %arg5[%c0_20, %c0_21, %c2_22] : memref<3x20x20xf32, #tpu.memory_space<vmem>>, vector<1x16x16xf32>
    %46 = vector.shape_cast %45 : vector<1x16x16xf32> to vector<16x16xf32>
    %c2_23 = arith.constant 2 : index
    %47 = memref.load %arg2[%c2_23] : memref<225xf32, #tpu.memory_space<smem>>
    %48 = vector.broadcast %47 : f32 to vector<16x16xf32>
    %49 = arith.mulf %48, %46 : vector<16x16xf32>
    %50 = arith.addf %36, %49 : vector<16x16xf32>
    %c77 = arith.constant 77 : index
    %51 = memref.load %arg2[%c77] : memref<225xf32, #tpu.memory_space<smem>>
    %52 = vector.broadcast %51 : f32 to vector<16x16xf32>
    %53 = arith.mulf %52, %46 : vector<16x16xf32>
    %54 = arith.addf %40, %53 : vector<16x16xf32>
    %c152 = arith.constant 152 : index
    %55 = memref.load %arg2[%c152] : memref<225xf32, #tpu.memory_space<smem>>
    %56 = vector.broadcast %55 : f32 to vector<16x16xf32>
    %57 = arith.mulf %56, %46 : vector<16x16xf32>
    %58 = arith.addf %44, %57 : vector<16x16xf32>
    %c0_24 = arith.constant 0 : index
    %c0_25 = arith.constant 0 : index
    %c3 = arith.constant 3 : index
    %59 = vector.load %arg5[%c0_24, %c0_25, %c3] : memref<3x20x20xf32, #tpu.memory_space<vmem>>, vector<1x16x16xf32>
    %60 = vector.shape_cast %59 : vector<1x16x16xf32> to vector<16x16xf32>
    %c3_26 = arith.constant 3 : index
    %61 = memref.load %arg2[%c3_26] : memref<225xf32, #tpu.memory_space<smem>>
    %62 = vector.broadcast %61 : f32 to vector<16x16xf32>
    %63 = arith.mulf %62, %60 : vector<16x16xf32>
    %64 = arith.addf %50, %63 : vector<16x16xf32>
    %c78 = arith.constant 78 : index
    %65 = memref.load %arg2[%c78] : memref<225xf32, #tpu.memory_space<smem>>
    %66 = vector.broadcast %65 : f32 to vector<16x16xf32>
    %67 = arith.mulf %66, %60 : vector<16x16xf32>
    %68 = arith.addf %54, %67 : vector<16x16xf32>
    %c153 = arith.constant 153 : index
    %69 = memref.load %arg2[%c153] : memref<225xf32, #tpu.memory_space<smem>>
    %70 = vector.broadcast %69 : f32 to vector<16x16xf32>
    %71 = arith.mulf %70, %60 : vector<16x16xf32>
    %72 = arith.addf %58, %71 : vector<16x16xf32>
    %c0_27 = arith.constant 0 : index
    %c0_28 = arith.constant 0 : index
    %c4 = arith.constant 4 : index
    %73 = vector.load %arg5[%c0_27, %c0_28, %c4] : memref<3x20x20xf32, #tpu.memory_space<vmem>>, vector<1x16x16xf32>
    %74 = vector.shape_cast %73 : vector<1x16x16xf32> to vector<16x16xf32>
    %c4_29 = arith.constant 4 : index
    %75 = memref.load %arg2[%c4_29] : memref<225xf32, #tpu.memory_space<smem>>
    %76 = vector.broadcast %75 : f32 to vector<16x16xf32>
    %77 = arith.mulf %76, %74 : vector<16x16xf32>
    %78 = arith.addf %64, %77 : vector<16x16xf32>
    %c79 = arith.constant 79 : index
    %79 = memref.load %arg2[%c79] : memref<225xf32, #tpu.memory_space<smem>>
    %80 = vector.broadcast %79 : f32 to vector<16x16xf32>
    %81 = arith.mulf %80, %74 : vector<16x16xf32>
    %82 = arith.addf %68, %81 : vector<16x16xf32>
    %c154 = arith.constant 154 : index
    %83 = memref.load %arg2[%c154] : memref<225xf32, #tpu.memory_space<smem>>
    %84 = vector.broadcast %83 : f32 to vector<16x16xf32>
    %85 = arith.mulf %84, %74 : vector<16x16xf32>
    %86 = arith.addf %72, %85 : vector<16x16xf32>
    %c0_30 = arith.constant 0 : index
    %c1_31 = arith.constant 1 : index
    %c0_32 = arith.constant 0 : index
    %87 = vector.load %arg5[%c0_30, %c1_31, %c0_32] : memref<3x20x20xf32, #tpu.memory_space<vmem>>, vector<1x16x16xf32>
    %88 = vector.shape_cast %87 : vector<1x16x16xf32> to vector<16x16xf32>
    %c5 = arith.constant 5 : index
    %89 = memref.load %arg2[%c5] : memref<225xf32, #tpu.memory_space<smem>>
    %90 = vector.broadcast %89 : f32 to vector<16x16xf32>
    %91 = arith.mulf %90, %88 : vector<16x16xf32>
    %92 = arith.addf %78, %91 : vector<16x16xf32>
    %c80 = arith.constant 80 : index
    %93 = memref.load %arg2[%c80] : memref<225xf32, #tpu.memory_space<smem>>
    %94 = vector.broadcast %93 : f32 to vector<16x16xf32>
    %95 = arith.mulf %94, %88 : vector<16x16xf32>
    %96 = arith.addf %82, %95 : vector<16x16xf32>
    %c155 = arith.constant 155 : index
    %97 = memref.load %arg2[%c155] : memref<225xf32, #tpu.memory_space<smem>>
    %98 = vector.broadcast %97 : f32 to vector<16x16xf32>
    %99 = arith.mulf %98, %88 : vector<16x16xf32>
    %100 = arith.addf %86, %99 : vector<16x16xf32>
    %c0_33 = arith.constant 0 : index
    %c1_34 = arith.constant 1 : index
    %c1_35 = arith.constant 1 : index
    %101 = vector.load %arg5[%c0_33, %c1_34, %c1_35] : memref<3x20x20xf32, #tpu.memory_space<vmem>>, vector<1x16x16xf32>
    %102 = vector.shape_cast %101 : vector<1x16x16xf32> to vector<16x16xf32>
    %c6 = arith.constant 6 : index
    %103 = memref.load %arg2[%c6] : memref<225xf32, #tpu.memory_space<smem>>
    %104 = vector.broadcast %103 : f32 to vector<16x16xf32>
    %105 = arith.mulf %104, %102 : vector<16x16xf32>
    %106 = arith.addf %92, %105 : vector<16x16xf32>
    %c81 = arith.constant 81 : index
    %107 = memref.load %arg2[%c81] : memref<225xf32, #tpu.memory_space<smem>>
    %108 = vector.broadcast %107 : f32 to vector<16x16xf32>
    %109 = arith.mulf %108, %102 : vector<16x16xf32>
    %110 = arith.addf %96, %109 : vector<16x16xf32>
    %c156 = arith.constant 156 : index
    %111 = memref.load %arg2[%c156] : memref<225xf32, #tpu.memory_space<smem>>
    %112 = vector.broadcast %111 : f32 to vector<16x16xf32>
    %113 = arith.mulf %112, %102 : vector<16x16xf32>
    %114 = arith.addf %100, %113 : vector<16x16xf32>
    %c0_36 = arith.constant 0 : index
    %c1_37 = arith.constant 1 : index
    %c2_38 = arith.constant 2 : index
    %115 = vector.load %arg5[%c0_36, %c1_37, %c2_38] : memref<3x20x20xf32, #tpu.memory_space<vmem>>, vector<1x16x16xf32>
    %116 = vector.shape_cast %115 : vector<1x16x16xf32> to vector<16x16xf32>
    %c7 = arith.constant 7 : index
    %117 = memref.load %arg2[%c7] : memref<225xf32, #tpu.memory_space<smem>>
    %118 = vector.broadcast %117 : f32 to vector<16x16xf32>
    %119 = arith.mulf %118, %116 : vector<16x16xf32>
    %120 = arith.addf %106, %119 : vector<16x16xf32>
    %c82 = arith.constant 82 : index
    %121 = memref.load %arg2[%c82] : memref<225xf32, #tpu.memory_space<smem>>
    %122 = vector.broadcast %121 : f32 to vector<16x16xf32>
    %123 = arith.mulf %122, %116 : vector<16x16xf32>
    %124 = arith.addf %110, %123 : vector<16x16xf32>
    %c157 = arith.constant 157 : index
    %125 = memref.load %arg2[%c157] : memref<225xf32, #tpu.memory_space<smem>>
    %126 = vector.broadcast %125 : f32 to vector<16x16xf32>
    %127 = arith.mulf %126, %116 : vector<16x16xf32>
    %128 = arith.addf %114, %127 : vector<16x16xf32>
    %c0_39 = arith.constant 0 : index
    %c1_40 = arith.constant 1 : index
    %c3_41 = arith.constant 3 : index
    %129 = vector.load %arg5[%c0_39, %c1_40, %c3_41] : memref<3x20x20xf32, #tpu.memory_space<vmem>>, vector<1x16x16xf32>
    %130 = vector.shape_cast %129 : vector<1x16x16xf32> to vector<16x16xf32>
    %c8 = arith.constant 8 : index
    %131 = memref.load %arg2[%c8] : memref<225xf32, #tpu.memory_space<smem>>
    %132 = vector.broadcast %131 : f32 to vector<16x16xf32>
    %133 = arith.mulf %132, %130 : vector<16x16xf32>
    %134 = arith.addf %120, %133 : vector<16x16xf32>
    %c83 = arith.constant 83 : index
    %135 = memref.load %arg2[%c83] : memref<225xf32, #tpu.memory_space<smem>>
    %136 = vector.broadcast %135 : f32 to vector<16x16xf32>
    %137 = arith.mulf %136, %130 : vector<16x16xf32>
    %138 = arith.addf %124, %137 : vector<16x16xf32>
    %c158 = arith.constant 158 : index
    %139 = memref.load %arg2[%c158] : memref<225xf32, #tpu.memory_space<smem>>
    %140 = vector.broadcast %139 : f32 to vector<16x16xf32>
    %141 = arith.mulf %140, %130 : vector<16x16xf32>
    %142 = arith.addf %128, %141 : vector<16x16xf32>
    %c0_42 = arith.constant 0 : index
    %c1_43 = arith.constant 1 : index
    %c4_44 = arith.constant 4 : index
    %143 = vector.load %arg5[%c0_42, %c1_43, %c4_44] : memref<3x20x20xf32, #tpu.memory_space<vmem>>, vector<1x16x16xf32>
    %144 = vector.shape_cast %143 : vector<1x16x16xf32> to vector<16x16xf32>
    %c9 = arith.constant 9 : index
    %145 = memref.load %arg2[%c9] : memref<225xf32, #tpu.memory_space<smem>>
    %146 = vector.broadcast %145 : f32 to vector<16x16xf32>
    %147 = arith.mulf %146, %144 : vector<16x16xf32>
    %148 = arith.addf %134, %147 : vector<16x16xf32>
    %c84 = arith.constant 84 : index
    %149 = memref.load %arg2[%c84] : memref<225xf32, #tpu.memory_space<smem>>
    %150 = vector.broadcast %149 : f32 to vector<16x16xf32>
    %151 = arith.mulf %150, %144 : vector<16x16xf32>
    %152 = arith.addf %138, %151 : vector<16x16xf32>
    %c159 = arith.constant 159 : index
    %153 = memref.load %arg2[%c159] : memref<225xf32, #tpu.memory_space<smem>>
    %154 = vector.broadcast %153 : f32 to vector<16x16xf32>
    %155 = arith.mulf %154, %144 : vector<16x16xf32>
    %156 = arith.addf %142, %155 : vector<16x16xf32>
    %c0_45 = arith.constant 0 : index
    %c2_46 = arith.constant 2 : index
    %c0_47 = arith.constant 0 : index
    %157 = vector.load %arg5[%c0_45, %c2_46, %c0_47] : memref<3x20x20xf32, #tpu.memory_space<vmem>>, vector<1x16x16xf32>
    %158 = vector.shape_cast %157 : vector<1x16x16xf32> to vector<16x16xf32>
    %c10 = arith.constant 10 : index
    %159 = memref.load %arg2[%c10] : memref<225xf32, #tpu.memory_space<smem>>
    %160 = vector.broadcast %159 : f32 to vector<16x16xf32>
    %161 = arith.mulf %160, %158 : vector<16x16xf32>
    %162 = arith.addf %148, %161 : vector<16x16xf32>
    %c85 = arith.constant 85 : index
    %163 = memref.load %arg2[%c85] : memref<225xf32, #tpu.memory_space<smem>>
    %164 = vector.broadcast %163 : f32 to vector<16x16xf32>
    %165 = arith.mulf %164, %158 : vector<16x16xf32>
    %166 = arith.addf %152, %165 : vector<16x16xf32>
    %c160 = arith.constant 160 : index
    %167 = memref.load %arg2[%c160] : memref<225xf32, #tpu.memory_space<smem>>
    %168 = vector.broadcast %167 : f32 to vector<16x16xf32>
    %169 = arith.mulf %168, %158 : vector<16x16xf32>
    %170 = arith.addf %156, %169 : vector<16x16xf32>
    %c0_48 = arith.constant 0 : index
    %c2_49 = arith.constant 2 : index
    %c1_50 = arith.constant 1 : index
    %171 = vector.load %arg5[%c0_48, %c2_49, %c1_50] : memref<3x20x20xf32, #tpu.memory_space<vmem>>, vector<1x16x16xf32>
    %172 = vector.shape_cast %171 : vector<1x16x16xf32> to vector<16x16xf32>
    %c11 = arith.constant 11 : index
    %173 = memref.load %arg2[%c11] : memref<225xf32, #tpu.memory_space<smem>>
    %174 = vector.broadcast %173 : f32 to vector<16x16xf32>
    %175 = arith.mulf %174, %172 : vector<16x16xf32>
    %176 = arith.addf %162, %175 : vector<16x16xf32>
    %c86 = arith.constant 86 : index
    %177 = memref.load %arg2[%c86] : memref<225xf32, #tpu.memory_space<smem>>
    %178 = vector.broadcast %177 : f32 to vector<16x16xf32>
    %179 = arith.mulf %178, %172 : vector<16x16xf32>
    %180 = arith.addf %166, %179 : vector<16x16xf32>
    %c161 = arith.constant 161 : index
    %181 = memref.load %arg2[%c161] : memref<225xf32, #tpu.memory_space<smem>>
    %182 = vector.broadcast %181 : f32 to vector<16x16xf32>
    %183 = arith.mulf %182, %172 : vector<16x16xf32>
    %184 = arith.addf %170, %183 : vector<16x16xf32>
    %c0_51 = arith.constant 0 : index
    %c2_52 = arith.constant 2 : index
    %c2_53 = arith.constant 2 : index
    %185 = vector.load %arg5[%c0_51, %c2_52, %c2_53] : memref<3x20x20xf32, #tpu.memory_space<vmem>>, vector<1x16x16xf32>
    %186 = vector.shape_cast %185 : vector<1x16x16xf32> to vector<16x16xf32>
    %c12 = arith.constant 12 : index
    %187 = memref.load %arg2[%c12] : memref<225xf32, #tpu.memory_space<smem>>
    %188 = vector.broadcast %187 : f32 to vector<16x16xf32>
    %189 = arith.mulf %188, %186 : vector<16x16xf32>
    %190 = arith.addf %176, %189 : vector<16x16xf32>
    %c87 = arith.constant 87 : index
    %191 = memref.load %arg2[%c87] : memref<225xf32, #tpu.memory_space<smem>>
    %192 = vector.broadcast %191 : f32 to vector<16x16xf32>
    %193 = arith.mulf %192, %186 : vector<16x16xf32>
    %194 = arith.addf %180, %193 : vector<16x16xf32>
    %c162 = arith.constant 162 : index
    %195 = memref.load %arg2[%c162] : memref<225xf32, #tpu.memory_space<smem>>
    %196 = vector.broadcast %195 : f32 to vector<16x16xf32>
    %197 = arith.mulf %196, %186 : vector<16x16xf32>
    %198 = arith.addf %184, %197 : vector<16x16xf32>
    %c0_54 = arith.constant 0 : index
    %c2_55 = arith.constant 2 : index
    %c3_56 = arith.constant 3 : index
    %199 = vector.load %arg5[%c0_54, %c2_55, %c3_56] : memref<3x20x20xf32, #tpu.memory_space<vmem>>, vector<1x16x16xf32>
    %200 = vector.shape_cast %199 : vector<1x16x16xf32> to vector<16x16xf32>
    %c13 = arith.constant 13 : index
    %201 = memref.load %arg2[%c13] : memref<225xf32, #tpu.memory_space<smem>>
    %202 = vector.broadcast %201 : f32 to vector<16x16xf32>
    %203 = arith.mulf %202, %200 : vector<16x16xf32>
    %204 = arith.addf %190, %203 : vector<16x16xf32>
    %c88 = arith.constant 88 : index
    %205 = memref.load %arg2[%c88] : memref<225xf32, #tpu.memory_space<smem>>
    %206 = vector.broadcast %205 : f32 to vector<16x16xf32>
    %207 = arith.mulf %206, %200 : vector<16x16xf32>
    %208 = arith.addf %194, %207 : vector<16x16xf32>
    %c163 = arith.constant 163 : index
    %209 = memref.load %arg2[%c163] : memref<225xf32, #tpu.memory_space<smem>>
    %210 = vector.broadcast %209 : f32 to vector<16x16xf32>
    %211 = arith.mulf %210, %200 : vector<16x16xf32>
    %212 = arith.addf %198, %211 : vector<16x16xf32>
    %c0_57 = arith.constant 0 : index
    %c2_58 = arith.constant 2 : index
    %c4_59 = arith.constant 4 : index
    %213 = vector.load %arg5[%c0_57, %c2_58, %c4_59] : memref<3x20x20xf32, #tpu.memory_space<vmem>>, vector<1x16x16xf32>
    %214 = vector.shape_cast %213 : vector<1x16x16xf32> to vector<16x16xf32>
    %c14 = arith.constant 14 : index
    %215 = memref.load %arg2[%c14] : memref<225xf32, #tpu.memory_space<smem>>
    %216 = vector.broadcast %215 : f32 to vector<16x16xf32>
    %217 = arith.mulf %216, %214 : vector<16x16xf32>
    %218 = arith.addf %204, %217 : vector<16x16xf32>
    %c89 = arith.constant 89 : index
    %219 = memref.load %arg2[%c89] : memref<225xf32, #tpu.memory_space<smem>>
    %220 = vector.broadcast %219 : f32 to vector<16x16xf32>
    %221 = arith.mulf %220, %214 : vector<16x16xf32>
    %222 = arith.addf %208, %221 : vector<16x16xf32>
    %c164 = arith.constant 164 : index
    %223 = memref.load %arg2[%c164] : memref<225xf32, #tpu.memory_space<smem>>
    %224 = vector.broadcast %223 : f32 to vector<16x16xf32>
    %225 = arith.mulf %224, %214 : vector<16x16xf32>
    %226 = arith.addf %212, %225 : vector<16x16xf32>
    %c0_60 = arith.constant 0 : index
    %c3_61 = arith.constant 3 : index
    %c0_62 = arith.constant 0 : index
    %227 = vector.load %arg5[%c0_60, %c3_61, %c0_62] : memref<3x20x20xf32, #tpu.memory_space<vmem>>, vector<1x16x16xf32>
    %228 = vector.shape_cast %227 : vector<1x16x16xf32> to vector<16x16xf32>
    %c15 = arith.constant 15 : index
    %229 = memref.load %arg2[%c15] : memref<225xf32, #tpu.memory_space<smem>>
    %230 = vector.broadcast %229 : f32 to vector<16x16xf32>
    %231 = arith.mulf %230, %228 : vector<16x16xf32>
    %232 = arith.addf %218, %231 : vector<16x16xf32>
    %c90 = arith.constant 90 : index
    %233 = memref.load %arg2[%c90] : memref<225xf32, #tpu.memory_space<smem>>
    %234 = vector.broadcast %233 : f32 to vector<16x16xf32>
    %235 = arith.mulf %234, %228 : vector<16x16xf32>
    %236 = arith.addf %222, %235 : vector<16x16xf32>
    %c165 = arith.constant 165 : index
    %237 = memref.load %arg2[%c165] : memref<225xf32, #tpu.memory_space<smem>>
    %238 = vector.broadcast %237 : f32 to vector<16x16xf32>
    %239 = arith.mulf %238, %228 : vector<16x16xf32>
    %240 = arith.addf %226, %239 : vector<16x16xf32>
    %c0_63 = arith.constant 0 : index
    %c3_64 = arith.constant 3 : index
    %c1_65 = arith.constant 1 : index
    %241 = vector.load %arg5[%c0_63, %c3_64, %c1_65] : memref<3x20x20xf32, #tpu.memory_space<vmem>>, vector<1x16x16xf32>
    %242 = vector.shape_cast %241 : vector<1x16x16xf32> to vector<16x16xf32>
    %c16 = arith.constant 16 : index
    %243 = memref.load %arg2[%c16] : memref<225xf32, #tpu.memory_space<smem>>
    %244 = vector.broadcast %243 : f32 to vector<16x16xf32>
    %245 = arith.mulf %244, %242 : vector<16x16xf32>
    %246 = arith.addf %232, %245 : vector<16x16xf32>
    %c91 = arith.constant 91 : index
    %247 = memref.load %arg2[%c91] : memref<225xf32, #tpu.memory_space<smem>>
    %248 = vector.broadcast %247 : f32 to vector<16x16xf32>
    %249 = arith.mulf %248, %242 : vector<16x16xf32>
    %250 = arith.addf %236, %249 : vector<16x16xf32>
    %c166 = arith.constant 166 : index
    %251 = memref.load %arg2[%c166] : memref<225xf32, #tpu.memory_space<smem>>
    %252 = vector.broadcast %251 : f32 to vector<16x16xf32>
    %253 = arith.mulf %252, %242 : vector<16x16xf32>
    %254 = arith.addf %240, %253 : vector<16x16xf32>
    %c0_66 = arith.constant 0 : index
    %c3_67 = arith.constant 3 : index
    %c2_68 = arith.constant 2 : index
    %255 = vector.load %arg5[%c0_66, %c3_67, %c2_68] : memref<3x20x20xf32, #tpu.memory_space<vmem>>, vector<1x16x16xf32>
    %256 = vector.shape_cast %255 : vector<1x16x16xf32> to vector<16x16xf32>
    %c17 = arith.constant 17 : index
    %257 = memref.load %arg2[%c17] : memref<225xf32, #tpu.memory_space<smem>>
    %258 = vector.broadcast %257 : f32 to vector<16x16xf32>
    %259 = arith.mulf %258, %256 : vector<16x16xf32>
    %260 = arith.addf %246, %259 : vector<16x16xf32>
    %c92 = arith.constant 92 : index
    %261 = memref.load %arg2[%c92] : memref<225xf32, #tpu.memory_space<smem>>
    %262 = vector.broadcast %261 : f32 to vector<16x16xf32>
    %263 = arith.mulf %262, %256 : vector<16x16xf32>
    %264 = arith.addf %250, %263 : vector<16x16xf32>
    %c167 = arith.constant 167 : index
    %265 = memref.load %arg2[%c167] : memref<225xf32, #tpu.memory_space<smem>>
    %266 = vector.broadcast %265 : f32 to vector<16x16xf32>
    %267 = arith.mulf %266, %256 : vector<16x16xf32>
    %268 = arith.addf %254, %267 : vector<16x16xf32>
    %c0_69 = arith.constant 0 : index
    %c3_70 = arith.constant 3 : index
    %c3_71 = arith.constant 3 : index
    %269 = vector.load %arg5[%c0_69, %c3_70, %c3_71] : memref<3x20x20xf32, #tpu.memory_space<vmem>>, vector<1x16x16xf32>
    %270 = vector.shape_cast %269 : vector<1x16x16xf32> to vector<16x16xf32>
    %c18 = arith.constant 18 : index
    %271 = memref.load %arg2[%c18] : memref<225xf32, #tpu.memory_space<smem>>
    %272 = vector.broadcast %271 : f32 to vector<16x16xf32>
    %273 = arith.mulf %272, %270 : vector<16x16xf32>
    %274 = arith.addf %260, %273 : vector<16x16xf32>
    %c93 = arith.constant 93 : index
    %275 = memref.load %arg2[%c93] : memref<225xf32, #tpu.memory_space<smem>>
    %276 = vector.broadcast %275 : f32 to vector<16x16xf32>
    %277 = arith.mulf %276, %270 : vector<16x16xf32>
    %278 = arith.addf %264, %277 : vector<16x16xf32>
    %c168 = arith.constant 168 : index
    %279 = memref.load %arg2[%c168] : memref<225xf32, #tpu.memory_space<smem>>
    %280 = vector.broadcast %279 : f32 to vector<16x16xf32>
    %281 = arith.mulf %280, %270 : vector<16x16xf32>
    %282 = arith.addf %268, %281 : vector<16x16xf32>
    %c0_72 = arith.constant 0 : index
    %c3_73 = arith.constant 3 : index
    %c4_74 = arith.constant 4 : index
    %283 = vector.load %arg5[%c0_72, %c3_73, %c4_74] : memref<3x20x20xf32, #tpu.memory_space<vmem>>, vector<1x16x16xf32>
    %284 = vector.shape_cast %283 : vector<1x16x16xf32> to vector<16x16xf32>
    %c19 = arith.constant 19 : index
    %285 = memref.load %arg2[%c19] : memref<225xf32, #tpu.memory_space<smem>>
    %286 = vector.broadcast %285 : f32 to vector<16x16xf32>
    %287 = arith.mulf %286, %284 : vector<16x16xf32>
    %288 = arith.addf %274, %287 : vector<16x16xf32>
    %c94 = arith.constant 94 : index
    %289 = memref.load %arg2[%c94] : memref<225xf32, #tpu.memory_space<smem>>
    %290 = vector.broadcast %289 : f32 to vector<16x16xf32>
    %291 = arith.mulf %290, %284 : vector<16x16xf32>
    %292 = arith.addf %278, %291 : vector<16x16xf32>
    %c169 = arith.constant 169 : index
    %293 = memref.load %arg2[%c169] : memref<225xf32, #tpu.memory_space<smem>>
    %294 = vector.broadcast %293 : f32 to vector<16x16xf32>
    %295 = arith.mulf %294, %284 : vector<16x16xf32>
    %296 = arith.addf %282, %295 : vector<16x16xf32>
    %c0_75 = arith.constant 0 : index
    %c4_76 = arith.constant 4 : index
    %c0_77 = arith.constant 0 : index
    %297 = vector.load %arg5[%c0_75, %c4_76, %c0_77] : memref<3x20x20xf32, #tpu.memory_space<vmem>>, vector<1x16x16xf32>
    %298 = vector.shape_cast %297 : vector<1x16x16xf32> to vector<16x16xf32>
    %c20 = arith.constant 20 : index
    %299 = memref.load %arg2[%c20] : memref<225xf32, #tpu.memory_space<smem>>
    %300 = vector.broadcast %299 : f32 to vector<16x16xf32>
    %301 = arith.mulf %300, %298 : vector<16x16xf32>
    %302 = arith.addf %288, %301 : vector<16x16xf32>
    %c95 = arith.constant 95 : index
    %303 = memref.load %arg2[%c95] : memref<225xf32, #tpu.memory_space<smem>>
    %304 = vector.broadcast %303 : f32 to vector<16x16xf32>
    %305 = arith.mulf %304, %298 : vector<16x16xf32>
    %306 = arith.addf %292, %305 : vector<16x16xf32>
    %c170 = arith.constant 170 : index
    %307 = memref.load %arg2[%c170] : memref<225xf32, #tpu.memory_space<smem>>
    %308 = vector.broadcast %307 : f32 to vector<16x16xf32>
    %309 = arith.mulf %308, %298 : vector<16x16xf32>
    %310 = arith.addf %296, %309 : vector<16x16xf32>
    %c0_78 = arith.constant 0 : index
    %c4_79 = arith.constant 4 : index
    %c1_80 = arith.constant 1 : index
    %311 = vector.load %arg5[%c0_78, %c4_79, %c1_80] : memref<3x20x20xf32, #tpu.memory_space<vmem>>, vector<1x16x16xf32>
    %312 = vector.shape_cast %311 : vector<1x16x16xf32> to vector<16x16xf32>
    %c21 = arith.constant 21 : index
    %313 = memref.load %arg2[%c21] : memref<225xf32, #tpu.memory_space<smem>>
    %314 = vector.broadcast %313 : f32 to vector<16x16xf32>
    %315 = arith.mulf %314, %312 : vector<16x16xf32>
    %316 = arith.addf %302, %315 : vector<16x16xf32>
    %c96 = arith.constant 96 : index
    %317 = memref.load %arg2[%c96] : memref<225xf32, #tpu.memory_space<smem>>
    %318 = vector.broadcast %317 : f32 to vector<16x16xf32>
    %319 = arith.mulf %318, %312 : vector<16x16xf32>
    %320 = arith.addf %306, %319 : vector<16x16xf32>
    %c171 = arith.constant 171 : index
    %321 = memref.load %arg2[%c171] : memref<225xf32, #tpu.memory_space<smem>>
    %322 = vector.broadcast %321 : f32 to vector<16x16xf32>
    %323 = arith.mulf %322, %312 : vector<16x16xf32>
    %324 = arith.addf %310, %323 : vector<16x16xf32>
    %c0_81 = arith.constant 0 : index
    %c4_82 = arith.constant 4 : index
    %c2_83 = arith.constant 2 : index
    %325 = vector.load %arg5[%c0_81, %c4_82, %c2_83] : memref<3x20x20xf32, #tpu.memory_space<vmem>>, vector<1x16x16xf32>
    %326 = vector.shape_cast %325 : vector<1x16x16xf32> to vector<16x16xf32>
    %c22 = arith.constant 22 : index
    %327 = memref.load %arg2[%c22] : memref<225xf32, #tpu.memory_space<smem>>
    %328 = vector.broadcast %327 : f32 to vector<16x16xf32>
    %329 = arith.mulf %328, %326 : vector<16x16xf32>
    %330 = arith.addf %316, %329 : vector<16x16xf32>
    %c97 = arith.constant 97 : index
    %331 = memref.load %arg2[%c97] : memref<225xf32, #tpu.memory_space<smem>>
    %332 = vector.broadcast %331 : f32 to vector<16x16xf32>
    %333 = arith.mulf %332, %326 : vector<16x16xf32>
    %334 = arith.addf %320, %333 : vector<16x16xf32>
    %c172 = arith.constant 172 : index
    %335 = memref.load %arg2[%c172] : memref<225xf32, #tpu.memory_space<smem>>
    %336 = vector.broadcast %335 : f32 to vector<16x16xf32>
    %337 = arith.mulf %336, %326 : vector<16x16xf32>
    %338 = arith.addf %324, %337 : vector<16x16xf32>
    %c0_84 = arith.constant 0 : index
    %c4_85 = arith.constant 4 : index
    %c3_86 = arith.constant 3 : index
    %339 = vector.load %arg5[%c0_84, %c4_85, %c3_86] : memref<3x20x20xf32, #tpu.memory_space<vmem>>, vector<1x16x16xf32>
    %340 = vector.shape_cast %339 : vector<1x16x16xf32> to vector<16x16xf32>
    %c23 = arith.constant 23 : index
    %341 = memref.load %arg2[%c23] : memref<225xf32, #tpu.memory_space<smem>>
    %342 = vector.broadcast %341 : f32 to vector<16x16xf32>
    %343 = arith.mulf %342, %340 : vector<16x16xf32>
    %344 = arith.addf %330, %343 : vector<16x16xf32>
    %c98 = arith.constant 98 : index
    %345 = memref.load %arg2[%c98] : memref<225xf32, #tpu.memory_space<smem>>
    %346 = vector.broadcast %345 : f32 to vector<16x16xf32>
    %347 = arith.mulf %346, %340 : vector<16x16xf32>
    %348 = arith.addf %334, %347 : vector<16x16xf32>
    %c173 = arith.constant 173 : index
    %349 = memref.load %arg2[%c173] : memref<225xf32, #tpu.memory_space<smem>>
    %350 = vector.broadcast %349 : f32 to vector<16x16xf32>
    %351 = arith.mulf %350, %340 : vector<16x16xf32>
    %352 = arith.addf %338, %351 : vector<16x16xf32>
    %c0_87 = arith.constant 0 : index
    %c4_88 = arith.constant 4 : index
    %c4_89 = arith.constant 4 : index
    %353 = vector.load %arg5[%c0_87, %c4_88, %c4_89] : memref<3x20x20xf32, #tpu.memory_space<vmem>>, vector<1x16x16xf32>
    %354 = vector.shape_cast %353 : vector<1x16x16xf32> to vector<16x16xf32>
    %c24 = arith.constant 24 : index
    %355 = memref.load %arg2[%c24] : memref<225xf32, #tpu.memory_space<smem>>
    %356 = vector.broadcast %355 : f32 to vector<16x16xf32>
    %357 = arith.mulf %356, %354 : vector<16x16xf32>
    %358 = arith.addf %344, %357 : vector<16x16xf32>
    %c99 = arith.constant 99 : index
    %359 = memref.load %arg2[%c99] : memref<225xf32, #tpu.memory_space<smem>>
    %360 = vector.broadcast %359 : f32 to vector<16x16xf32>
    %361 = arith.mulf %360, %354 : vector<16x16xf32>
    %362 = arith.addf %348, %361 : vector<16x16xf32>
    %c174 = arith.constant 174 : index
    %363 = memref.load %arg2[%c174] : memref<225xf32, #tpu.memory_space<smem>>
    %364 = vector.broadcast %363 : f32 to vector<16x16xf32>
    %365 = arith.mulf %364, %354 : vector<16x16xf32>
    %366 = arith.addf %352, %365 : vector<16x16xf32>
    %c1_90 = arith.constant 1 : index
    %c0_91 = arith.constant 0 : index
    %c0_92 = arith.constant 0 : index
    %367 = vector.load %arg5[%c1_90, %c0_91, %c0_92] : memref<3x20x20xf32, #tpu.memory_space<vmem>>, vector<1x16x16xf32>
    %368 = vector.shape_cast %367 : vector<1x16x16xf32> to vector<16x16xf32>
    %c25 = arith.constant 25 : index
    %369 = memref.load %arg2[%c25] : memref<225xf32, #tpu.memory_space<smem>>
    %370 = vector.broadcast %369 : f32 to vector<16x16xf32>
    %371 = arith.mulf %370, %368 : vector<16x16xf32>
    %372 = arith.addf %358, %371 : vector<16x16xf32>
    %c100 = arith.constant 100 : index
    %373 = memref.load %arg2[%c100] : memref<225xf32, #tpu.memory_space<smem>>
    %374 = vector.broadcast %373 : f32 to vector<16x16xf32>
    %375 = arith.mulf %374, %368 : vector<16x16xf32>
    %376 = arith.addf %362, %375 : vector<16x16xf32>
    %c175 = arith.constant 175 : index
    %377 = memref.load %arg2[%c175] : memref<225xf32, #tpu.memory_space<smem>>
    %378 = vector.broadcast %377 : f32 to vector<16x16xf32>
    %379 = arith.mulf %378, %368 : vector<16x16xf32>
    %380 = arith.addf %366, %379 : vector<16x16xf32>
    %c1_93 = arith.constant 1 : index
    %c0_94 = arith.constant 0 : index
    %c1_95 = arith.constant 1 : index
    %381 = vector.load %arg5[%c1_93, %c0_94, %c1_95] : memref<3x20x20xf32, #tpu.memory_space<vmem>>, vector<1x16x16xf32>
    %382 = vector.shape_cast %381 : vector<1x16x16xf32> to vector<16x16xf32>
    %c26 = arith.constant 26 : index
    %383 = memref.load %arg2[%c26] : memref<225xf32, #tpu.memory_space<smem>>
    %384 = vector.broadcast %383 : f32 to vector<16x16xf32>
    %385 = arith.mulf %384, %382 : vector<16x16xf32>
    %386 = arith.addf %372, %385 : vector<16x16xf32>
    %c101 = arith.constant 101 : index
    %387 = memref.load %arg2[%c101] : memref<225xf32, #tpu.memory_space<smem>>
    %388 = vector.broadcast %387 : f32 to vector<16x16xf32>
    %389 = arith.mulf %388, %382 : vector<16x16xf32>
    %390 = arith.addf %376, %389 : vector<16x16xf32>
    %c176 = arith.constant 176 : index
    %391 = memref.load %arg2[%c176] : memref<225xf32, #tpu.memory_space<smem>>
    %392 = vector.broadcast %391 : f32 to vector<16x16xf32>
    %393 = arith.mulf %392, %382 : vector<16x16xf32>
    %394 = arith.addf %380, %393 : vector<16x16xf32>
    %c1_96 = arith.constant 1 : index
    %c0_97 = arith.constant 0 : index
    %c2_98 = arith.constant 2 : index
    %395 = vector.load %arg5[%c1_96, %c0_97, %c2_98] : memref<3x20x20xf32, #tpu.memory_space<vmem>>, vector<1x16x16xf32>
    %396 = vector.shape_cast %395 : vector<1x16x16xf32> to vector<16x16xf32>
    %c27 = arith.constant 27 : index
    %397 = memref.load %arg2[%c27] : memref<225xf32, #tpu.memory_space<smem>>
    %398 = vector.broadcast %397 : f32 to vector<16x16xf32>
    %399 = arith.mulf %398, %396 : vector<16x16xf32>
    %400 = arith.addf %386, %399 : vector<16x16xf32>
    %c102 = arith.constant 102 : index
    %401 = memref.load %arg2[%c102] : memref<225xf32, #tpu.memory_space<smem>>
    %402 = vector.broadcast %401 : f32 to vector<16x16xf32>
    %403 = arith.mulf %402, %396 : vector<16x16xf32>
    %404 = arith.addf %390, %403 : vector<16x16xf32>
    %c177 = arith.constant 177 : index
    %405 = memref.load %arg2[%c177] : memref<225xf32, #tpu.memory_space<smem>>
    %406 = vector.broadcast %405 : f32 to vector<16x16xf32>
    %407 = arith.mulf %406, %396 : vector<16x16xf32>
    %408 = arith.addf %394, %407 : vector<16x16xf32>
    %c1_99 = arith.constant 1 : index
    %c0_100 = arith.constant 0 : index
    %c3_101 = arith.constant 3 : index
    %409 = vector.load %arg5[%c1_99, %c0_100, %c3_101] : memref<3x20x20xf32, #tpu.memory_space<vmem>>, vector<1x16x16xf32>
    %410 = vector.shape_cast %409 : vector<1x16x16xf32> to vector<16x16xf32>
    %c28 = arith.constant 28 : index
    %411 = memref.load %arg2[%c28] : memref<225xf32, #tpu.memory_space<smem>>
    %412 = vector.broadcast %411 : f32 to vector<16x16xf32>
    %413 = arith.mulf %412, %410 : vector<16x16xf32>
    %414 = arith.addf %400, %413 : vector<16x16xf32>
    %c103 = arith.constant 103 : index
    %415 = memref.load %arg2[%c103] : memref<225xf32, #tpu.memory_space<smem>>
    %416 = vector.broadcast %415 : f32 to vector<16x16xf32>
    %417 = arith.mulf %416, %410 : vector<16x16xf32>
    %418 = arith.addf %404, %417 : vector<16x16xf32>
    %c178 = arith.constant 178 : index
    %419 = memref.load %arg2[%c178] : memref<225xf32, #tpu.memory_space<smem>>
    %420 = vector.broadcast %419 : f32 to vector<16x16xf32>
    %421 = arith.mulf %420, %410 : vector<16x16xf32>
    %422 = arith.addf %408, %421 : vector<16x16xf32>
    %c1_102 = arith.constant 1 : index
    %c0_103 = arith.constant 0 : index
    %c4_104 = arith.constant 4 : index
    %423 = vector.load %arg5[%c1_102, %c0_103, %c4_104] : memref<3x20x20xf32, #tpu.memory_space<vmem>>, vector<1x16x16xf32>
    %424 = vector.shape_cast %423 : vector<1x16x16xf32> to vector<16x16xf32>
    %c29 = arith.constant 29 : index
    %425 = memref.load %arg2[%c29] : memref<225xf32, #tpu.memory_space<smem>>
    %426 = vector.broadcast %425 : f32 to vector<16x16xf32>
    %427 = arith.mulf %426, %424 : vector<16x16xf32>
    %428 = arith.addf %414, %427 : vector<16x16xf32>
    %c104 = arith.constant 104 : index
    %429 = memref.load %arg2[%c104] : memref<225xf32, #tpu.memory_space<smem>>
    %430 = vector.broadcast %429 : f32 to vector<16x16xf32>
    %431 = arith.mulf %430, %424 : vector<16x16xf32>
    %432 = arith.addf %418, %431 : vector<16x16xf32>
    %c179 = arith.constant 179 : index
    %433 = memref.load %arg2[%c179] : memref<225xf32, #tpu.memory_space<smem>>
    %434 = vector.broadcast %433 : f32 to vector<16x16xf32>
    %435 = arith.mulf %434, %424 : vector<16x16xf32>
    %436 = arith.addf %422, %435 : vector<16x16xf32>
    %c1_105 = arith.constant 1 : index
    %c1_106 = arith.constant 1 : index
    %c0_107 = arith.constant 0 : index
    %437 = vector.load %arg5[%c1_105, %c1_106, %c0_107] : memref<3x20x20xf32, #tpu.memory_space<vmem>>, vector<1x16x16xf32>
    %438 = vector.shape_cast %437 : vector<1x16x16xf32> to vector<16x16xf32>
    %c30 = arith.constant 30 : index
    %439 = memref.load %arg2[%c30] : memref<225xf32, #tpu.memory_space<smem>>
    %440 = vector.broadcast %439 : f32 to vector<16x16xf32>
    %441 = arith.mulf %440, %438 : vector<16x16xf32>
    %442 = arith.addf %428, %441 : vector<16x16xf32>
    %c105 = arith.constant 105 : index
    %443 = memref.load %arg2[%c105] : memref<225xf32, #tpu.memory_space<smem>>
    %444 = vector.broadcast %443 : f32 to vector<16x16xf32>
    %445 = arith.mulf %444, %438 : vector<16x16xf32>
    %446 = arith.addf %432, %445 : vector<16x16xf32>
    %c180 = arith.constant 180 : index
    %447 = memref.load %arg2[%c180] : memref<225xf32, #tpu.memory_space<smem>>
    %448 = vector.broadcast %447 : f32 to vector<16x16xf32>
    %449 = arith.mulf %448, %438 : vector<16x16xf32>
    %450 = arith.addf %436, %449 : vector<16x16xf32>
    %c1_108 = arith.constant 1 : index
    %c1_109 = arith.constant 1 : index
    %c1_110 = arith.constant 1 : index
    %451 = vector.load %arg5[%c1_108, %c1_109, %c1_110] : memref<3x20x20xf32, #tpu.memory_space<vmem>>, vector<1x16x16xf32>
    %452 = vector.shape_cast %451 : vector<1x16x16xf32> to vector<16x16xf32>
    %c31 = arith.constant 31 : index
    %453 = memref.load %arg2[%c31] : memref<225xf32, #tpu.memory_space<smem>>
    %454 = vector.broadcast %453 : f32 to vector<16x16xf32>
    %455 = arith.mulf %454, %452 : vector<16x16xf32>
    %456 = arith.addf %442, %455 : vector<16x16xf32>
    %c106 = arith.constant 106 : index
    %457 = memref.load %arg2[%c106] : memref<225xf32, #tpu.memory_space<smem>>
    %458 = vector.broadcast %457 : f32 to vector<16x16xf32>
    %459 = arith.mulf %458, %452 : vector<16x16xf32>
    %460 = arith.addf %446, %459 : vector<16x16xf32>
    %c181 = arith.constant 181 : index
    %461 = memref.load %arg2[%c181] : memref<225xf32, #tpu.memory_space<smem>>
    %462 = vector.broadcast %461 : f32 to vector<16x16xf32>
    %463 = arith.mulf %462, %452 : vector<16x16xf32>
    %464 = arith.addf %450, %463 : vector<16x16xf32>
    %c1_111 = arith.constant 1 : index
    %c1_112 = arith.constant 1 : index
    %c2_113 = arith.constant 2 : index
    %465 = vector.load %arg5[%c1_111, %c1_112, %c2_113] : memref<3x20x20xf32, #tpu.memory_space<vmem>>, vector<1x16x16xf32>
    %466 = vector.shape_cast %465 : vector<1x16x16xf32> to vector<16x16xf32>
    %c32 = arith.constant 32 : index
    %467 = memref.load %arg2[%c32] : memref<225xf32, #tpu.memory_space<smem>>
    %468 = vector.broadcast %467 : f32 to vector<16x16xf32>
    %469 = arith.mulf %468, %466 : vector<16x16xf32>
    %470 = arith.addf %456, %469 : vector<16x16xf32>
    %c107 = arith.constant 107 : index
    %471 = memref.load %arg2[%c107] : memref<225xf32, #tpu.memory_space<smem>>
    %472 = vector.broadcast %471 : f32 to vector<16x16xf32>
    %473 = arith.mulf %472, %466 : vector<16x16xf32>
    %474 = arith.addf %460, %473 : vector<16x16xf32>
    %c182 = arith.constant 182 : index
    %475 = memref.load %arg2[%c182] : memref<225xf32, #tpu.memory_space<smem>>
    %476 = vector.broadcast %475 : f32 to vector<16x16xf32>
    %477 = arith.mulf %476, %466 : vector<16x16xf32>
    %478 = arith.addf %464, %477 : vector<16x16xf32>
    %c1_114 = arith.constant 1 : index
    %c1_115 = arith.constant 1 : index
    %c3_116 = arith.constant 3 : index
    %479 = vector.load %arg5[%c1_114, %c1_115, %c3_116] : memref<3x20x20xf32, #tpu.memory_space<vmem>>, vector<1x16x16xf32>
    %480 = vector.shape_cast %479 : vector<1x16x16xf32> to vector<16x16xf32>
    %c33 = arith.constant 33 : index
    %481 = memref.load %arg2[%c33] : memref<225xf32, #tpu.memory_space<smem>>
    %482 = vector.broadcast %481 : f32 to vector<16x16xf32>
    %483 = arith.mulf %482, %480 : vector<16x16xf32>
    %484 = arith.addf %470, %483 : vector<16x16xf32>
    %c108 = arith.constant 108 : index
    %485 = memref.load %arg2[%c108] : memref<225xf32, #tpu.memory_space<smem>>
    %486 = vector.broadcast %485 : f32 to vector<16x16xf32>
    %487 = arith.mulf %486, %480 : vector<16x16xf32>
    %488 = arith.addf %474, %487 : vector<16x16xf32>
    %c183 = arith.constant 183 : index
    %489 = memref.load %arg2[%c183] : memref<225xf32, #tpu.memory_space<smem>>
    %490 = vector.broadcast %489 : f32 to vector<16x16xf32>
    %491 = arith.mulf %490, %480 : vector<16x16xf32>
    %492 = arith.addf %478, %491 : vector<16x16xf32>
    %c1_117 = arith.constant 1 : index
    %c1_118 = arith.constant 1 : index
    %c4_119 = arith.constant 4 : index
    %493 = vector.load %arg5[%c1_117, %c1_118, %c4_119] : memref<3x20x20xf32, #tpu.memory_space<vmem>>, vector<1x16x16xf32>
    %494 = vector.shape_cast %493 : vector<1x16x16xf32> to vector<16x16xf32>
    %c34 = arith.constant 34 : index
    %495 = memref.load %arg2[%c34] : memref<225xf32, #tpu.memory_space<smem>>
    %496 = vector.broadcast %495 : f32 to vector<16x16xf32>
    %497 = arith.mulf %496, %494 : vector<16x16xf32>
    %498 = arith.addf %484, %497 : vector<16x16xf32>
    %c109 = arith.constant 109 : index
    %499 = memref.load %arg2[%c109] : memref<225xf32, #tpu.memory_space<smem>>
    %500 = vector.broadcast %499 : f32 to vector<16x16xf32>
    %501 = arith.mulf %500, %494 : vector<16x16xf32>
    %502 = arith.addf %488, %501 : vector<16x16xf32>
    %c184 = arith.constant 184 : index
    %503 = memref.load %arg2[%c184] : memref<225xf32, #tpu.memory_space<smem>>
    %504 = vector.broadcast %503 : f32 to vector<16x16xf32>
    %505 = arith.mulf %504, %494 : vector<16x16xf32>
    %506 = arith.addf %492, %505 : vector<16x16xf32>
    %c1_120 = arith.constant 1 : index
    %c2_121 = arith.constant 2 : index
    %c0_122 = arith.constant 0 : index
    %507 = vector.load %arg5[%c1_120, %c2_121, %c0_122] : memref<3x20x20xf32, #tpu.memory_space<vmem>>, vector<1x16x16xf32>
    %508 = vector.shape_cast %507 : vector<1x16x16xf32> to vector<16x16xf32>
    %c35 = arith.constant 35 : index
    %509 = memref.load %arg2[%c35] : memref<225xf32, #tpu.memory_space<smem>>
    %510 = vector.broadcast %509 : f32 to vector<16x16xf32>
    %511 = arith.mulf %510, %508 : vector<16x16xf32>
    %512 = arith.addf %498, %511 : vector<16x16xf32>
    %c110 = arith.constant 110 : index
    %513 = memref.load %arg2[%c110] : memref<225xf32, #tpu.memory_space<smem>>
    %514 = vector.broadcast %513 : f32 to vector<16x16xf32>
    %515 = arith.mulf %514, %508 : vector<16x16xf32>
    %516 = arith.addf %502, %515 : vector<16x16xf32>
    %c185 = arith.constant 185 : index
    %517 = memref.load %arg2[%c185] : memref<225xf32, #tpu.memory_space<smem>>
    %518 = vector.broadcast %517 : f32 to vector<16x16xf32>
    %519 = arith.mulf %518, %508 : vector<16x16xf32>
    %520 = arith.addf %506, %519 : vector<16x16xf32>
    %c1_123 = arith.constant 1 : index
    %c2_124 = arith.constant 2 : index
    %c1_125 = arith.constant 1 : index
    %521 = vector.load %arg5[%c1_123, %c2_124, %c1_125] : memref<3x20x20xf32, #tpu.memory_space<vmem>>, vector<1x16x16xf32>
    %522 = vector.shape_cast %521 : vector<1x16x16xf32> to vector<16x16xf32>
    %c36 = arith.constant 36 : index
    %523 = memref.load %arg2[%c36] : memref<225xf32, #tpu.memory_space<smem>>
    %524 = vector.broadcast %523 : f32 to vector<16x16xf32>
    %525 = arith.mulf %524, %522 : vector<16x16xf32>
    %526 = arith.addf %512, %525 : vector<16x16xf32>
    %c111 = arith.constant 111 : index
    %527 = memref.load %arg2[%c111] : memref<225xf32, #tpu.memory_space<smem>>
    %528 = vector.broadcast %527 : f32 to vector<16x16xf32>
    %529 = arith.mulf %528, %522 : vector<16x16xf32>
    %530 = arith.addf %516, %529 : vector<16x16xf32>
    %c186 = arith.constant 186 : index
    %531 = memref.load %arg2[%c186] : memref<225xf32, #tpu.memory_space<smem>>
    %532 = vector.broadcast %531 : f32 to vector<16x16xf32>
    %533 = arith.mulf %532, %522 : vector<16x16xf32>
    %534 = arith.addf %520, %533 : vector<16x16xf32>
    %c1_126 = arith.constant 1 : index
    %c2_127 = arith.constant 2 : index
    %c2_128 = arith.constant 2 : index
    %535 = vector.load %arg5[%c1_126, %c2_127, %c2_128] : memref<3x20x20xf32, #tpu.memory_space<vmem>>, vector<1x16x16xf32>
    %536 = vector.shape_cast %535 : vector<1x16x16xf32> to vector<16x16xf32>
    %c37 = arith.constant 37 : index
    %537 = memref.load %arg2[%c37] : memref<225xf32, #tpu.memory_space<smem>>
    %538 = vector.broadcast %537 : f32 to vector<16x16xf32>
    %539 = arith.mulf %538, %536 : vector<16x16xf32>
    %540 = arith.addf %526, %539 : vector<16x16xf32>
    %c112 = arith.constant 112 : index
    %541 = memref.load %arg2[%c112] : memref<225xf32, #tpu.memory_space<smem>>
    %542 = vector.broadcast %541 : f32 to vector<16x16xf32>
    %543 = arith.mulf %542, %536 : vector<16x16xf32>
    %544 = arith.addf %530, %543 : vector<16x16xf32>
    %c187 = arith.constant 187 : index
    %545 = memref.load %arg2[%c187] : memref<225xf32, #tpu.memory_space<smem>>
    %546 = vector.broadcast %545 : f32 to vector<16x16xf32>
    %547 = arith.mulf %546, %536 : vector<16x16xf32>
    %548 = arith.addf %534, %547 : vector<16x16xf32>
    %c1_129 = arith.constant 1 : index
    %c2_130 = arith.constant 2 : index
    %c3_131 = arith.constant 3 : index
    %549 = vector.load %arg5[%c1_129, %c2_130, %c3_131] : memref<3x20x20xf32, #tpu.memory_space<vmem>>, vector<1x16x16xf32>
    %550 = vector.shape_cast %549 : vector<1x16x16xf32> to vector<16x16xf32>
    %c38 = arith.constant 38 : index
    %551 = memref.load %arg2[%c38] : memref<225xf32, #tpu.memory_space<smem>>
    %552 = vector.broadcast %551 : f32 to vector<16x16xf32>
    %553 = arith.mulf %552, %550 : vector<16x16xf32>
    %554 = arith.addf %540, %553 : vector<16x16xf32>
    %c113 = arith.constant 113 : index
    %555 = memref.load %arg2[%c113] : memref<225xf32, #tpu.memory_space<smem>>
    %556 = vector.broadcast %555 : f32 to vector<16x16xf32>
    %557 = arith.mulf %556, %550 : vector<16x16xf32>
    %558 = arith.addf %544, %557 : vector<16x16xf32>
    %c188 = arith.constant 188 : index
    %559 = memref.load %arg2[%c188] : memref<225xf32, #tpu.memory_space<smem>>
    %560 = vector.broadcast %559 : f32 to vector<16x16xf32>
    %561 = arith.mulf %560, %550 : vector<16x16xf32>
    %562 = arith.addf %548, %561 : vector<16x16xf32>
    %c1_132 = arith.constant 1 : index
    %c2_133 = arith.constant 2 : index
    %c4_134 = arith.constant 4 : index
    %563 = vector.load %arg5[%c1_132, %c2_133, %c4_134] : memref<3x20x20xf32, #tpu.memory_space<vmem>>, vector<1x16x16xf32>
    %564 = vector.shape_cast %563 : vector<1x16x16xf32> to vector<16x16xf32>
    %c39 = arith.constant 39 : index
    %565 = memref.load %arg2[%c39] : memref<225xf32, #tpu.memory_space<smem>>
    %566 = vector.broadcast %565 : f32 to vector<16x16xf32>
    %567 = arith.mulf %566, %564 : vector<16x16xf32>
    %568 = arith.addf %554, %567 : vector<16x16xf32>
    %c114 = arith.constant 114 : index
    %569 = memref.load %arg2[%c114] : memref<225xf32, #tpu.memory_space<smem>>
    %570 = vector.broadcast %569 : f32 to vector<16x16xf32>
    %571 = arith.mulf %570, %564 : vector<16x16xf32>
    %572 = arith.addf %558, %571 : vector<16x16xf32>
    %c189 = arith.constant 189 : index
    %573 = memref.load %arg2[%c189] : memref<225xf32, #tpu.memory_space<smem>>
    %574 = vector.broadcast %573 : f32 to vector<16x16xf32>
    %575 = arith.mulf %574, %564 : vector<16x16xf32>
    %576 = arith.addf %562, %575 : vector<16x16xf32>
    %c1_135 = arith.constant 1 : index
    %c3_136 = arith.constant 3 : index
    %c0_137 = arith.constant 0 : index
    %577 = vector.load %arg5[%c1_135, %c3_136, %c0_137] : memref<3x20x20xf32, #tpu.memory_space<vmem>>, vector<1x16x16xf32>
    %578 = vector.shape_cast %577 : vector<1x16x16xf32> to vector<16x16xf32>
    %c40 = arith.constant 40 : index
    %579 = memref.load %arg2[%c40] : memref<225xf32, #tpu.memory_space<smem>>
    %580 = vector.broadcast %579 : f32 to vector<16x16xf32>
    %581 = arith.mulf %580, %578 : vector<16x16xf32>
    %582 = arith.addf %568, %581 : vector<16x16xf32>
    %c115 = arith.constant 115 : index
    %583 = memref.load %arg2[%c115] : memref<225xf32, #tpu.memory_space<smem>>
    %584 = vector.broadcast %583 : f32 to vector<16x16xf32>
    %585 = arith.mulf %584, %578 : vector<16x16xf32>
    %586 = arith.addf %572, %585 : vector<16x16xf32>
    %c190 = arith.constant 190 : index
    %587 = memref.load %arg2[%c190] : memref<225xf32, #tpu.memory_space<smem>>
    %588 = vector.broadcast %587 : f32 to vector<16x16xf32>
    %589 = arith.mulf %588, %578 : vector<16x16xf32>
    %590 = arith.addf %576, %589 : vector<16x16xf32>
    %c1_138 = arith.constant 1 : index
    %c3_139 = arith.constant 3 : index
    %c1_140 = arith.constant 1 : index
    %591 = vector.load %arg5[%c1_138, %c3_139, %c1_140] : memref<3x20x20xf32, #tpu.memory_space<vmem>>, vector<1x16x16xf32>
    %592 = vector.shape_cast %591 : vector<1x16x16xf32> to vector<16x16xf32>
    %c41 = arith.constant 41 : index
    %593 = memref.load %arg2[%c41] : memref<225xf32, #tpu.memory_space<smem>>
    %594 = vector.broadcast %593 : f32 to vector<16x16xf32>
    %595 = arith.mulf %594, %592 : vector<16x16xf32>
    %596 = arith.addf %582, %595 : vector<16x16xf32>
    %c116 = arith.constant 116 : index
    %597 = memref.load %arg2[%c116] : memref<225xf32, #tpu.memory_space<smem>>
    %598 = vector.broadcast %597 : f32 to vector<16x16xf32>
    %599 = arith.mulf %598, %592 : vector<16x16xf32>
    %600 = arith.addf %586, %599 : vector<16x16xf32>
    %c191 = arith.constant 191 : index
    %601 = memref.load %arg2[%c191] : memref<225xf32, #tpu.memory_space<smem>>
    %602 = vector.broadcast %601 : f32 to vector<16x16xf32>
    %603 = arith.mulf %602, %592 : vector<16x16xf32>
    %604 = arith.addf %590, %603 : vector<16x16xf32>
    %c1_141 = arith.constant 1 : index
    %c3_142 = arith.constant 3 : index
    %c2_143 = arith.constant 2 : index
    %605 = vector.load %arg5[%c1_141, %c3_142, %c2_143] : memref<3x20x20xf32, #tpu.memory_space<vmem>>, vector<1x16x16xf32>
    %606 = vector.shape_cast %605 : vector<1x16x16xf32> to vector<16x16xf32>
    %c42 = arith.constant 42 : index
    %607 = memref.load %arg2[%c42] : memref<225xf32, #tpu.memory_space<smem>>
    %608 = vector.broadcast %607 : f32 to vector<16x16xf32>
    %609 = arith.mulf %608, %606 : vector<16x16xf32>
    %610 = arith.addf %596, %609 : vector<16x16xf32>
    %c117 = arith.constant 117 : index
    %611 = memref.load %arg2[%c117] : memref<225xf32, #tpu.memory_space<smem>>
    %612 = vector.broadcast %611 : f32 to vector<16x16xf32>
    %613 = arith.mulf %612, %606 : vector<16x16xf32>
    %614 = arith.addf %600, %613 : vector<16x16xf32>
    %c192 = arith.constant 192 : index
    %615 = memref.load %arg2[%c192] : memref<225xf32, #tpu.memory_space<smem>>
    %616 = vector.broadcast %615 : f32 to vector<16x16xf32>
    %617 = arith.mulf %616, %606 : vector<16x16xf32>
    %618 = arith.addf %604, %617 : vector<16x16xf32>
    %c1_144 = arith.constant 1 : index
    %c3_145 = arith.constant 3 : index
    %c3_146 = arith.constant 3 : index
    %619 = vector.load %arg5[%c1_144, %c3_145, %c3_146] : memref<3x20x20xf32, #tpu.memory_space<vmem>>, vector<1x16x16xf32>
    %620 = vector.shape_cast %619 : vector<1x16x16xf32> to vector<16x16xf32>
    %c43 = arith.constant 43 : index
    %621 = memref.load %arg2[%c43] : memref<225xf32, #tpu.memory_space<smem>>
    %622 = vector.broadcast %621 : f32 to vector<16x16xf32>
    %623 = arith.mulf %622, %620 : vector<16x16xf32>
    %624 = arith.addf %610, %623 : vector<16x16xf32>
    %c118 = arith.constant 118 : index
    %625 = memref.load %arg2[%c118] : memref<225xf32, #tpu.memory_space<smem>>
    %626 = vector.broadcast %625 : f32 to vector<16x16xf32>
    %627 = arith.mulf %626, %620 : vector<16x16xf32>
    %628 = arith.addf %614, %627 : vector<16x16xf32>
    %c193 = arith.constant 193 : index
    %629 = memref.load %arg2[%c193] : memref<225xf32, #tpu.memory_space<smem>>
    %630 = vector.broadcast %629 : f32 to vector<16x16xf32>
    %631 = arith.mulf %630, %620 : vector<16x16xf32>
    %632 = arith.addf %618, %631 : vector<16x16xf32>
    %c1_147 = arith.constant 1 : index
    %c3_148 = arith.constant 3 : index
    %c4_149 = arith.constant 4 : index
    %633 = vector.load %arg5[%c1_147, %c3_148, %c4_149] : memref<3x20x20xf32, #tpu.memory_space<vmem>>, vector<1x16x16xf32>
    %634 = vector.shape_cast %633 : vector<1x16x16xf32> to vector<16x16xf32>
    %c44 = arith.constant 44 : index
    %635 = memref.load %arg2[%c44] : memref<225xf32, #tpu.memory_space<smem>>
    %636 = vector.broadcast %635 : f32 to vector<16x16xf32>
    %637 = arith.mulf %636, %634 : vector<16x16xf32>
    %638 = arith.addf %624, %637 : vector<16x16xf32>
    %c119 = arith.constant 119 : index
    %639 = memref.load %arg2[%c119] : memref<225xf32, #tpu.memory_space<smem>>
    %640 = vector.broadcast %639 : f32 to vector<16x16xf32>
    %641 = arith.mulf %640, %634 : vector<16x16xf32>
    %642 = arith.addf %628, %641 : vector<16x16xf32>
    %c194 = arith.constant 194 : index
    %643 = memref.load %arg2[%c194] : memref<225xf32, #tpu.memory_space<smem>>
    %644 = vector.broadcast %643 : f32 to vector<16x16xf32>
    %645 = arith.mulf %644, %634 : vector<16x16xf32>
    %646 = arith.addf %632, %645 : vector<16x16xf32>
    %c1_150 = arith.constant 1 : index
    %c4_151 = arith.constant 4 : index
    %c0_152 = arith.constant 0 : index
    %647 = vector.load %arg5[%c1_150, %c4_151, %c0_152] : memref<3x20x20xf32, #tpu.memory_space<vmem>>, vector<1x16x16xf32>
    %648 = vector.shape_cast %647 : vector<1x16x16xf32> to vector<16x16xf32>
    %c45 = arith.constant 45 : index
    %649 = memref.load %arg2[%c45] : memref<225xf32, #tpu.memory_space<smem>>
    %650 = vector.broadcast %649 : f32 to vector<16x16xf32>
    %651 = arith.mulf %650, %648 : vector<16x16xf32>
    %652 = arith.addf %638, %651 : vector<16x16xf32>
    %c120 = arith.constant 120 : index
    %653 = memref.load %arg2[%c120] : memref<225xf32, #tpu.memory_space<smem>>
    %654 = vector.broadcast %653 : f32 to vector<16x16xf32>
    %655 = arith.mulf %654, %648 : vector<16x16xf32>
    %656 = arith.addf %642, %655 : vector<16x16xf32>
    %c195 = arith.constant 195 : index
    %657 = memref.load %arg2[%c195] : memref<225xf32, #tpu.memory_space<smem>>
    %658 = vector.broadcast %657 : f32 to vector<16x16xf32>
    %659 = arith.mulf %658, %648 : vector<16x16xf32>
    %660 = arith.addf %646, %659 : vector<16x16xf32>
    %c1_153 = arith.constant 1 : index
    %c4_154 = arith.constant 4 : index
    %c1_155 = arith.constant 1 : index
    %661 = vector.load %arg5[%c1_153, %c4_154, %c1_155] : memref<3x20x20xf32, #tpu.memory_space<vmem>>, vector<1x16x16xf32>
    %662 = vector.shape_cast %661 : vector<1x16x16xf32> to vector<16x16xf32>
    %c46 = arith.constant 46 : index
    %663 = memref.load %arg2[%c46] : memref<225xf32, #tpu.memory_space<smem>>
    %664 = vector.broadcast %663 : f32 to vector<16x16xf32>
    %665 = arith.mulf %664, %662 : vector<16x16xf32>
    %666 = arith.addf %652, %665 : vector<16x16xf32>
    %c121 = arith.constant 121 : index
    %667 = memref.load %arg2[%c121] : memref<225xf32, #tpu.memory_space<smem>>
    %668 = vector.broadcast %667 : f32 to vector<16x16xf32>
    %669 = arith.mulf %668, %662 : vector<16x16xf32>
    %670 = arith.addf %656, %669 : vector<16x16xf32>
    %c196 = arith.constant 196 : index
    %671 = memref.load %arg2[%c196] : memref<225xf32, #tpu.memory_space<smem>>
    %672 = vector.broadcast %671 : f32 to vector<16x16xf32>
    %673 = arith.mulf %672, %662 : vector<16x16xf32>
    %674 = arith.addf %660, %673 : vector<16x16xf32>
    %c1_156 = arith.constant 1 : index
    %c4_157 = arith.constant 4 : index
    %c2_158 = arith.constant 2 : index
    %675 = vector.load %arg5[%c1_156, %c4_157, %c2_158] : memref<3x20x20xf32, #tpu.memory_space<vmem>>, vector<1x16x16xf32>
    %676 = vector.shape_cast %675 : vector<1x16x16xf32> to vector<16x16xf32>
    %c47 = arith.constant 47 : index
    %677 = memref.load %arg2[%c47] : memref<225xf32, #tpu.memory_space<smem>>
    %678 = vector.broadcast %677 : f32 to vector<16x16xf32>
    %679 = arith.mulf %678, %676 : vector<16x16xf32>
    %680 = arith.addf %666, %679 : vector<16x16xf32>
    %c122 = arith.constant 122 : index
    %681 = memref.load %arg2[%c122] : memref<225xf32, #tpu.memory_space<smem>>
    %682 = vector.broadcast %681 : f32 to vector<16x16xf32>
    %683 = arith.mulf %682, %676 : vector<16x16xf32>
    %684 = arith.addf %670, %683 : vector<16x16xf32>
    %c197 = arith.constant 197 : index
    %685 = memref.load %arg2[%c197] : memref<225xf32, #tpu.memory_space<smem>>
    %686 = vector.broadcast %685 : f32 to vector<16x16xf32>
    %687 = arith.mulf %686, %676 : vector<16x16xf32>
    %688 = arith.addf %674, %687 : vector<16x16xf32>
    %c1_159 = arith.constant 1 : index
    %c4_160 = arith.constant 4 : index
    %c3_161 = arith.constant 3 : index
    %689 = vector.load %arg5[%c1_159, %c4_160, %c3_161] : memref<3x20x20xf32, #tpu.memory_space<vmem>>, vector<1x16x16xf32>
    %690 = vector.shape_cast %689 : vector<1x16x16xf32> to vector<16x16xf32>
    %c48 = arith.constant 48 : index
    %691 = memref.load %arg2[%c48] : memref<225xf32, #tpu.memory_space<smem>>
    %692 = vector.broadcast %691 : f32 to vector<16x16xf32>
    %693 = arith.mulf %692, %690 : vector<16x16xf32>
    %694 = arith.addf %680, %693 : vector<16x16xf32>
    %c123 = arith.constant 123 : index
    %695 = memref.load %arg2[%c123] : memref<225xf32, #tpu.memory_space<smem>>
    %696 = vector.broadcast %695 : f32 to vector<16x16xf32>
    %697 = arith.mulf %696, %690 : vector<16x16xf32>
    %698 = arith.addf %684, %697 : vector<16x16xf32>
    %c198 = arith.constant 198 : index
    %699 = memref.load %arg2[%c198] : memref<225xf32, #tpu.memory_space<smem>>
    %700 = vector.broadcast %699 : f32 to vector<16x16xf32>
    %701 = arith.mulf %700, %690 : vector<16x16xf32>
    %702 = arith.addf %688, %701 : vector<16x16xf32>
    %c1_162 = arith.constant 1 : index
    %c4_163 = arith.constant 4 : index
    %c4_164 = arith.constant 4 : index
    %703 = vector.load %arg5[%c1_162, %c4_163, %c4_164] : memref<3x20x20xf32, #tpu.memory_space<vmem>>, vector<1x16x16xf32>
    %704 = vector.shape_cast %703 : vector<1x16x16xf32> to vector<16x16xf32>
    %c49 = arith.constant 49 : index
    %705 = memref.load %arg2[%c49] : memref<225xf32, #tpu.memory_space<smem>>
    %706 = vector.broadcast %705 : f32 to vector<16x16xf32>
    %707 = arith.mulf %706, %704 : vector<16x16xf32>
    %708 = arith.addf %694, %707 : vector<16x16xf32>
    %c124 = arith.constant 124 : index
    %709 = memref.load %arg2[%c124] : memref<225xf32, #tpu.memory_space<smem>>
    %710 = vector.broadcast %709 : f32 to vector<16x16xf32>
    %711 = arith.mulf %710, %704 : vector<16x16xf32>
    %712 = arith.addf %698, %711 : vector<16x16xf32>
    %c199 = arith.constant 199 : index
    %713 = memref.load %arg2[%c199] : memref<225xf32, #tpu.memory_space<smem>>
    %714 = vector.broadcast %713 : f32 to vector<16x16xf32>
    %715 = arith.mulf %714, %704 : vector<16x16xf32>
    %716 = arith.addf %702, %715 : vector<16x16xf32>
    %c2_165 = arith.constant 2 : index
    %c0_166 = arith.constant 0 : index
    %c0_167 = arith.constant 0 : index
    %717 = vector.load %arg5[%c2_165, %c0_166, %c0_167] : memref<3x20x20xf32, #tpu.memory_space<vmem>>, vector<1x16x16xf32>
    %718 = vector.shape_cast %717 : vector<1x16x16xf32> to vector<16x16xf32>
    %c50 = arith.constant 50 : index
    %719 = memref.load %arg2[%c50] : memref<225xf32, #tpu.memory_space<smem>>
    %720 = vector.broadcast %719 : f32 to vector<16x16xf32>
    %721 = arith.mulf %720, %718 : vector<16x16xf32>
    %722 = arith.addf %708, %721 : vector<16x16xf32>
    %c125 = arith.constant 125 : index
    %723 = memref.load %arg2[%c125] : memref<225xf32, #tpu.memory_space<smem>>
    %724 = vector.broadcast %723 : f32 to vector<16x16xf32>
    %725 = arith.mulf %724, %718 : vector<16x16xf32>
    %726 = arith.addf %712, %725 : vector<16x16xf32>
    %c200 = arith.constant 200 : index
    %727 = memref.load %arg2[%c200] : memref<225xf32, #tpu.memory_space<smem>>
    %728 = vector.broadcast %727 : f32 to vector<16x16xf32>
    %729 = arith.mulf %728, %718 : vector<16x16xf32>
    %730 = arith.addf %716, %729 : vector<16x16xf32>
    %c2_168 = arith.constant 2 : index
    %c0_169 = arith.constant 0 : index
    %c1_170 = arith.constant 1 : index
    %731 = vector.load %arg5[%c2_168, %c0_169, %c1_170] : memref<3x20x20xf32, #tpu.memory_space<vmem>>, vector<1x16x16xf32>
    %732 = vector.shape_cast %731 : vector<1x16x16xf32> to vector<16x16xf32>
    %c51 = arith.constant 51 : index
    %733 = memref.load %arg2[%c51] : memref<225xf32, #tpu.memory_space<smem>>
    %734 = vector.broadcast %733 : f32 to vector<16x16xf32>
    %735 = arith.mulf %734, %732 : vector<16x16xf32>
    %736 = arith.addf %722, %735 : vector<16x16xf32>
    %c126 = arith.constant 126 : index
    %737 = memref.load %arg2[%c126] : memref<225xf32, #tpu.memory_space<smem>>
    %738 = vector.broadcast %737 : f32 to vector<16x16xf32>
    %739 = arith.mulf %738, %732 : vector<16x16xf32>
    %740 = arith.addf %726, %739 : vector<16x16xf32>
    %c201 = arith.constant 201 : index
    %741 = memref.load %arg2[%c201] : memref<225xf32, #tpu.memory_space<smem>>
    %742 = vector.broadcast %741 : f32 to vector<16x16xf32>
    %743 = arith.mulf %742, %732 : vector<16x16xf32>
    %744 = arith.addf %730, %743 : vector<16x16xf32>
    %c2_171 = arith.constant 2 : index
    %c0_172 = arith.constant 0 : index
    %c2_173 = arith.constant 2 : index
    %745 = vector.load %arg5[%c2_171, %c0_172, %c2_173] : memref<3x20x20xf32, #tpu.memory_space<vmem>>, vector<1x16x16xf32>
    %746 = vector.shape_cast %745 : vector<1x16x16xf32> to vector<16x16xf32>
    %c52 = arith.constant 52 : index
    %747 = memref.load %arg2[%c52] : memref<225xf32, #tpu.memory_space<smem>>
    %748 = vector.broadcast %747 : f32 to vector<16x16xf32>
    %749 = arith.mulf %748, %746 : vector<16x16xf32>
    %750 = arith.addf %736, %749 : vector<16x16xf32>
    %c127 = arith.constant 127 : index
    %751 = memref.load %arg2[%c127] : memref<225xf32, #tpu.memory_space<smem>>
    %752 = vector.broadcast %751 : f32 to vector<16x16xf32>
    %753 = arith.mulf %752, %746 : vector<16x16xf32>
    %754 = arith.addf %740, %753 : vector<16x16xf32>
    %c202 = arith.constant 202 : index
    %755 = memref.load %arg2[%c202] : memref<225xf32, #tpu.memory_space<smem>>
    %756 = vector.broadcast %755 : f32 to vector<16x16xf32>
    %757 = arith.mulf %756, %746 : vector<16x16xf32>
    %758 = arith.addf %744, %757 : vector<16x16xf32>
    %c2_174 = arith.constant 2 : index
    %c0_175 = arith.constant 0 : index
    %c3_176 = arith.constant 3 : index
    %759 = vector.load %arg5[%c2_174, %c0_175, %c3_176] : memref<3x20x20xf32, #tpu.memory_space<vmem>>, vector<1x16x16xf32>
    %760 = vector.shape_cast %759 : vector<1x16x16xf32> to vector<16x16xf32>
    %c53 = arith.constant 53 : index
    %761 = memref.load %arg2[%c53] : memref<225xf32, #tpu.memory_space<smem>>
    %762 = vector.broadcast %761 : f32 to vector<16x16xf32>
    %763 = arith.mulf %762, %760 : vector<16x16xf32>
    %764 = arith.addf %750, %763 : vector<16x16xf32>
    %c128 = arith.constant 128 : index
    %765 = memref.load %arg2[%c128] : memref<225xf32, #tpu.memory_space<smem>>
    %766 = vector.broadcast %765 : f32 to vector<16x16xf32>
    %767 = arith.mulf %766, %760 : vector<16x16xf32>
    %768 = arith.addf %754, %767 : vector<16x16xf32>
    %c203 = arith.constant 203 : index
    %769 = memref.load %arg2[%c203] : memref<225xf32, #tpu.memory_space<smem>>
    %770 = vector.broadcast %769 : f32 to vector<16x16xf32>
    %771 = arith.mulf %770, %760 : vector<16x16xf32>
    %772 = arith.addf %758, %771 : vector<16x16xf32>
    %c2_177 = arith.constant 2 : index
    %c0_178 = arith.constant 0 : index
    %c4_179 = arith.constant 4 : index
    %773 = vector.load %arg5[%c2_177, %c0_178, %c4_179] : memref<3x20x20xf32, #tpu.memory_space<vmem>>, vector<1x16x16xf32>
    %774 = vector.shape_cast %773 : vector<1x16x16xf32> to vector<16x16xf32>
    %c54 = arith.constant 54 : index
    %775 = memref.load %arg2[%c54] : memref<225xf32, #tpu.memory_space<smem>>
    %776 = vector.broadcast %775 : f32 to vector<16x16xf32>
    %777 = arith.mulf %776, %774 : vector<16x16xf32>
    %778 = arith.addf %764, %777 : vector<16x16xf32>
    %c129 = arith.constant 129 : index
    %779 = memref.load %arg2[%c129] : memref<225xf32, #tpu.memory_space<smem>>
    %780 = vector.broadcast %779 : f32 to vector<16x16xf32>
    %781 = arith.mulf %780, %774 : vector<16x16xf32>
    %782 = arith.addf %768, %781 : vector<16x16xf32>
    %c204 = arith.constant 204 : index
    %783 = memref.load %arg2[%c204] : memref<225xf32, #tpu.memory_space<smem>>
    %784 = vector.broadcast %783 : f32 to vector<16x16xf32>
    %785 = arith.mulf %784, %774 : vector<16x16xf32>
    %786 = arith.addf %772, %785 : vector<16x16xf32>
    %c2_180 = arith.constant 2 : index
    %c1_181 = arith.constant 1 : index
    %c0_182 = arith.constant 0 : index
    %787 = vector.load %arg5[%c2_180, %c1_181, %c0_182] : memref<3x20x20xf32, #tpu.memory_space<vmem>>, vector<1x16x16xf32>
    %788 = vector.shape_cast %787 : vector<1x16x16xf32> to vector<16x16xf32>
    %c55 = arith.constant 55 : index
    %789 = memref.load %arg2[%c55] : memref<225xf32, #tpu.memory_space<smem>>
    %790 = vector.broadcast %789 : f32 to vector<16x16xf32>
    %791 = arith.mulf %790, %788 : vector<16x16xf32>
    %792 = arith.addf %778, %791 : vector<16x16xf32>
    %c130 = arith.constant 130 : index
    %793 = memref.load %arg2[%c130] : memref<225xf32, #tpu.memory_space<smem>>
    %794 = vector.broadcast %793 : f32 to vector<16x16xf32>
    %795 = arith.mulf %794, %788 : vector<16x16xf32>
    %796 = arith.addf %782, %795 : vector<16x16xf32>
    %c205 = arith.constant 205 : index
    %797 = memref.load %arg2[%c205] : memref<225xf32, #tpu.memory_space<smem>>
    %798 = vector.broadcast %797 : f32 to vector<16x16xf32>
    %799 = arith.mulf %798, %788 : vector<16x16xf32>
    %800 = arith.addf %786, %799 : vector<16x16xf32>
    %c2_183 = arith.constant 2 : index
    %c1_184 = arith.constant 1 : index
    %c1_185 = arith.constant 1 : index
    %801 = vector.load %arg5[%c2_183, %c1_184, %c1_185] : memref<3x20x20xf32, #tpu.memory_space<vmem>>, vector<1x16x16xf32>
    %802 = vector.shape_cast %801 : vector<1x16x16xf32> to vector<16x16xf32>
    %c56 = arith.constant 56 : index
    %803 = memref.load %arg2[%c56] : memref<225xf32, #tpu.memory_space<smem>>
    %804 = vector.broadcast %803 : f32 to vector<16x16xf32>
    %805 = arith.mulf %804, %802 : vector<16x16xf32>
    %806 = arith.addf %792, %805 : vector<16x16xf32>
    %c131 = arith.constant 131 : index
    %807 = memref.load %arg2[%c131] : memref<225xf32, #tpu.memory_space<smem>>
    %808 = vector.broadcast %807 : f32 to vector<16x16xf32>
    %809 = arith.mulf %808, %802 : vector<16x16xf32>
    %810 = arith.addf %796, %809 : vector<16x16xf32>
    %c206 = arith.constant 206 : index
    %811 = memref.load %arg2[%c206] : memref<225xf32, #tpu.memory_space<smem>>
    %812 = vector.broadcast %811 : f32 to vector<16x16xf32>
    %813 = arith.mulf %812, %802 : vector<16x16xf32>
    %814 = arith.addf %800, %813 : vector<16x16xf32>
    %c2_186 = arith.constant 2 : index
    %c1_187 = arith.constant 1 : index
    %c2_188 = arith.constant 2 : index
    %815 = vector.load %arg5[%c2_186, %c1_187, %c2_188] : memref<3x20x20xf32, #tpu.memory_space<vmem>>, vector<1x16x16xf32>
    %816 = vector.shape_cast %815 : vector<1x16x16xf32> to vector<16x16xf32>
    %c57 = arith.constant 57 : index
    %817 = memref.load %arg2[%c57] : memref<225xf32, #tpu.memory_space<smem>>
    %818 = vector.broadcast %817 : f32 to vector<16x16xf32>
    %819 = arith.mulf %818, %816 : vector<16x16xf32>
    %820 = arith.addf %806, %819 : vector<16x16xf32>
    %c132 = arith.constant 132 : index
    %821 = memref.load %arg2[%c132] : memref<225xf32, #tpu.memory_space<smem>>
    %822 = vector.broadcast %821 : f32 to vector<16x16xf32>
    %823 = arith.mulf %822, %816 : vector<16x16xf32>
    %824 = arith.addf %810, %823 : vector<16x16xf32>
    %c207 = arith.constant 207 : index
    %825 = memref.load %arg2[%c207] : memref<225xf32, #tpu.memory_space<smem>>
    %826 = vector.broadcast %825 : f32 to vector<16x16xf32>
    %827 = arith.mulf %826, %816 : vector<16x16xf32>
    %828 = arith.addf %814, %827 : vector<16x16xf32>
    %c2_189 = arith.constant 2 : index
    %c1_190 = arith.constant 1 : index
    %c3_191 = arith.constant 3 : index
    %829 = vector.load %arg5[%c2_189, %c1_190, %c3_191] : memref<3x20x20xf32, #tpu.memory_space<vmem>>, vector<1x16x16xf32>
    %830 = vector.shape_cast %829 : vector<1x16x16xf32> to vector<16x16xf32>
    %c58 = arith.constant 58 : index
    %831 = memref.load %arg2[%c58] : memref<225xf32, #tpu.memory_space<smem>>
    %832 = vector.broadcast %831 : f32 to vector<16x16xf32>
    %833 = arith.mulf %832, %830 : vector<16x16xf32>
    %834 = arith.addf %820, %833 : vector<16x16xf32>
    %c133 = arith.constant 133 : index
    %835 = memref.load %arg2[%c133] : memref<225xf32, #tpu.memory_space<smem>>
    %836 = vector.broadcast %835 : f32 to vector<16x16xf32>
    %837 = arith.mulf %836, %830 : vector<16x16xf32>
    %838 = arith.addf %824, %837 : vector<16x16xf32>
    %c208 = arith.constant 208 : index
    %839 = memref.load %arg2[%c208] : memref<225xf32, #tpu.memory_space<smem>>
    %840 = vector.broadcast %839 : f32 to vector<16x16xf32>
    %841 = arith.mulf %840, %830 : vector<16x16xf32>
    %842 = arith.addf %828, %841 : vector<16x16xf32>
    %c2_192 = arith.constant 2 : index
    %c1_193 = arith.constant 1 : index
    %c4_194 = arith.constant 4 : index
    %843 = vector.load %arg5[%c2_192, %c1_193, %c4_194] : memref<3x20x20xf32, #tpu.memory_space<vmem>>, vector<1x16x16xf32>
    %844 = vector.shape_cast %843 : vector<1x16x16xf32> to vector<16x16xf32>
    %c59 = arith.constant 59 : index
    %845 = memref.load %arg2[%c59] : memref<225xf32, #tpu.memory_space<smem>>
    %846 = vector.broadcast %845 : f32 to vector<16x16xf32>
    %847 = arith.mulf %846, %844 : vector<16x16xf32>
    %848 = arith.addf %834, %847 : vector<16x16xf32>
    %c134 = arith.constant 134 : index
    %849 = memref.load %arg2[%c134] : memref<225xf32, #tpu.memory_space<smem>>
    %850 = vector.broadcast %849 : f32 to vector<16x16xf32>
    %851 = arith.mulf %850, %844 : vector<16x16xf32>
    %852 = arith.addf %838, %851 : vector<16x16xf32>
    %c209 = arith.constant 209 : index
    %853 = memref.load %arg2[%c209] : memref<225xf32, #tpu.memory_space<smem>>
    %854 = vector.broadcast %853 : f32 to vector<16x16xf32>
    %855 = arith.mulf %854, %844 : vector<16x16xf32>
    %856 = arith.addf %842, %855 : vector<16x16xf32>
    %c2_195 = arith.constant 2 : index
    %c2_196 = arith.constant 2 : index
    %c0_197 = arith.constant 0 : index
    %857 = vector.load %arg5[%c2_195, %c2_196, %c0_197] : memref<3x20x20xf32, #tpu.memory_space<vmem>>, vector<1x16x16xf32>
    %858 = vector.shape_cast %857 : vector<1x16x16xf32> to vector<16x16xf32>
    %c60 = arith.constant 60 : index
    %859 = memref.load %arg2[%c60] : memref<225xf32, #tpu.memory_space<smem>>
    %860 = vector.broadcast %859 : f32 to vector<16x16xf32>
    %861 = arith.mulf %860, %858 : vector<16x16xf32>
    %862 = arith.addf %848, %861 : vector<16x16xf32>
    %c135 = arith.constant 135 : index
    %863 = memref.load %arg2[%c135] : memref<225xf32, #tpu.memory_space<smem>>
    %864 = vector.broadcast %863 : f32 to vector<16x16xf32>
    %865 = arith.mulf %864, %858 : vector<16x16xf32>
    %866 = arith.addf %852, %865 : vector<16x16xf32>
    %c210 = arith.constant 210 : index
    %867 = memref.load %arg2[%c210] : memref<225xf32, #tpu.memory_space<smem>>
    %868 = vector.broadcast %867 : f32 to vector<16x16xf32>
    %869 = arith.mulf %868, %858 : vector<16x16xf32>
    %870 = arith.addf %856, %869 : vector<16x16xf32>
    %c2_198 = arith.constant 2 : index
    %c2_199 = arith.constant 2 : index
    %c1_200 = arith.constant 1 : index
    %871 = vector.load %arg5[%c2_198, %c2_199, %c1_200] : memref<3x20x20xf32, #tpu.memory_space<vmem>>, vector<1x16x16xf32>
    %872 = vector.shape_cast %871 : vector<1x16x16xf32> to vector<16x16xf32>
    %c61 = arith.constant 61 : index
    %873 = memref.load %arg2[%c61] : memref<225xf32, #tpu.memory_space<smem>>
    %874 = vector.broadcast %873 : f32 to vector<16x16xf32>
    %875 = arith.mulf %874, %872 : vector<16x16xf32>
    %876 = arith.addf %862, %875 : vector<16x16xf32>
    %c136 = arith.constant 136 : index
    %877 = memref.load %arg2[%c136] : memref<225xf32, #tpu.memory_space<smem>>
    %878 = vector.broadcast %877 : f32 to vector<16x16xf32>
    %879 = arith.mulf %878, %872 : vector<16x16xf32>
    %880 = arith.addf %866, %879 : vector<16x16xf32>
    %c211 = arith.constant 211 : index
    %881 = memref.load %arg2[%c211] : memref<225xf32, #tpu.memory_space<smem>>
    %882 = vector.broadcast %881 : f32 to vector<16x16xf32>
    %883 = arith.mulf %882, %872 : vector<16x16xf32>
    %884 = arith.addf %870, %883 : vector<16x16xf32>
    %c2_201 = arith.constant 2 : index
    %c2_202 = arith.constant 2 : index
    %c2_203 = arith.constant 2 : index
    %885 = vector.load %arg5[%c2_201, %c2_202, %c2_203] : memref<3x20x20xf32, #tpu.memory_space<vmem>>, vector<1x16x16xf32>
    %886 = vector.shape_cast %885 : vector<1x16x16xf32> to vector<16x16xf32>
    %c62 = arith.constant 62 : index
    %887 = memref.load %arg2[%c62] : memref<225xf32, #tpu.memory_space<smem>>
    %888 = vector.broadcast %887 : f32 to vector<16x16xf32>
    %889 = arith.mulf %888, %886 : vector<16x16xf32>
    %890 = arith.addf %876, %889 : vector<16x16xf32>
    %c137 = arith.constant 137 : index
    %891 = memref.load %arg2[%c137] : memref<225xf32, #tpu.memory_space<smem>>
    %892 = vector.broadcast %891 : f32 to vector<16x16xf32>
    %893 = arith.mulf %892, %886 : vector<16x16xf32>
    %894 = arith.addf %880, %893 : vector<16x16xf32>
    %c212 = arith.constant 212 : index
    %895 = memref.load %arg2[%c212] : memref<225xf32, #tpu.memory_space<smem>>
    %896 = vector.broadcast %895 : f32 to vector<16x16xf32>
    %897 = arith.mulf %896, %886 : vector<16x16xf32>
    %898 = arith.addf %884, %897 : vector<16x16xf32>
    %c2_204 = arith.constant 2 : index
    %c2_205 = arith.constant 2 : index
    %c3_206 = arith.constant 3 : index
    %899 = vector.load %arg5[%c2_204, %c2_205, %c3_206] : memref<3x20x20xf32, #tpu.memory_space<vmem>>, vector<1x16x16xf32>
    %900 = vector.shape_cast %899 : vector<1x16x16xf32> to vector<16x16xf32>
    %c63 = arith.constant 63 : index
    %901 = memref.load %arg2[%c63] : memref<225xf32, #tpu.memory_space<smem>>
    %902 = vector.broadcast %901 : f32 to vector<16x16xf32>
    %903 = arith.mulf %902, %900 : vector<16x16xf32>
    %904 = arith.addf %890, %903 : vector<16x16xf32>
    %c138 = arith.constant 138 : index
    %905 = memref.load %arg2[%c138] : memref<225xf32, #tpu.memory_space<smem>>
    %906 = vector.broadcast %905 : f32 to vector<16x16xf32>
    %907 = arith.mulf %906, %900 : vector<16x16xf32>
    %908 = arith.addf %894, %907 : vector<16x16xf32>
    %c213 = arith.constant 213 : index
    %909 = memref.load %arg2[%c213] : memref<225xf32, #tpu.memory_space<smem>>
    %910 = vector.broadcast %909 : f32 to vector<16x16xf32>
    %911 = arith.mulf %910, %900 : vector<16x16xf32>
    %912 = arith.addf %898, %911 : vector<16x16xf32>
    %c2_207 = arith.constant 2 : index
    %c2_208 = arith.constant 2 : index
    %c4_209 = arith.constant 4 : index
    %913 = vector.load %arg5[%c2_207, %c2_208, %c4_209] : memref<3x20x20xf32, #tpu.memory_space<vmem>>, vector<1x16x16xf32>
    %914 = vector.shape_cast %913 : vector<1x16x16xf32> to vector<16x16xf32>
    %c64 = arith.constant 64 : index
    %915 = memref.load %arg2[%c64] : memref<225xf32, #tpu.memory_space<smem>>
    %916 = vector.broadcast %915 : f32 to vector<16x16xf32>
    %917 = arith.mulf %916, %914 : vector<16x16xf32>
    %918 = arith.addf %904, %917 : vector<16x16xf32>
    %c139 = arith.constant 139 : index
    %919 = memref.load %arg2[%c139] : memref<225xf32, #tpu.memory_space<smem>>
    %920 = vector.broadcast %919 : f32 to vector<16x16xf32>
    %921 = arith.mulf %920, %914 : vector<16x16xf32>
    %922 = arith.addf %908, %921 : vector<16x16xf32>
    %c214 = arith.constant 214 : index
    %923 = memref.load %arg2[%c214] : memref<225xf32, #tpu.memory_space<smem>>
    %924 = vector.broadcast %923 : f32 to vector<16x16xf32>
    %925 = arith.mulf %924, %914 : vector<16x16xf32>
    %926 = arith.addf %912, %925 : vector<16x16xf32>
    %c2_210 = arith.constant 2 : index
    %c3_211 = arith.constant 3 : index
    %c0_212 = arith.constant 0 : index
    %927 = vector.load %arg5[%c2_210, %c3_211, %c0_212] : memref<3x20x20xf32, #tpu.memory_space<vmem>>, vector<1x16x16xf32>
    %928 = vector.shape_cast %927 : vector<1x16x16xf32> to vector<16x16xf32>
    %c65 = arith.constant 65 : index
    %929 = memref.load %arg2[%c65] : memref<225xf32, #tpu.memory_space<smem>>
    %930 = vector.broadcast %929 : f32 to vector<16x16xf32>
    %931 = arith.mulf %930, %928 : vector<16x16xf32>
    %932 = arith.addf %918, %931 : vector<16x16xf32>
    %c140 = arith.constant 140 : index
    %933 = memref.load %arg2[%c140] : memref<225xf32, #tpu.memory_space<smem>>
    %934 = vector.broadcast %933 : f32 to vector<16x16xf32>
    %935 = arith.mulf %934, %928 : vector<16x16xf32>
    %936 = arith.addf %922, %935 : vector<16x16xf32>
    %c215 = arith.constant 215 : index
    %937 = memref.load %arg2[%c215] : memref<225xf32, #tpu.memory_space<smem>>
    %938 = vector.broadcast %937 : f32 to vector<16x16xf32>
    %939 = arith.mulf %938, %928 : vector<16x16xf32>
    %940 = arith.addf %926, %939 : vector<16x16xf32>
    %c2_213 = arith.constant 2 : index
    %c3_214 = arith.constant 3 : index
    %c1_215 = arith.constant 1 : index
    %941 = vector.load %arg5[%c2_213, %c3_214, %c1_215] : memref<3x20x20xf32, #tpu.memory_space<vmem>>, vector<1x16x16xf32>
    %942 = vector.shape_cast %941 : vector<1x16x16xf32> to vector<16x16xf32>
    %c66 = arith.constant 66 : index
    %943 = memref.load %arg2[%c66] : memref<225xf32, #tpu.memory_space<smem>>
    %944 = vector.broadcast %943 : f32 to vector<16x16xf32>
    %945 = arith.mulf %944, %942 : vector<16x16xf32>
    %946 = arith.addf %932, %945 : vector<16x16xf32>
    %c141 = arith.constant 141 : index
    %947 = memref.load %arg2[%c141] : memref<225xf32, #tpu.memory_space<smem>>
    %948 = vector.broadcast %947 : f32 to vector<16x16xf32>
    %949 = arith.mulf %948, %942 : vector<16x16xf32>
    %950 = arith.addf %936, %949 : vector<16x16xf32>
    %c216 = arith.constant 216 : index
    %951 = memref.load %arg2[%c216] : memref<225xf32, #tpu.memory_space<smem>>
    %952 = vector.broadcast %951 : f32 to vector<16x16xf32>
    %953 = arith.mulf %952, %942 : vector<16x16xf32>
    %954 = arith.addf %940, %953 : vector<16x16xf32>
    %c2_216 = arith.constant 2 : index
    %c3_217 = arith.constant 3 : index
    %c2_218 = arith.constant 2 : index
    %955 = vector.load %arg5[%c2_216, %c3_217, %c2_218] : memref<3x20x20xf32, #tpu.memory_space<vmem>>, vector<1x16x16xf32>
    %956 = vector.shape_cast %955 : vector<1x16x16xf32> to vector<16x16xf32>
    %c67 = arith.constant 67 : index
    %957 = memref.load %arg2[%c67] : memref<225xf32, #tpu.memory_space<smem>>
    %958 = vector.broadcast %957 : f32 to vector<16x16xf32>
    %959 = arith.mulf %958, %956 : vector<16x16xf32>
    %960 = arith.addf %946, %959 : vector<16x16xf32>
    %c142 = arith.constant 142 : index
    %961 = memref.load %arg2[%c142] : memref<225xf32, #tpu.memory_space<smem>>
    %962 = vector.broadcast %961 : f32 to vector<16x16xf32>
    %963 = arith.mulf %962, %956 : vector<16x16xf32>
    %964 = arith.addf %950, %963 : vector<16x16xf32>
    %c217 = arith.constant 217 : index
    %965 = memref.load %arg2[%c217] : memref<225xf32, #tpu.memory_space<smem>>
    %966 = vector.broadcast %965 : f32 to vector<16x16xf32>
    %967 = arith.mulf %966, %956 : vector<16x16xf32>
    %968 = arith.addf %954, %967 : vector<16x16xf32>
    %c2_219 = arith.constant 2 : index
    %c3_220 = arith.constant 3 : index
    %c3_221 = arith.constant 3 : index
    %969 = vector.load %arg5[%c2_219, %c3_220, %c3_221] : memref<3x20x20xf32, #tpu.memory_space<vmem>>, vector<1x16x16xf32>
    %970 = vector.shape_cast %969 : vector<1x16x16xf32> to vector<16x16xf32>
    %c68 = arith.constant 68 : index
    %971 = memref.load %arg2[%c68] : memref<225xf32, #tpu.memory_space<smem>>
    %972 = vector.broadcast %971 : f32 to vector<16x16xf32>
    %973 = arith.mulf %972, %970 : vector<16x16xf32>
    %974 = arith.addf %960, %973 : vector<16x16xf32>
    %c143 = arith.constant 143 : index
    %975 = memref.load %arg2[%c143] : memref<225xf32, #tpu.memory_space<smem>>
    %976 = vector.broadcast %975 : f32 to vector<16x16xf32>
    %977 = arith.mulf %976, %970 : vector<16x16xf32>
    %978 = arith.addf %964, %977 : vector<16x16xf32>
    %c218 = arith.constant 218 : index
    %979 = memref.load %arg2[%c218] : memref<225xf32, #tpu.memory_space<smem>>
    %980 = vector.broadcast %979 : f32 to vector<16x16xf32>
    %981 = arith.mulf %980, %970 : vector<16x16xf32>
    %982 = arith.addf %968, %981 : vector<16x16xf32>
    %c2_222 = arith.constant 2 : index
    %c3_223 = arith.constant 3 : index
    %c4_224 = arith.constant 4 : index
    %983 = vector.load %arg5[%c2_222, %c3_223, %c4_224] : memref<3x20x20xf32, #tpu.memory_space<vmem>>, vector<1x16x16xf32>
    %984 = vector.shape_cast %983 : vector<1x16x16xf32> to vector<16x16xf32>
    %c69 = arith.constant 69 : index
    %985 = memref.load %arg2[%c69] : memref<225xf32, #tpu.memory_space<smem>>
    %986 = vector.broadcast %985 : f32 to vector<16x16xf32>
    %987 = arith.mulf %986, %984 : vector<16x16xf32>
    %988 = arith.addf %974, %987 : vector<16x16xf32>
    %c144 = arith.constant 144 : index
    %989 = memref.load %arg2[%c144] : memref<225xf32, #tpu.memory_space<smem>>
    %990 = vector.broadcast %989 : f32 to vector<16x16xf32>
    %991 = arith.mulf %990, %984 : vector<16x16xf32>
    %992 = arith.addf %978, %991 : vector<16x16xf32>
    %c219 = arith.constant 219 : index
    %993 = memref.load %arg2[%c219] : memref<225xf32, #tpu.memory_space<smem>>
    %994 = vector.broadcast %993 : f32 to vector<16x16xf32>
    %995 = arith.mulf %994, %984 : vector<16x16xf32>
    %996 = arith.addf %982, %995 : vector<16x16xf32>
    %c2_225 = arith.constant 2 : index
    %c4_226 = arith.constant 4 : index
    %c0_227 = arith.constant 0 : index
    %997 = vector.load %arg5[%c2_225, %c4_226, %c0_227] : memref<3x20x20xf32, #tpu.memory_space<vmem>>, vector<1x16x16xf32>
    %998 = vector.shape_cast %997 : vector<1x16x16xf32> to vector<16x16xf32>
    %c70 = arith.constant 70 : index
    %999 = memref.load %arg2[%c70] : memref<225xf32, #tpu.memory_space<smem>>
    %1000 = vector.broadcast %999 : f32 to vector<16x16xf32>
    %1001 = arith.mulf %1000, %998 : vector<16x16xf32>
    %1002 = arith.addf %988, %1001 : vector<16x16xf32>
    %c145 = arith.constant 145 : index
    %1003 = memref.load %arg2[%c145] : memref<225xf32, #tpu.memory_space<smem>>
    %1004 = vector.broadcast %1003 : f32 to vector<16x16xf32>
    %1005 = arith.mulf %1004, %998 : vector<16x16xf32>
    %1006 = arith.addf %992, %1005 : vector<16x16xf32>
    %c220 = arith.constant 220 : index
    %1007 = memref.load %arg2[%c220] : memref<225xf32, #tpu.memory_space<smem>>
    %1008 = vector.broadcast %1007 : f32 to vector<16x16xf32>
    %1009 = arith.mulf %1008, %998 : vector<16x16xf32>
    %1010 = arith.addf %996, %1009 : vector<16x16xf32>
    %c2_228 = arith.constant 2 : index
    %c4_229 = arith.constant 4 : index
    %c1_230 = arith.constant 1 : index
    %1011 = vector.load %arg5[%c2_228, %c4_229, %c1_230] : memref<3x20x20xf32, #tpu.memory_space<vmem>>, vector<1x16x16xf32>
    %1012 = vector.shape_cast %1011 : vector<1x16x16xf32> to vector<16x16xf32>
    %c71 = arith.constant 71 : index
    %1013 = memref.load %arg2[%c71] : memref<225xf32, #tpu.memory_space<smem>>
    %1014 = vector.broadcast %1013 : f32 to vector<16x16xf32>
    %1015 = arith.mulf %1014, %1012 : vector<16x16xf32>
    %1016 = arith.addf %1002, %1015 : vector<16x16xf32>
    %c146 = arith.constant 146 : index
    %1017 = memref.load %arg2[%c146] : memref<225xf32, #tpu.memory_space<smem>>
    %1018 = vector.broadcast %1017 : f32 to vector<16x16xf32>
    %1019 = arith.mulf %1018, %1012 : vector<16x16xf32>
    %1020 = arith.addf %1006, %1019 : vector<16x16xf32>
    %c221 = arith.constant 221 : index
    %1021 = memref.load %arg2[%c221] : memref<225xf32, #tpu.memory_space<smem>>
    %1022 = vector.broadcast %1021 : f32 to vector<16x16xf32>
    %1023 = arith.mulf %1022, %1012 : vector<16x16xf32>
    %1024 = arith.addf %1010, %1023 : vector<16x16xf32>
    %c2_231 = arith.constant 2 : index
    %c4_232 = arith.constant 4 : index
    %c2_233 = arith.constant 2 : index
    %1025 = vector.load %arg5[%c2_231, %c4_232, %c2_233] : memref<3x20x20xf32, #tpu.memory_space<vmem>>, vector<1x16x16xf32>
    %1026 = vector.shape_cast %1025 : vector<1x16x16xf32> to vector<16x16xf32>
    %c72 = arith.constant 72 : index
    %1027 = memref.load %arg2[%c72] : memref<225xf32, #tpu.memory_space<smem>>
    %1028 = vector.broadcast %1027 : f32 to vector<16x16xf32>
    %1029 = arith.mulf %1028, %1026 : vector<16x16xf32>
    %1030 = arith.addf %1016, %1029 : vector<16x16xf32>
    %c147 = arith.constant 147 : index
    %1031 = memref.load %arg2[%c147] : memref<225xf32, #tpu.memory_space<smem>>
    %1032 = vector.broadcast %1031 : f32 to vector<16x16xf32>
    %1033 = arith.mulf %1032, %1026 : vector<16x16xf32>
    %1034 = arith.addf %1020, %1033 : vector<16x16xf32>
    %c222 = arith.constant 222 : index
    %1035 = memref.load %arg2[%c222] : memref<225xf32, #tpu.memory_space<smem>>
    %1036 = vector.broadcast %1035 : f32 to vector<16x16xf32>
    %1037 = arith.mulf %1036, %1026 : vector<16x16xf32>
    %1038 = arith.addf %1024, %1037 : vector<16x16xf32>
    %c2_234 = arith.constant 2 : index
    %c4_235 = arith.constant 4 : index
    %c3_236 = arith.constant 3 : index
    %1039 = vector.load %arg5[%c2_234, %c4_235, %c3_236] : memref<3x20x20xf32, #tpu.memory_space<vmem>>, vector<1x16x16xf32>
    %1040 = vector.shape_cast %1039 : vector<1x16x16xf32> to vector<16x16xf32>
    %c73 = arith.constant 73 : index
    %1041 = memref.load %arg2[%c73] : memref<225xf32, #tpu.memory_space<smem>>
    %1042 = vector.broadcast %1041 : f32 to vector<16x16xf32>
    %1043 = arith.mulf %1042, %1040 : vector<16x16xf32>
    %1044 = arith.addf %1030, %1043 : vector<16x16xf32>
    %c148 = arith.constant 148 : index
    %1045 = memref.load %arg2[%c148] : memref<225xf32, #tpu.memory_space<smem>>
    %1046 = vector.broadcast %1045 : f32 to vector<16x16xf32>
    %1047 = arith.mulf %1046, %1040 : vector<16x16xf32>
    %1048 = arith.addf %1034, %1047 : vector<16x16xf32>
    %c223 = arith.constant 223 : index
    %1049 = memref.load %arg2[%c223] : memref<225xf32, #tpu.memory_space<smem>>
    %1050 = vector.broadcast %1049 : f32 to vector<16x16xf32>
    %1051 = arith.mulf %1050, %1040 : vector<16x16xf32>
    %1052 = arith.addf %1038, %1051 : vector<16x16xf32>
    %c2_237 = arith.constant 2 : index
    %c4_238 = arith.constant 4 : index
    %c4_239 = arith.constant 4 : index
    %1053 = vector.load %arg5[%c2_237, %c4_238, %c4_239] : memref<3x20x20xf32, #tpu.memory_space<vmem>>, vector<1x16x16xf32>
    %1054 = vector.shape_cast %1053 : vector<1x16x16xf32> to vector<16x16xf32>
    %c74 = arith.constant 74 : index
    %1055 = memref.load %arg2[%c74] : memref<225xf32, #tpu.memory_space<smem>>
    %1056 = vector.broadcast %1055 : f32 to vector<16x16xf32>
    %1057 = arith.mulf %1056, %1054 : vector<16x16xf32>
    %1058 = arith.addf %1044, %1057 : vector<16x16xf32>
    %c149 = arith.constant 149 : index
    %1059 = memref.load %arg2[%c149] : memref<225xf32, #tpu.memory_space<smem>>
    %1060 = vector.broadcast %1059 : f32 to vector<16x16xf32>
    %1061 = arith.mulf %1060, %1054 : vector<16x16xf32>
    %1062 = arith.addf %1048, %1061 : vector<16x16xf32>
    %c224 = arith.constant 224 : index
    %1063 = memref.load %arg2[%c224] : memref<225xf32, #tpu.memory_space<smem>>
    %1064 = vector.broadcast %1063 : f32 to vector<16x16xf32>
    %1065 = arith.mulf %1064, %1054 : vector<16x16xf32>
    %1066 = arith.addf %1052, %1065 : vector<16x16xf32>
    %c0_240 = arith.constant 0 : index
    %c0_241 = arith.constant 0 : index
    %c0_242 = arith.constant 0 : index
    %c0_243 = arith.constant 0 : index
    %1067 = vector.load %arg4[%c0_240, %c0_241, %c0_242, %c0_243] : memref<1x3x16x16xf32, #tpu.memory_space<vmem>>, vector<1x1x16x16xf32>
    %1068 = vector.shape_cast %1067 : vector<1x1x16x16xf32> to vector<16x16xf32>
    %1069 = vector.shape_cast %1058 : vector<16x16xf32> to vector<1x1x16x16xf32>
    tpu.vector_store %arg4[%c0_240, %c0_241, %c0_242, %c0_243], %1069 {strides = array<i32>} : memref<1x3x16x16xf32, #tpu.memory_space<vmem>>, vector<1x1x16x16xf32>,
    %c0_244 = arith.constant 0 : index
    %c1_245 = arith.constant 1 : index
    %c0_246 = arith.constant 0 : index
    %c0_247 = arith.constant 0 : index
    %1070 = vector.load %arg4[%c0_244, %c1_245, %c0_246, %c0_247] : memref<1x3x16x16xf32, #tpu.memory_space<vmem>>, vector<1x1x16x16xf32>
    %1071 = vector.shape_cast %1070 : vector<1x1x16x16xf32> to vector<16x16xf32>
    %1072 = vector.shape_cast %1062 : vector<16x16xf32> to vector<1x1x16x16xf32>
    tpu.vector_store %arg4[%c0_244, %c1_245, %c0_246, %c0_247], %1072 {strides = array<i32>} : memref<1x3x16x16xf32, #tpu.memory_space<vmem>>, vector<1x1x16x16xf32>,
    %c0_248 = arith.constant 0 : index
    %c2_249 = arith.constant 2 : index
    %c0_250 = arith.constant 0 : index
    %c0_251 = arith.constant 0 : index
    %1073 = vector.load %arg4[%c0_248, %c2_249, %c0_250, %c0_251] : memref<1x3x16x16xf32, #tpu.memory_space<vmem>>, vector<1x1x16x16xf32>
    %1074 = vector.shape_cast %1073 : vector<1x1x16x16xf32> to vector<16x16xf32>
    %1075 = vector.shape_cast %1066 : vector<16x16xf32> to vector<1x1x16x16xf32>
    tpu.vector_store %arg4[%c0_248, %c2_249, %c0_250, %c0_251], %1075 {strides = array<i32>} : memref<1x3x16x16xf32, #tpu.memory_space<vmem>>, vector<1x1x16x16xf32>,
    return
  }
  func.func @transform_0(%arg0: i32, %arg1: i32) -> i32 {
    %c0_i32 = arith.constant 0 : i32
    %c0_i32_0 = arith.constant 0 : i32
    return %c0_i32 : i32
  }
  func.func @transform_1(%arg0: i32, %arg1: i32) -> (i32, i32, i32, i32) {
    %c0_i32 = arith.constant 0 : i32
    %c0_i32_0 = arith.constant 0 : i32
    %c0_i32_1 = arith.constant 0 : i32
    %c0_i32_2 = arith.constant 0 : i32
    return %arg0, %c0_i32, %c0_i32_0, %c0_i32_1 : i32, i32, i32, i32
  }
  func.func @transform_2(%arg0: i32, %arg1: i32) -> (i32, i32, i32, i32) {
    %c0_i32 = arith.constant 0 : i32
    %c0_i32_0 = arith.constant 0 : i32
    %c0_i32_1 = arith.constant 0 : i32
    return %arg0, %c0_i32, %arg1, %c0_i32_0 : i32, i32, i32, i32
  }
}

</mosaic_0001>

<bundles_post_ra>
// kernel: tpu_custom_call.1
= control target key start
LH: loop header
LB: loop body
LE: loop exit
PB: predicated region body
PF: predicated region fallthrough
CT: control target
= control target key end

     0   :  { %7 = vsyncpa [#allocation6], 0  ;;  %s5726_s0 = inlined_call_operand.hbm [shape: f32[225], index: 0, kind: input, shape index: {}]   ;;  %s5727_s1 = inlined_call_operand.hbm [shape: f32[2,3,16,16], index: 1, kind: input, shape index: {}]   ;;  %s5728_s2 = inlined_call_operand.hbm [shape: f32[2,3,16,16], index: 2, kind: output, shape index: {}]  }
   0x1   :  { %8 = vsyncpa [#allocation4], 0 }
   0x2   :  { %10 = vsyncpa [#allocation4 + $0x1], 0 }
   0x3   :  { %11 = vsyncpa [#allocation5], 0 }
   0x4   :  { %13 = vsyncpa [#allocation5 + $0x1], 0  ;;  %s3723_s9 = smov 0   ;;  %s3725_s10 = smov 0  }
   0x5   :  { %s3727_s11 = smov 0   ;;  %s3729_s12 = smov 0  }
   0x6   :  { %s3731_s13 = smov 0   ;;  %s3733_s14 = smov 0  }
   0x7 LB: > { %s3238_s15 = sadd.s32 4294967295, %s3693_s14   ;;  %s3239_s16 = sadd.s32 4294967294, %s3693_s14   ;;  %s3693_s14 = sphi %s3733_s14, %s19_s14   ;;  %s3689_s13 = sphi %s3731_s13, %s5741_s13   ;;  %s3685_s12 = sphi %s3729_s12, %s5740_s12   ;;  %s3681_s11 = sphi %s3727_s11, %s5739_s11   ;;  %s3677_s10 = sphi %s3725_s10, %s5738_s10   ;;  %s3673_s9 = sphi %s3723_s9, %s5737_s9  }
   0x8   : > { %s59_s17 = sadd.s32 1, %s3681_s11  ;;  %p66_p0 = scmp.ne.s32.totalorder %s3681_s11, %s3677_s10 }
   0x9   : > { %p67_p1 = scmp.eq.s32.totalorder %s3693_s14, 0  ;;  %p72_p2 = scmp.ne.s32.totalorder %s3677_s10, %s3673_s9 }
   0xa   : > { %p3761_p3 = scmp.eq.s32.totalorder %s3238_s15, 0  ;;  %p98_p4 = scmp.eq.s32.totalorder %s3238_s15, 1 }
   0xb   : > { %p68_p5 = por %p67_p1, %p66_p0  ;;  %p104_p6 = scmp.eq.s32.totalorder %s3239_s16, 1 }
   0xc   : > { %p3767_p7 = por %p3761_p3, %p72_p2  ;;  %p3771_p8 = por %p98_p4, %p66_p0 }
   0xd   : > { %p3775_p9 = por %p104_p6, %p72_p2  ;;  %p3240_p10 = scmp.ge.s32.totalorder %s3693_s14, 1 }
   0xe   : > { %p111_p11 = scmp.lt.s32.totalorder %s3693_s14, 3  ;;  %p3508_p1 = scmp.lt.s32.totalorder %s3693_s14, 2 }
   0xf   : > { %s5732_s21 = scalar_select %p3775_p9, 1, 0 }
  0x10   : > { %p3782_p13 = pnand %p3240_p10, %p111_p11  ;;  %s133_s23 = sand.u32 1, %s3681_s11  }
  0x11   : > { %p3790_p2 = pnand %p3508_p1, %p68_p5  ;;  %s31_s25 = sadd.s32 1, %s3689_s13 }
  0x12   : > { %p3495_p0 = pneg %p3782_p13  ;;  %s3483_s26 = smul.u32 48, %s133_s23 }
  0x13   : > { %p33_p6 = scmp.ge.s32.totalorder %s31_s25, 2  ;;  %s3695_s27 = smov [#allocation3]  }
  0x14   : > { %p3496_p4 = pnand %p3495_p0, %p3761_p3  ;;  %s3484_s30 = smul.u32 768, %s3689_s13 }
  0x15   : > { %s5743_s25 = smov (%p33_p6, %s31_s25), 0  ;;  %s137_s4 = scalar_lea.vmem [#allocation7], %s3483_s26 }
  0x16   : > { %3498 = dma.hbm_to_smem (!%p3496_p4), %s5726_s0, 32, %s3695_s27, [#allocation6]  }
  0x17   : > { %s56_s3 = ssub.s32 %s3689_s13, %s5743_s25  ;;  %s144_s5 = sshll.u32 %s137_s4, 4  ;;  %s145_s5 = int_to_ptr.vmem [resolvable:$true] %s144_s5 }
  0x18   : > { %p57_p5 = scmp.eq.s32.totalorder %s56_s3, 0  ;;  %s143_s8 = scalar_lea.hbm %s5727_s1, %s3484_s30 }
  0x19   : > { %s134_s16 = scalar_lea.sflag [#allocation4], %s133_s23  ;;  %p3583_p10 = pneg %p3790_p2 }
  0x1a   : > { %s3811_s15 = scalar_select %p57_p5, %s3681_s11, %s59_s17  }
  0x1b   : > { %s3594_s27 = scalar_lea.vmem %s145_s5, 768  ;;  %s3696_s28 = smov [#allocation7]  }
  0x1c   : > { %p3595_p11 = scmp.ne.s32.totalorder %s145_s5, %s3594_s27  ;;  %s3599_s29 = sshll.u32 %s3696_s28, 4  ;;  %s3600_s29 = int_to_ptr.vmem [resolvable:$false] %s3599_s29 }
  0x1d   : > { %s3601_s26 = scalar_lea.vmem %s3600_s29, 1536  ;;  %p3602_p4 = scmp.lt.s32.totalorder %s145_s5, %s3600_s29 }
  0x1e   : > { %p3597_p1 = pnand %p3595_p11, %p3583_p10  ;;  %p3603_p6 = scmp.lt.s32.totalorder %s3601_s26, %s3594_s27 }
  0x20   : > { %p3598_p0 = pneg %p3597_p1  ;;  %p3604_p12 = por %p3603_p6, %p3602_p4 }
  0x22   : > { %p3605_p9 = pnand %p3604_p12, %p3598_p0 }
  0x24   : > { %3608 = shalt.err (!%p3605_p9)
}
  0x25   : > { %s3697_s30 = smov 128   ;;  %s3698_s17 = smov 8  }
  0x26   : > { %3502 = dma.hbm_to_vmem [thread:$0]  (!%p3790_p2), %s143_s8, 768, %s145_s5, %s134_s16, %s3697_s30, %s3697_s30, %s3698_s17  }
  0x27   : > { %156 = sbr.rel (%p3782_p13) target bundleno = 1029 (0x405), region = 28 }
  0x2c   : > { %3660 = dma.done.wait (%p3761_p3), [#allocation6], 32  }
  0x2d   : > { %3662 = vsyncadd (%p3761_p3), [#allocation6], 4294967264  ;;  %s3824_s23 = sand.u32 1, %s3677_s10  }
  0x2e   : > { %s3485_s3 = smul.u32 48, %s3824_s23  ;;  %s163_s4 = scalar_lea.sflag [#allocation4], %s3824_s23 }
  0x30   : > { %s166_s24 = scalar_lea.vmem [#allocation7], %s3485_s3 }
  0x31   : > { %3664 = dma.done.wait (%p3767_p7), %s163_s4, 768  }
  0x32   : > { %3666 = vsyncadd (%p3767_p7), %s163_s4, 4294966528 }
  0x33   : > { %171 = sfence }
  0x34   : > { %v202_v0 = vld [vmem:[%s166_s24] sm:$0xff]  ;;  %v204_v1 = vld [vmem:[%s166_s24 + $0x10] sm:$0xff]  ;;  %vm190_vm0 = vcmask 162816   ;;  %s3699_s18 = smov 2   ;;  %vm193_vm1 = vcmask 158720   ;;  %v203_v2 = vld [vmem:[%s166_s24 + $0x8] sm:$0xff] }
  0x35   : > { %214 = vrot.lane.b32.xlu0 %v202_v0, %s3699_s18  ;;  %218 = vrot.lane.b32.xlu1 %v204_v1, %s3699_s18  ;;  %v3700_v3 = vmov 0.0   ;;  %v205_v4 = vld [vmem:[%s166_s24 + $0x18] sm:$0xff]  ;;  %v206_v5 = vld [vmem:[%s166_s24 + $0x20] sm:$0xff]  ;;  %vm232_vm2 = vcmask 146448   ;;  %s3254_s19 = sld [smem:[#allocation3 + $0x1]]  ;;  %s3701_s7 = smov 127  }
  0x36   : > { %191 = vst.msk [vmem:[#allocation2] sm:$0xff] %vm190_vm0, %v3700_v3  ;;  %192 = vst.msk [vmem:[#allocation2 + $0x8] sm:$0xff] %vm190_vm0, %v3700_v3  ;;  %v207_v6 = vld [vmem:[%s166_s24 + $0x28] sm:$0xff]  ;;  %s3255_s22 = sld [smem:[#allocation3 + $0x4c]]  ;;  %s3702_s28 = smov 126   ;;  %vm3111_vm3 = vcmask 130048  }
  0x37   : > { %195 = vst.msk [vmem:[#allocation2 + $0x18] sm:$0xff] %vm190_vm0, %v3700_v3  ;;  %196 = vst.msk [vmem:[#allocation2 + $0x20] sm:$0xff] %vm190_vm0, %v3700_v3  ;;  %s3256_s5 = sld [smem:[#allocation3 + $0x97]]  ;;  %s3703_s17 = smov 125  }
  0x38   : > { %198 = vst.msk [vmem:[#allocation2 + $0x30] sm:$0xff] %vm190_vm0, %v3700_v3  ;;  %199 = vst.msk [vmem:[#allocation2 + $0x38] sm:$0xff] %vm190_vm0, %v3700_v3  ;;  %s3257_s6 = sld [smem:[#allocation3 + $0x2]] }
  0x39   : > { %194 = vst.msk [vmem:[#allocation2 + $0x10] sm:$0xf] %vm193_vm1, %v3700_v3  ;;  %197 = vst.msk [vmem:[#allocation2 + $0x28] sm:$0xf] %vm193_vm1, %v3700_v3  ;;  %216 = vrot.lane.b32.xlu0 %v203_v2, %s3699_s18  ;;  %220 = vrot.lane.b32.xlu1 %v205_v4, %s3699_s18  ;;  %s3258_s8 = sld [smem:[#allocation3 + $0x4d]] }
  0x3a   : > { %200 = vst.msk [vmem:[#allocation2 + $0x40] sm:$0xf] %vm193_vm1, %v3700_v3  ;;  %s3259_s16 = sld [smem:[#allocation3 + $0x98]] }
  0x3b   : > { %v310_v11 = vstv %s3254_s19  ;;  %s3260_s27 = sld [smem:[#allocation3 + $0x3]]  ;;  %s3704_s19 = smov 124  }
  0x3c   : > { %v324_v16 = vstv %s3255_s22  ;;  %s3261_s29 = sld [smem:[#allocation3 + $0x4e]] }
  0x3d   : > { %222 = vrot.lane.b32.xlu0 %v206_v5, %s3699_s18  ;;  %224 = vrot.lane.b32.xlu1 %v207_v6, %s3699_s18  ;;  %v338_v20 = vstv %s3256_s5  ;;  %s3262_s26 = sld [smem:[#allocation3 + $0x99]] }
  0x3e   : > { %v352_v23 = vstv %s3257_s6  ;;  %s3263_s30 = sld [smem:[#allocation3 + $0x4]] }
  0x3f   : > { %v366_v26 = vstv %s3258_s8  ;;  %s3264_s4 = sld [smem:[#allocation3 + $0x4f]] }
  0x40   : > { %v380_v29 = vstv %s3259_s16  ;;  %s3265_s24 = sld [smem:[#allocation3 + $0x9a]] }
  0x41   : > { %v394_v32 = vstv %s3260_s27  ;;  %s3269_s18 = sld [smem:[#allocation3 + $0x6]] }
  0x42   : > { %v408_v35 = vstv %s3261_s29  ;;  %s3270_s22 = sld [smem:[#allocation3 + $0x51]] }
  0x43   : > { %v422_v38 = vstv %s3262_s26  ;;  %s3271_s5 = sld [smem:[#allocation3 + $0x9c]] }
  0x44   : > { %v436_v41 = vstv %s3263_s30  ;;  %s3272_s6 = sld [smem:[#allocation3 + $0x7]] }
  0x45   : > { %v450_v44 = vstv %s3264_s4  ;;  %s3273_s8 = sld [smem:[#allocation3 + $0x52]] }
  0x46   : > { %v464_v47 = vstv %s3265_s24  ;;  %s3274_s16 = sld [smem:[#allocation3 + $0x9d]] }
  0x47   : > { %v498_v51 = vstv %s3269_s18  ;;  %s3275_s27 = sld [smem:[#allocation3 + $0x8]] }
  0x48   : > { %v512_v55 = vstv %s3270_s22  ;;  %s3276_s29 = sld [smem:[#allocation3 + $0x53]] }
  0x49   : > { %v526_v58 = vstv %s3271_s5  ;;  %s3277_s26 = sld [smem:[#allocation3 + $0x9e]] }
  0x4a   : > { %v540_v61 = vstv %s3272_s6  ;;  %s3278_s30 = sld [smem:[#allocation3 + $0x9]] }
  0x4b   : > { %v554_v0 = vstv %s3273_s8  ;;  %s3279_s4 = sld [smem:[#allocation3 + $0x54]] }
  0x4c   : > { %v568_v3 = vstv %s3274_s16  ;;  %s3280_s24 = sld [smem:[#allocation3 + $0x9f]] }
  0x4d   : > { %v582_v6 = vstv %s3275_s27  ;;  %s3284_s18 = sld [smem:[#allocation3 + $0xb]] }
  0x4e   : > { %s3285_s22 = sld [smem:[#allocation3 + $0x56]] }
  0x4f   : > { %s3286_s5 = sld [smem:[#allocation3 + $0xa1]] }
  0x50   : > { %s3287_s6 = sld [smem:[#allocation3 + $0xc]] }
  0x51   : > { %s3288_s8 = sld [smem:[#allocation3 + $0x57]] }
  0x52   : > { %s3289_s16 = sld [smem:[#allocation3 + $0xa2]] }
  0x53   : > { %s3290_s27 = sld [smem:[#allocation3 + $0xd]] }
  0xa7   : > { %v215_v7 = vpop.permute.xlu0 %214  ;;  %v219_v8 = vpop.permute.xlu1 %218 }
  0xa8   : > { %233 = vst.msk [vmem:[#allocation2 + $0x2] sm:$0xff] %vm232_vm2, %v215_v7  ;;  %235 = vst.msk [vmem:[#allocation2 + $0x1a] sm:$0xff] %vm232_vm2, %v219_v8 }
  0xab   : > { %v217_v9 = vpop.permute.xlu0 %216  ;;  %v221_v10 = vpop.permute.xlu1 %220 }
  0xac   : > { %234 = vst.msk [vmem:[#allocation2 + $0xa] sm:$0xff] %vm232_vm2, %v217_v9  ;;  %236 = vst.msk [vmem:[#allocation2 + $0x22] sm:$0xff] %vm232_vm2, %v221_v10  ;;  %v596_v9 = vstv %s3276_s29  ;;  %s3291_s29 = sld [smem:[#allocation3 + $0x58]] }
  0xaf   : > { %v3838_v12 = vld [vmem:[#allocation2] sm:$0xff]  ;;  %v223_v13 = vpop.permute.xlu0 %222  ;;  %v225_v14 = vpop.permute.xlu1 %224 }
  0xb0   : > { %v311_v15 = vmul.f32 %v310_v11, %v3838_v12  ;;  %237 = vst.msk [vmem:[#allocation2 + $0x32] sm:$0xff] %vm232_vm2, %v223_v13  ;;  %238 = vst.msk [vmem:[#allocation2 + $0x3a] sm:$0xff] %vm232_vm2, %v225_v14  ;;  %v325_v19 = vmul.f32 %v324_v16, %v3838_v12  ;;  %v339_v22 = vmul.f32 %v338_v20, %v3838_v12  ;;  %v3888_v50 = vld [vmem:[#allocation2 + $0x1] sm:$0xff]  ;;  %v610_v13 = vstv %s3277_s26  ;;  %s3292_s26 = sld [smem:[#allocation3 + $0xa3]] }
  0xb1   : > { %v353_v25 = vmul.f32 %v352_v23, %v3838_v12  ;;  %v367_v28 = vmul.f32 %v366_v26, %v3838_v12  ;;  %v381_v31 = vmul.f32 %v380_v29, %v3838_v12  ;;  %v395_v34 = vmul.f32 %v394_v32, %v3838_v12 }
  0xb2   : > { %315 = vrot.lane.b32.xlu0 %v311_v15, %s3701_s7  ;;  %v409_v37 = vmul.f32 %v408_v35, %v3838_v12  ;;  %v423_v40 = vmul.f32 %v422_v38, %v3838_v12  ;;  %v437_v43 = vmul.f32 %v436_v41, %v3838_v12  ;;  %v451_v46 = vmul.f32 %v450_v44, %v3838_v12 }
  0xb3   : > { %v3844_v17 = vld [vmem:[#allocation2 + $0x8] sm:$0xff]  ;;  %v465_v49 = vmul.f32 %v464_v47, %v3838_v12  ;;  %v499_v53 = vmul.f32 %v498_v51, %v3888_v50  ;;  %v513_v57 = vmul.f32 %v512_v55, %v3888_v50  ;;  %v527_v60 = vmul.f32 %v526_v58, %v3888_v50 }
  0xb4   : > { %v312_v18 = vmul.f32 %v310_v11, %v3844_v17  ;;  %v326_v21 = vmul.f32 %v324_v16, %v3844_v17  ;;  %v340_v24 = vmul.f32 %v338_v20, %v3844_v17  ;;  %v354_v27 = vmul.f32 %v352_v23, %v3844_v17  ;;  %v3894_v54 = vld [vmem:[#allocation2 + $0x9] sm:$0xff] }
  0xb5   : > { %v368_v30 = vmul.f32 %v366_v26, %v3844_v17  ;;  %v382_v33 = vmul.f32 %v380_v29, %v3844_v17  ;;  %v396_v36 = vmul.f32 %v394_v32, %v3844_v17  ;;  %v410_v39 = vmul.f32 %v408_v35, %v3844_v17  ;;  %v3940_v26 = vld [vmem:[#allocation2 + $0x2] sm:$0xff] }
  0xb6   : > { %317 = vrot.lane.b32.xlu1 %v312_v18, %s3701_s7  ;;  %329 = vrot.lane.b32.xlu0 %v325_v19, %s3701_s7  ;;  %v424_v42 = vmul.f32 %v422_v38, %v3844_v17  ;;  %v438_v45 = vmul.f32 %v436_v41, %v3844_v17  ;;  %v452_v48 = vmul.f32 %v450_v44, %v3844_v17  ;;  %v624_v16 = vstv %s3278_s30  ;;  %s3293_s30 = sld [smem:[#allocation3 + $0xe]] }
  0xb7   : > { %v466_v52 = vmul.f32 %v464_v47, %v3844_v17  ;;  %v500_v56 = vmul.f32 %v498_v51, %v3894_v54  ;;  %v514_v59 = vmul.f32 %v512_v55, %v3894_v54  ;;  %v528_v62 = vmul.f32 %v526_v58, %v3894_v54 }
  0xb8   : > { %v541_v63 = vmul.f32 %v540_v61, %v3888_v50  ;;  %v542_v1 = vmul.f32 %v540_v61, %v3894_v54  ;;  %v555_v2 = vmul.f32 %v554_v0, %v3888_v50  ;;  %v556_v4 = vmul.f32 %v554_v0, %v3894_v54 }
  0xb9   : > { %v569_v5 = vmul.f32 %v568_v3, %v3888_v50  ;;  %v570_v7 = vmul.f32 %v568_v3, %v3894_v54  ;;  %v583_v8 = vmul.f32 %v582_v6, %v3888_v50  ;;  %v584_v10 = vmul.f32 %v582_v6, %v3894_v54 }
  0xba   : > { %331 = vrot.lane.b32.xlu1 %v326_v21, %s3701_s7  ;;  %343 = vrot.lane.b32.xlu0 %v339_v22, %s3701_s7  ;;  %v597_v11 = vmul.f32 %v596_v9, %v3888_v50  ;;  %v598_v14 = vmul.f32 %v596_v9, %v3894_v54  ;;  %v611_v15 = vmul.f32 %v610_v13, %v3888_v50  ;;  %v638_v20 = vstv %s3279_s4  ;;  %s3986_s4 = sld [smem:[#allocation3 + $0x59]] }
  0xbb   : > { %v612_v18 = vmul.f32 %v610_v13, %v3894_v54  ;;  %v625_v19 = vmul.f32 %v624_v16, %v3888_v50  ;;  %v626_v21 = vmul.f32 %v624_v16, %v3894_v54  ;;  %v639_v22 = vmul.f32 %v638_v20, %v3888_v50  ;;  %v4032_v16 = vld [vmem:[#allocation2 + $0x3] sm:$0xff] }
  0xbc   : > { %v652_v23 = vstv %s3280_s24  ;;  %v770_v47 = vstv %s3290_s27  ;;  %v812_v0 = vstv %s3293_s30  ;;  %s3994_s24 = sld [smem:[#allocation3 + $0xa4]] }
  0xbd   : > { %s4035_s27 = sld [smem:[#allocation3 + $0xa6]] }
  0xbe   : > { %345 = vrot.lane.b32.xlu1 %v340_v24, %s3701_s7  ;;  %357 = vrot.lane.b32.xlu0 %v353_v25, %s3702_s28  ;;  %v640_v24 = vmul.f32 %v638_v20, %v3894_v54  ;;  %v653_v25 = vmul.f32 %v652_v23, %v3888_v50  ;;  %s4053_s30 = sld [smem:[#allocation3 + $0x5c]] }
  0xc2   : > { %359 = vrot.lane.b32.xlu1 %v354_v27, %s3702_s28  ;;  %371 = vrot.lane.b32.xlu0 %v367_v28, %s3702_s28  ;;  %v686_v27 = vstv %s3284_s18  ;;  %v654_v28 = vmul.f32 %v652_v23, %v3894_v54  ;;  %s4005_s18 = sld [smem:[#allocation3 + $0x10]] }
  0xc3   : > { %v687_v29 = vmul.f32 %v686_v27, %v3940_v26 }
  0xc6   : > { %373 = vrot.lane.b32.xlu1 %v368_v30, %s3702_s28  ;;  %385 = vrot.lane.b32.xlu0 %v381_v31, %s3702_s28  ;;  %v3946_v30 = vld [vmem:[#allocation2 + $0xa] sm:$0xff]  ;;  %v700_v31 = vstv %s3285_s22  ;;  %s4007_s22 = sld [smem:[#allocation3]] }
  0xc7   : > { %v688_v32 = vmul.f32 %v686_v27, %v3946_v30  ;;  %v702_v35 = vmul.f32 %v700_v31, %v3946_v30 }
  0xca   : > { %387 = vrot.lane.b32.xlu1 %v382_v33, %s3702_s28  ;;  %399 = vrot.lane.b32.xlu0 %v395_v34, %s3703_s17  ;;  %v701_v33 = vmul.f32 %v700_v31, %v3940_v26  ;;  %v714_v34 = vstv %s3286_s5  ;;  %s4018_s5 = sld [smem:[#allocation3 + $0x5b]] }
  0xcb   : > { %v716_v38 = vmul.f32 %v714_v34, %v3946_v30 }
  0xce   : > { %401 = vrot.lane.b32.xlu1 %v396_v36, %s3703_s17  ;;  %413 = vrot.lane.b32.xlu0 %v409_v37, %s3703_s17  ;;  %v715_v36 = vmul.f32 %v714_v34, %v3940_v26  ;;  %v728_v37 = vstv %s3287_s6  ;;  %s4020_s6 = sld [smem:[#allocation3 + $0x4b]] }
  0xcf   : > { %v730_v41 = vmul.f32 %v728_v37, %v3946_v30 }
  0xd0   : > { %v888_v27 = vstv %s4018_s5  ;;  %s3307_s5 = sld [smem:[#allocation3 + $0xa8]] }
  0xd2   : > { %415 = vrot.lane.b32.xlu1 %v410_v39, %s3703_s17  ;;  %427 = vrot.lane.b32.xlu0 %v423_v40, %s3703_s17  ;;  %v729_v39 = vmul.f32 %v728_v37, %v3940_v26  ;;  %v742_v40 = vstv %s3288_s8  ;;  %s4024_s8 = sld [smem:[#allocation3 + $0x96]] }
  0xd6   : > { %429 = vrot.lane.b32.xlu1 %v424_v42, %s3703_s17  ;;  %441 = vrot.lane.b32.xlu0 %v437_v43, %s3704_s19  ;;  %v743_v42 = vmul.f32 %v742_v40, %v3940_v26  ;;  %v756_v43 = vstv %s3289_s16  ;;  %s4030_s16 = sld [smem:[#allocation3 + $0x5]] }
  0xd7   : > { %v758_v51 = vmul.f32 %v756_v43, %v3946_v30 }
  0xd8   : > { %v304_v31 = vstv %s4024_s8  ;;  %s3309_s8 = sld [smem:[#allocation3 + $0x5e]] }
  0xda   : > { %443 = vrot.lane.b32.xlu1 %v438_v45, %s3704_s19  ;;  %455 = vrot.lane.b32.xlu0 %v451_v46, %s3704_s19  ;;  %v744_v45 = vmul.f32 %v742_v40, %v3946_v30  ;;  %v757_v46 = vmul.f32 %v756_v43, %v3940_v26 }
  0xdc   : > { %v480_v40 = vstv %s4030_s16  ;;  %s4149_s16 = sld [smem:[#allocation3 + $0xa9]] }
  0xde   : > { %457 = vrot.lane.b32.xlu1 %v452_v48, %s3704_s19  ;;  %469 = vrot.lane.b32.xlu0 %v465_v49, %s3704_s19 }
  0xe2   : > { %471 = vrot.lane.b32.xlu1 %v466_v52, %s3704_s19  ;;  %503 = vrot.lane.b32.xlu0 %v499_v53, %s3701_s7  ;;  %v771_v52 = vmul.f32 %v770_v47, %v3940_v26  ;;  %v784_v53 = vstv %s3291_s29  ;;  %s4040_s29 = sld [smem:[#allocation3 + $0x50]] }
  0xe3   : > { %v785_v58 = vmul.f32 %v784_v53, %v3940_v26 }
  0xe6   : > { %505 = vrot.lane.b32.xlu1 %v500_v56, %s3701_s7  ;;  %517 = vrot.lane.b32.xlu0 %v513_v57, %s3701_s7  ;;  %v772_v57 = vmul.f32 %v770_v47, %v3946_v30  ;;  %v305_v47 = vmul.f32 %v304_v31, %v3838_v12 }
  0xea   : > { %519 = vrot.lane.b32.xlu1 %v514_v59, %s3701_s7  ;;  %531 = vrot.lane.b32.xlu0 %v527_v60, %s3701_s7  ;;  %v798_v59 = vstv %s3292_s26  ;;  %s4042_s26 = sld [smem:[#allocation3 + $0x11]] }
  0xeb   : > { %v800_v3 = vmul.f32 %v798_v59, %v3946_v30 }
  0xee   : > { %533 = vrot.lane.b32.xlu1 %v528_v62, %s3701_s7  ;;  %545 = vrot.lane.b32.xlu0 %v541_v63, %s3702_s28  ;;  %v786_v62 = vmul.f32 %v784_v53, %v3946_v30  ;;  %v799_v63 = vmul.f32 %v798_v59, %v3940_v26 }
  0xf2   : > { %547 = vrot.lane.b32.xlu1 %v542_v1, %s3702_s28  ;;  %559 = vrot.lane.b32.xlu0 %v555_v2, %s3702_s28 }
  0xf6   : > { %561 = vrot.lane.b32.xlu1 %v556_v4, %s3702_s28  ;;  %573 = vrot.lane.b32.xlu0 %v569_v5, %s3702_s28  ;;  %v813_v4 = vmul.f32 %v812_v0, %v3940_v26  ;;  %v826_v5 = vstv %s3986_s4  ;;  %s4066_s4 = sld [smem:[#allocation3 + $0x9b]] }
  0xf7   : > { %v827_v9 = vmul.f32 %v826_v5, %v3940_v26 }
  0xfa   : > { %575 = vrot.lane.b32.xlu1 %v570_v7, %s3702_s28  ;;  %587 = vrot.lane.b32.xlu0 %v583_v8, %s3703_s17  ;;  %v814_v8 = vmul.f32 %v812_v0, %v3946_v30 }
  0xfe   : > { %589 = vrot.lane.b32.xlu1 %v584_v10, %s3703_s17  ;;  %601 = vrot.lane.b32.xlu0 %v597_v11, %s3703_s17  ;;  %v840_v10 = vstv %s3994_s24  ;;  %s4075_s24 = sld [smem:[#allocation3 + $0xa7]] }
 0x102   : > { %603 = vrot.lane.b32.xlu1 %v598_v14, %s3703_s17  ;;  %615 = vrot.lane.b32.xlu0 %v611_v15, %s3703_s17  ;;  %v828_v14 = vmul.f32 %v826_v5, %v3946_v30  ;;  %v841_v15 = vmul.f32 %v840_v10, %v3940_v26 }
 0x106   : > { %617 = vrot.lane.b32.xlu1 %v612_v18, %s3703_s17  ;;  %629 = vrot.lane.b32.xlu0 %v625_v19, %s3704_s19  ;;  %v874_v18 = vstv %s4005_s18  ;;  %v292_v19 = vstv %s4007_s22  ;;  %s4094_s18 = sld [smem:[#allocation3 + $0x12]] }
 0x107   : > { %v875_v23 = vmul.f32 %v874_v18, %v4032_v16  ;;  %s4110_s22 = sld [smem:[#allocation3 + $0x5d]] }
 0x10a   : > { %631 = vrot.lane.b32.xlu1 %v626_v21, %s3704_s19  ;;  %643 = vrot.lane.b32.xlu0 %v639_v22, %s3704_s19  ;;  %v842_v22 = vmul.f32 %v840_v10, %v3946_v30 }
 0x10e   : > { %645 = vrot.lane.b32.xlu1 %v640_v24, %s3704_s19  ;;  %657 = vrot.lane.b32.xlu0 %v653_v25, %s3704_s19  ;;  %v4046_v24 = vld [vmem:[#allocation2 + $0xb] sm:$0xff]  ;;  %v293_v25 = vmul.f32 %v292_v19, %v3838_v12 }
 0x10f   : > { %v876_v34 = vmul.f32 %v874_v18, %v4046_v24  ;;  %v890_v53 = vmul.f32 %v888_v27, %v4046_v24 }
 0x112   : > { %659 = vrot.lane.b32.xlu1 %v654_v28, %s3704_s19  ;;  %691 = vrot.lane.b32.xlu0 %v687_v29, %s3701_s7  ;;  %v298_v28 = vstv %s4020_s6  ;;  %s3308_s6 = sld [smem:[#allocation3 + $0x13]] }
 0x113   : > { %v299_v37 = vmul.f32 %v298_v28, %v3838_v12  ;;  %v930_v12 = vstv %s4053_s30  ;;  %s4181_s30 = sld [smem:[#allocation3 + $0xa]] }
 0x116   : > { %693 = vrot.lane.b32.xlu1 %v688_v32, %s3701_s7  ;;  %705 = vrot.lane.b32.xlu0 %v701_v33, %s3701_s7 }
 0x11a   : > { %707 = vrot.lane.b32.xlu1 %v702_v35, %s3701_s7  ;;  %719 = vrot.lane.b32.xlu0 %v715_v36, %s3701_s7  ;;  %v889_v35 = vmul.f32 %v888_v27, %v4032_v16  ;;  %v294_v36 = vmul.f32 %v292_v19, %v3844_v17 }
 0x11e   : > { %721 = vrot.lane.b32.xlu1 %v716_v38, %s3701_s7  ;;  %733 = vrot.lane.b32.xlu0 %v729_v39, %s3702_s28  ;;  %v902_v39 = vstv %s4035_s27  ;;  %s4155_s27 = sld [smem:[#allocation3 + $0x15]] }
 0x122   : > { %735 = vrot.lane.b32.xlu1 %v730_v41, %s3702_s28  ;;  %747 = vrot.lane.b32.xlu0 %v743_v42, %s3702_s28  ;;  %v486_v41 = vstv %s4040_s29  ;;  %s4166_s29 = sld [smem:[#allocation3 + $0x60]] }
 0x123   : > { %v487_v5 = vmul.f32 %v486_v41, %v3888_v50 }
 0x124   : > { %v3966_v44 = vpop.permute.xlu0 %315 }
 0x125   : > { %v321_v29 = vadd.f32 %v3966_v44, %v293_v25  ;;  %v931_v25 = vmul.f32 %v930_v12, %v4032_v16 }
 0x126   : > { %749 = vrot.lane.b32.xlu1 %v744_v45, %s3702_s28  ;;  %761 = vrot.lane.b32.xlu0 %v757_v46, %s3702_s28  ;;  %v916_v45 = vstv %s4042_s26  ;;  %v300_v46 = vmul.f32 %v298_v28, %v3844_v17  ;;  %s4177_s26 = sld [smem:[#allocation3 + $0xab]] }
 0x128   : > { %v3972_v48 = vpop.permute.xlu1 %317  ;;  %v3974_v49 = vpop.permute.xlu0 %329 }
 0x129   : > { %v322_v42 = vadd.f32 %v3972_v48, %v294_v36  ;;  %v335_v43 = vadd.f32 %v3974_v49, %v299_v37  ;;  %v481_v49 = vmul.f32 %v480_v40, %v3888_v50 }
 0x12a   : > { %763 = vrot.lane.b32.xlu1 %v758_v51, %s3702_s28  ;;  %775 = vrot.lane.b32.xlu0 %v771_v52, %s3703_s17 }
 0x12c   : > { %v3980_v55 = vpop.permute.xlu1 %331  ;;  %v3982_v56 = vpop.permute.xlu0 %343 }
 0x12e   : > { %777 = vrot.lane.b32.xlu1 %v772_v57, %s3703_s17  ;;  %789 = vrot.lane.b32.xlu0 %v785_v58, %s3703_s17  ;;  %v903_v57 = vmul.f32 %v902_v39, %v4032_v16 }
 0x130   : > { %v3990_v60 = vpop.permute.xlu1 %345  ;;  %v358_v61 = vpop.permute.xlu0 %357 }
 0x131   : > { %v363_v38 = vadd.f32 %v358_v61, %v321_v29  ;;  %v336_v61 = vadd.f32 %v3980_v55, %v300_v46 }
 0x132   : > { %791 = vrot.lane.b32.xlu1 %v786_v62, %s3703_s17  ;;  %803 = vrot.lane.b32.xlu0 %v799_v63, %s3703_s17  ;;  %v306_v62 = vmul.f32 %v304_v31, %v3844_v17  ;;  %v349_v63 = vadd.f32 %v3982_v56, %v305_v47  ;;  %v904_v17 = vmul.f32 %v902_v39, %v4046_v24  ;;  %v958_v39 = vstv %s4094_s18  ;;  %s4194_s18 = sld [smem:[#allocation3 + $0x61]] }
 0x133   : > { %v960_v47 = vmul.f32 %v958_v39, %v4046_v24 }
 0x134   : > { %v3998_v1 = vpop.permute.xlu1 %359  ;;  %v4000_v2 = vpop.permute.xlu0 %371 }
 0x135   : > { %v364_v58 = vadd.f32 %v3998_v1, %v322_v42  ;;  %v377_v48 = vadd.f32 %v4000_v2, %v335_v43  ;;  %v482_v2 = vmul.f32 %v480_v40, %v3894_v54 }
 0x136   : > { %805 = vrot.lane.b32.xlu1 %v800_v3, %s3703_s17  ;;  %817 = vrot.lane.b32.xlu0 %v813_v4, %s3704_s19 }
 0x138   : > { %v4011_v6 = vpop.permute.xlu1 %373  ;;  %v4013_v7 = vpop.permute.xlu0 %385 }
 0x139   : > { %v391_v10 = vadd.f32 %v4013_v7, %v349_v63  ;;  %v1014_v63 = vstv %s3309_s8  ;;  %s4249_s8 = sld [smem:[#allocation3 + $0x62]] }
 0x13a   : > { %819 = vrot.lane.b32.xlu1 %v814_v8, %s3704_s19  ;;  %831 = vrot.lane.b32.xlu0 %v827_v9, %s3704_s19  ;;  %v917_v8 = vmul.f32 %v916_v45, %v4032_v16  ;;  %v378_v9 = vadd.f32 %v4011_v6, %v336_v61  ;;  %v488_v6 = vmul.f32 %v486_v41, %v3894_v54 }
 0x13c   : > { %v4026_v11 = vpop.permute.xlu1 %387  ;;  %v400_v13 = vpop.permute.xlu0 %399 }
 0x13d   : > { %v405_v44 = vadd.f32 %v400_v13, %v363_v38 }
 0x13e   : > { %833 = vrot.lane.b32.xlu1 %v828_v14, %s3704_s19  ;;  %845 = vrot.lane.b32.xlu0 %v841_v15, %s3704_s19  ;;  %v350_v14 = vadd.f32 %v3990_v60, %v306_v62  ;;  %v492_v15 = vstv %s4066_s4  ;;  %v944_v60 = vstv %s4075_s24  ;;  %s4183_s4 = sld [smem:[#allocation3 + $0x55]] }
 0x13f   : > { %v493_v29 = vmul.f32 %v492_v15, %v3888_v50  ;;  %v945_v50 = vmul.f32 %v944_v60, %v4032_v16  ;;  %v494_v37 = vmul.f32 %v492_v15, %v3894_v54  ;;  %v946_v43 = vmul.f32 %v944_v60, %v4046_v24  ;;  %s4187_s24 = sld [smem:[#allocation3 + $0x16]] }
 0x140   : > { %v402_v20 = vpop.permute.xlu1 %401  ;;  %v414_v21 = vpop.permute.xlu0 %413  ;;  %v392_v27 = vadd.f32 %v4026_v11, %v350_v14  ;;  %v932_v11 = vmul.f32 %v930_v12, %v4046_v24 }
 0x141   : > { %v406_v0 = vadd.f32 %v402_v20, %v364_v58  ;;  %v419_v3 = vadd.f32 %v414_v21, %v377_v48 }
 0x142   : > { %847 = vrot.lane.b32.xlu1 %v842_v22, %s3704_s19  ;;  %879 = vrot.lane.b32.xlu0 %v875_v23, %s3701_s7  ;;  %v918_v23 = vmul.f32 %v916_v45, %v4046_v24  ;;  %v972_v45 = vstv %s4110_s22  ;;  %s4204_s22 = sld [smem:[#allocation3 + $0xa0]] }
 0x143   : > { %v974_v58 = vmul.f32 %v972_v45, %v4046_v24 }
 0x144   : > { %v416_v32 = vpop.permute.xlu1 %415  ;;  %v428_v33 = vpop.permute.xlu0 %427 }
 0x145   : > { %v420_v18 = vadd.f32 %v416_v32, %v378_v9  ;;  %v433_v19 = vadd.f32 %v428_v33, %v391_v10  ;;  %v4174_v10 = vld [vmem:[#allocation2 + $0x4] sm:$0xff] }
 0x146   : > { %881 = vrot.lane.b32.xlu1 %v876_v34, %s3701_s7  ;;  %893 = vrot.lane.b32.xlu0 %v889_v35, %s3701_s7 }
 0x148   : > { %v430_v51 = vpop.permute.xlu1 %429  ;;  %v442_v52 = vpop.permute.xlu0 %441 }
 0x149   : > { %v447_v59 = vadd.f32 %v442_v52, %v405_v44  ;;  %v434_v32 = vadd.f32 %v430_v51, %v392_v27  ;;  %v959_v44 = vmul.f32 %v958_v39, %v4032_v16  ;;  %v973_v51 = vmul.f32 %v972_v45, %v4032_v16 }
 0x14a   : > { %895 = vrot.lane.b32.xlu1 %v890_v53, %s3701_s7  ;;  %907 = vrot.lane.b32.xlu0 %v903_v57, %s3701_s7  ;;  %v986_v52 = vstv %s3307_s5  ;;  %s4214_s5 = sld [smem:[#allocation3 + $0xac]] }
 0x14b   : > { %v4086_v1 = vadd.f32 %v481_v49, %v447_v59  ;;  %v987_v48 = vmul.f32 %v986_v52, %v4032_v16  ;;  %v1000_v49 = vstv %s3308_s6  ;;  %v988_v62 = vmul.f32 %v986_v52, %v4046_v24  ;;  %s4232_s6 = sld [smem:[#allocation3 + $0x17]] }
 0x14c   : > { %v444_v4 = vpop.permute.xlu1 %443  ;;  %v456_v55 = vpop.permute.xlu0 %455  ;;  %v1001_v12 = vmul.f32 %v1000_v49, %v4032_v16 }
 0x14d   : > { %v448_v56 = vadd.f32 %v444_v4, %v406_v0  ;;  %v461_v13 = vadd.f32 %v456_v55, %v419_v3  ;;  %v1015_v4 = vmul.f32 %v1014_v63, %v4032_v16 }
 0x14e   : > { %909 = vrot.lane.b32.xlu1 %v904_v17, %s3701_s7  ;;  %921 = vrot.lane.b32.xlu0 %v917_v8, %s3702_s28  ;;  %v1016_v8 = vmul.f32 %v1014_v63, %v4046_v24 }
 0x14f   : > { %v4100_v20 = vadd.f32 %v482_v2, %v448_v56  ;;  %v4102_v21 = vadd.f32 %v487_v5, %v461_v13  ;;  %v1002_v2 = vmul.f32 %v1000_v49, %v4046_v24  ;;  %v1028_v5 = vstv %s4149_s16  ;;  %s3322_s16 = sld [smem:[#allocation3 + $0xad]] }
 0x150   : > { %v458_v7 = vpop.permute.xlu1 %457  ;;  %v470_v22 = vpop.permute.xlu0 %469  ;;  %v1029_v9 = vmul.f32 %v1028_v5, %v4032_v16  ;;  %v1062_v56 = vstv %s4155_s27  ;;  %v1030_v15 = vmul.f32 %v1028_v5, %v4046_v24  ;;  %s3323_s27 = sld [smem:[#allocation3 + $0x18]] }
 0x151   : > { %v462_v28 = vadd.f32 %v458_v7, %v420_v18  ;;  %v475_v31 = vadd.f32 %v470_v22, %v433_v19  ;;  %v1063_v18 = vmul.f32 %v1062_v56, %v4174_v10  ;;  %v4189_v19 = vld [vmem:[#allocation2 + $0xc] sm:$0xff] }
 0x152   : > { %923 = vrot.lane.b32.xlu1 %v918_v23, %s3702_s28  ;;  %935 = vrot.lane.b32.xlu0 %v931_v25, %s3702_s28  ;;  %v1064_v25 = vmul.f32 %v1062_v56, %v4189_v19 }
 0x153   : > { %v4114_v33 = vadd.f32 %v488_v6, %v462_v28  ;;  %v4116_v34 = vadd.f32 %v493_v29, %v475_v31  ;;  %v1076_v6 = vstv %s4166_s29  ;;  %v1090_v28 = vstv %s4177_s26  ;;  %s3324_s29 = sld [smem:[#allocation3 + $0x63]] }
 0x154   : > { %v472_v35 = vpop.permute.xlu1 %471  ;;  %v4118_v36 = vpop.permute.xlu0 %503  ;;  %v1077_v60 = vmul.f32 %v1076_v6, %v4174_v10  ;;  %v668_v29 = vstv %s4181_s30  ;;  %s4288_s26 = sld [smem:[#allocation3 + $0xae]] }
 0x155   : > { %v476_v38 = vadd.f32 %v472_v35, %v434_v32  ;;  %v509_v7 = vadd.f32 %v4118_v36, %v4086_v1  ;;  %v670_v52 = vmul.f32 %v668_v29, %v3946_v30  ;;  %s4294_s30 = sld [smem:[#allocation3 + $0x1a]] }
 0x156   : > { %937 = vrot.lane.b32.xlu1 %v932_v11, %s3702_s28  ;;  %949 = vrot.lane.b32.xlu0 %v945_v50, %s3702_s28  ;;  %v1078_v11 = vmul.f32 %v1076_v6, %v4189_v19  ;;  %v1091_v50 = vmul.f32 %v1090_v28, %v4174_v10 }
 0x157   : > { %v4126_v40 = vadd.f32 %v494_v37, %v476_v38  ;;  %v674_v37 = vstv %s4183_s4  ;;  %v1104_v38 = vstv %s4187_s24  ;;  %s4305_s4 = sld [smem:[#allocation3 + $0x65]] }
 0x158   : > { %v4128_v41 = vpop.permute.xlu1 %505  ;;  %v4130_v42 = vpop.permute.xlu0 %517  ;;  %s4316_s24 = sld [smem:[#allocation3 + $0xb0]] }
 0x159   : > { %v510_v1 = vadd.f32 %v4128_v41, %v4100_v20  ;;  %v523_v31 = vadd.f32 %v4130_v42, %v4102_v21  ;;  %v1118_v41 = vstv %s4194_s18  ;;  %s4320_s18 = sld [smem:[#allocation3 + $0xf]] }
 0x15a   : > { %951 = vrot.lane.b32.xlu1 %v946_v43, %s3702_s28  ;;  %963 = vrot.lane.b32.xlu0 %v959_v44, %s3703_s17  ;;  %v669_v44 = vmul.f32 %v668_v29, %v3940_v26 }
 0x15c   : > { %v4137_v54 = vpop.permute.xlu1 %519  ;;  %v4139_v46 = vpop.permute.xlu0 %531 }
 0x15d   : > { %v524_v21 = vadd.f32 %v4137_v54, %v4114_v33  ;;  %v537_v42 = vadd.f32 %v4139_v46, %v4116_v34  ;;  %v1092_v33 = vmul.f32 %v1090_v28, %v4189_v19  ;;  %v1105_v54 = vmul.f32 %v1104_v38, %v4174_v10 }
 0x15e   : > { %965 = vrot.lane.b32.xlu1 %v960_v47, %s3703_s17  ;;  %977 = vrot.lane.b32.xlu0 %v973_v51, %s3703_s17 }
 0x160   : > { %v4145_v53 = vpop.permute.xlu1 %533  ;;  %v546_v57 = vpop.permute.xlu0 %545 }
 0x161   : > { %v551_v27 = vadd.f32 %v546_v57, %v509_v7 }
 0x162   : > { %979 = vrot.lane.b32.xlu1 %v974_v58, %s3703_s17  ;;  %991 = vrot.lane.b32.xlu0 %v987_v48, %s3703_s17  ;;  %v675_v58 = vmul.f32 %v674_v37, %v3940_v26 }
 0x164   : > { %v548_v59 = vpop.permute.xlu1 %547  ;;  %v560_v61 = vpop.permute.xlu0 %559 }
 0x165   : > { %v552_v39 = vadd.f32 %v548_v59, %v510_v1  ;;  %v565_v43 = vadd.f32 %v560_v61, %v523_v31  ;;  %v538_v61 = vadd.f32 %v4145_v53, %v4126_v40  ;;  %v1132_v40 = vstv %s4214_s5  ;;  %s4326_s5 = sld [smem:[#allocation3 + $0x1b]] }
 0x166   : > { %993 = vrot.lane.b32.xlu1 %v988_v62, %s3703_s17  ;;  %1005 = vrot.lane.b32.xlu0 %v1001_v12, %s3704_s19  ;;  %v680_v62 = vstv %s4204_s22  ;;  %v1134_v29 = vmul.f32 %v1132_v40, %v4189_v19  ;;  %v1160_v31 = vstv %s4249_s8  ;;  %s4322_s22 = sld [smem:[#allocation3 + $0x5a]] }
 0x167   : > { %v681_v56 = vmul.f32 %v680_v62, %v3940_v26  ;;  %v1133_v26 = vmul.f32 %v1132_v40, %v4174_v10  ;;  %s4339_s8 = sld [smem:[#allocation3 + $0x66]] }
 0x168   : > { %v4159_v0 = vpop.permute.xlu1 %561  ;;  %v4161_v3 = vpop.permute.xlu0 %573 }
 0x169   : > { %v566_v49 = vadd.f32 %v4159_v0, %v524_v21  ;;  %v579_v59 = vadd.f32 %v4161_v3, %v537_v42  ;;  %v676_v3 = vmul.f32 %v674_v37, %v3946_v30  ;;  %v1202_v42 = vstv %s3324_s29  ;;  %s4388_s29 = sld [smem:[#allocation3 + $0x67]] }
 0x16a   : > { %1007 = vrot.lane.b32.xlu1 %v1002_v2, %s3704_s19  ;;  %1019 = vrot.lane.b32.xlu0 %v1015_v4, %s3704_s19 }
 0x16c   : > { %v4170_v55 = vpop.permute.xlu1 %575  ;;  %v588_v17 = vpop.permute.xlu0 %587 }
 0x16d   : > { %v593_v32 = vadd.f32 %v588_v17, %v551_v27  ;;  %v1106_v17 = vmul.f32 %v1104_v38, %v4189_v19  ;;  %v580_v53 = vadd.f32 %v4170_v55, %v538_v61  ;;  %v1120_v55 = vmul.f32 %v1118_v41, %v4189_v19 }
 0x16e   : > { %1021 = vrot.lane.b32.xlu1 %v1016_v8, %s3704_s19  ;;  %1033 = vrot.lane.b32.xlu0 %v1029_v9, %s3704_s19  ;;  %v1119_v8 = vmul.f32 %v1118_v41, %v4174_v10  ;;  %v1162_v38 = vmul.f32 %v1160_v31, %v4189_v19 }
 0x170   : > { %v590_v13 = vpop.permute.xlu1 %589  ;;  %v602_v14 = vpop.permute.xlu0 %601 }
 0x171   : > { %v594_v45 = vadd.f32 %v590_v13, %v552_v39  ;;  %v607_v47 = vadd.f32 %v602_v14, %v565_v43  ;;  %v1188_v43 = vstv %s3323_s27  ;;  %s4372_s27 = sld [smem:[#allocation3 + $0x1c]] }
 0x172   : > { %1035 = vrot.lane.b32.xlu1 %v1030_v15, %s3704_s19  ;;  %1067 = vrot.lane.b32.xlu0 %v1063_v18, %s3701_s7  ;;  %v1189_v41 = vmul.f32 %v1188_v43, %v4174_v10 }
 0x174   : > { %v604_v22 = vpop.permute.xlu1 %603  ;;  %v616_v23 = vpop.permute.xlu0 %615 }
 0x175   : > { %v608_v12 = vadd.f32 %v604_v22, %v566_v49  ;;  %v621_v63 = vadd.f32 %v616_v23, %v579_v59  ;;  %v682_v22 = vmul.f32 %v680_v62, %v3946_v30  ;;  %v4313_v59 = vld [vmem:[#allocation2 + $0x18] sm:$0xff] }
 0x176   : > { %1069 = vrot.lane.b32.xlu1 %v1064_v25, %s3701_s7  ;;  %1081 = vrot.lane.b32.xlu0 %v1077_v60, %s3701_s7  ;;  %v1146_v25 = vstv %s4232_s6  ;;  %s4333_s6 = sld [smem:[#allocation3 + $0xa5]] }
 0x177   : > { %v1147_v1 = vmul.f32 %v1146_v25, %v4174_v10 }
 0x178   : > { %v618_v35 = vpop.permute.xlu1 %617  ;;  %v630_v36 = vpop.permute.xlu0 %629 }
 0x179   : > { %v635_v20 = vadd.f32 %v630_v36, %v593_v32  ;;  %v622_v14 = vadd.f32 %v618_v35, %v580_v53  ;;  %v1148_v35 = vmul.f32 %v1146_v25, %v4189_v19  ;;  %v1161_v36 = vmul.f32 %v1160_v31, %v4174_v10 }
 0x17a   : > { %1083 = vrot.lane.b32.xlu1 %v1078_v11, %s3701_s7  ;;  %1095 = vrot.lane.b32.xlu0 %v1091_v50, %s3701_s7  ;;  %v1174_v11 = vstv %s3322_s16  ;;  %s4354_s16 = sld [smem:[#allocation3 + $0xb1]] }
 0x17b   : > { %v4224_v51 = vadd.f32 %v669_v44, %v635_v20  ;;  %v1175_v39 = vmul.f32 %v1174_v11, %v4174_v10  ;;  %v1176_v21 = vmul.f32 %v1174_v11, %v4189_v19 }
 0x17c   : > { %v632_v57 = vpop.permute.xlu1 %631  ;;  %v644_v48 = vpop.permute.xlu0 %643 }
 0x17d   : > { %v636_v34 = vadd.f32 %v632_v57, %v594_v45  ;;  %v649_v46 = vadd.f32 %v644_v48, %v607_v47  ;;  %v1203_v57 = vmul.f32 %v1202_v42, %v4174_v10 }
 0x17e   : > { %1097 = vrot.lane.b32.xlu1 %v1092_v33, %s3701_s7  ;;  %1109 = vrot.lane.b32.xlu0 %v1105_v54, %s3702_s28  ;;  %v1204_v54 = vmul.f32 %v1202_v42, %v4189_v19 }
 0x17f   : > { %v4239_v2 = vadd.f32 %v670_v52, %v636_v34  ;;  %v4241_v0 = vadd.f32 %v675_v58, %v649_v46  ;;  %v1190_v52 = vmul.f32 %v1188_v43, %v4189_v19  ;;  %v1216_v58 = vstv %s4288_s26  ;;  %s3337_s26 = sld [smem:[#allocation3 + $0xb2]] }
 0x180   : > { %v646_v4 = vpop.permute.xlu1 %645  ;;  %v658_v5 = vpop.permute.xlu0 %657  ;;  %v1217_v49 = vmul.f32 %v1216_v58, %v4174_v10  ;;  %v1251_v34 = vstv %s4294_s30  ;;  %v1218_v62 = vmul.f32 %v1216_v58, %v4189_v19  ;;  %v1307_v43 = vstv %s4339_s8  ;;  %s3338_s30 = sld [smem:[#allocation3 + $0x1d]] }
 0x181   : > { %v650_v9 = vadd.f32 %v646_v4, %v608_v12  ;;  %v663_v13 = vadd.f32 %v658_v5, %v621_v63  ;;  %v1252_v12 = vmul.f32 %v1251_v34, %v4313_v59  ;;  %v4328_v63 = vld [vmem:[#allocation2 + $0x20] sm:$0xff]  ;;  %s4463_s8 = sld [smem:[#allocation3 + $0x5f]] }
 0x182   : > { %1111 = vrot.lane.b32.xlu1 %v1106_v17, %s3702_s28  ;;  %1123 = vrot.lane.b32.xlu0 %v1119_v8, %s3702_s28  ;;  %v1253_v8 = vmul.f32 %v1251_v34, %v4328_v63 }
 0x183   : > { %v4253_v15 = vadd.f32 %v676_v3, %v650_v9  ;;  %v4255_v18 = vadd.f32 %v681_v56, %v663_v13  ;;  %v1265_v3 = vstv %s4305_s4  ;;  %v1279_v9 = vstv %s4316_s24  ;;  %s3339_s4 = sld [smem:[#allocation3 + $0x68]] }
 0x184   : > { %v660_v6 = vpop.permute.xlu1 %659  ;;  %v4257_v7 = vpop.permute.xlu0 %691  ;;  %v1266_v40 = vmul.f32 %v1265_v3, %v4313_v59  ;;  %v856_v56 = vstv %s4320_s18  ;;  %s4427_s24 = sld [smem:[#allocation3 + $0xb3]] }
 0x185   : > { %v664_v23 = vadd.f32 %v660_v6, %v622_v14  ;;  %v697_v4 = vadd.f32 %v4257_v7, %v4224_v51  ;;  %s4433_s18 = sld [smem:[#allocation3 + $0x1f]] }
 0x186   : > { %1125 = vrot.lane.b32.xlu1 %v1120_v55, %s3702_s28  ;;  %1137 = vrot.lane.b32.xlu0 %v1133_v26, %s3702_s28  ;;  %v1267_v55 = vmul.f32 %v1265_v3, %v4328_v63  ;;  %v1280_v26 = vmul.f32 %v1279_v9, %v4313_v59 }
 0x187   : > { %v4265_v60 = vadd.f32 %v682_v22, %v664_v23  ;;  %v862_v22 = vstv %s4322_s22  ;;  %v1293_v23 = vstv %s4326_s5  ;;  %s4444_s22 = sld [smem:[#allocation3 + $0x6a]] }
 0x188   : > { %v4267_v27 = vpop.permute.xlu1 %693  ;;  %v4269_v28 = vpop.permute.xlu0 %705  ;;  %s4452_s5 = sld [smem:[#allocation3 + $0x14]] }
 0x189   : > { %v698_v51 = vadd.f32 %v4267_v27, %v4239_v2  ;;  %v711_v13 = vadd.f32 %v4269_v28, %v4241_v0  ;;  %v858_v0 = vmul.f32 %v856_v56, %v4046_v24  ;;  %v868_v27 = vstv %s4333_s6  ;;  %s4457_s6 = sld [smem:[#allocation3 + $0xb5]] }
 0x18a   : > { %1139 = vrot.lane.b32.xlu1 %v1134_v29, %s3702_s28  ;;  %1151 = vrot.lane.b32.xlu0 %v1147_v1, %s3703_s17  ;;  %v857_v1 = vmul.f32 %v856_v56, %v4032_v16  ;;  %v869_v58 = vmul.f32 %v868_v27, %v4032_v16 }
 0x18c   : > { %v4276_v30 = vpop.permute.xlu1 %707  ;;  %v4278_v32 = vpop.permute.xlu0 %719 }
 0x18d   : > { %v712_v2 = vadd.f32 %v4276_v30, %v4253_v15  ;;  %v725_v28 = vadd.f32 %v4278_v32, %v4255_v18  ;;  %v1281_v15 = vmul.f32 %v1279_v9, %v4328_v63  ;;  %v1294_v30 = vmul.f32 %v1293_v23, %v4313_v59 }
 0x18e   : > { %1153 = vrot.lane.b32.xlu1 %v1148_v35, %s3703_s17  ;;  %1165 = vrot.lane.b32.xlu0 %v1161_v36, %s3703_s17 }
 0x190   : > { %v4284_v50 = vpop.permute.xlu1 %721  ;;  %v734_v37 = vpop.permute.xlu0 %733 }
 0x191   : > { %v739_v53 = vadd.f32 %v734_v37, %v697_v4  ;;  %v726_v18 = vadd.f32 %v4284_v50, %v4265_v60  ;;  %v1308_v60 = vmul.f32 %v1307_v43, %v4313_v59 }
 0x192   : > { %1167 = vrot.lane.b32.xlu1 %v1162_v38, %s3703_s17  ;;  %1179 = vrot.lane.b32.xlu0 %v1175_v39, %s3703_s17  ;;  %v863_v38 = vmul.f32 %v862_v22, %v4032_v16 }
 0x194   : > { %v736_v44 = vpop.permute.xlu1 %735  ;;  %v748_v20 = vpop.permute.xlu0 %747 }
 0x195   : > { %v740_v25 = vadd.f32 %v736_v44, %v698_v51  ;;  %v753_v29 = vadd.f32 %v748_v20, %v711_v13  ;;  %v1349_v13 = vstv %s4388_s29  ;;  %s4478_s29 = sld [smem:[#allocation3 + $0x6b]] }
 0x196   : > { %1181 = vrot.lane.b32.xlu1 %v1176_v21, %s3703_s17  ;;  %1193 = vrot.lane.b32.xlu0 %v1189_v41, %s3704_s19 }
 0x198   : > { %v4298_v45 = vpop.permute.xlu1 %749  ;;  %v4300_v47 = vpop.permute.xlu0 %761 }
 0x199   : > { %v754_v44 = vadd.f32 %v4298_v45, %v712_v2  ;;  %v767_v20 = vadd.f32 %v4300_v47, %v725_v28  ;;  %v864_v45 = vmul.f32 %v862_v22, %v4046_v24 }
 0x19a   : > { %1195 = vrot.lane.b32.xlu1 %v1190_v52, %s3704_s19  ;;  %1207 = vrot.lane.b32.xlu0 %v1203_v57, %s3704_s19 }
 0x19c   : > { %v4309_v48 = vpop.permute.xlu1 %763  ;;  %v776_v33 = vpop.permute.xlu0 %775 }
 0x19d   : > { %v781_v14 = vadd.f32 %v776_v33, %v739_v53  ;;  %v768_v50 = vadd.f32 %v4309_v48, %v726_v18  ;;  %v1309_v48 = vmul.f32 %v1307_v43, %v4328_v63 }
 0x19e   : > { %1209 = vrot.lane.b32.xlu1 %v1204_v54, %s3704_s19  ;;  %1221 = vrot.lane.b32.xlu0 %v1217_v49, %s3704_s19  ;;  %v1295_v54 = vmul.f32 %v1293_v23, %v4328_v63  ;;  %v1351_v23 = vmul.f32 %v1349_v13, %v4328_v63 }
 0x1a0   : > { %v778_v46 = vpop.permute.xlu1 %777  ;;  %v790_v61 = vpop.permute.xlu0 %789 }
 0x1a1   : > { %v782_v35 = vadd.f32 %v778_v46, %v740_v25  ;;  %v795_v36 = vadd.f32 %v790_v61, %v753_v29  ;;  %v1321_v46 = vstv %s4354_s16  ;;  %v1377_v29 = vstv %s3338_s30  ;;  %s4468_s16 = sld [smem:[#allocation3 + $0x20]] }
 0x1a2   : > { %1223 = vrot.lane.b32.xlu1 %v1218_v62, %s3704_s19  ;;  %1256 = vrot.lane.b32.xlu0 %v1252_v12, %s3701_s7  ;;  %v1322_v4 = vmul.f32 %v1321_v46, %v4313_v59  ;;  %v1323_v56 = vmul.f32 %v1321_v46, %v4328_v63  ;;  %s4511_s30 = sld [smem:[#allocation3 + $0x21]] }
 0x1a4   : > { %v792_v5 = vpop.permute.xlu1 %791  ;;  %v804_v17 = vpop.permute.xlu0 %803 }
 0x1a5   : > { %v796_v32 = vadd.f32 %v792_v5, %v754_v44  ;;  %v809_v42 = vadd.f32 %v804_v17, %v767_v20  ;;  %v870_v5 = vmul.f32 %v868_v27, %v4046_v24  ;;  %v1391_v27 = vstv %s3339_s4  ;;  %v4454_v44 = vld [vmem:[#allocation2 + $0x19] sm:$0xff]  ;;  %s4527_s4 = sld [smem:[#allocation3 + $0x6c]] }
 0x1a6   : > { %1258 = vrot.lane.b32.xlu1 %v1253_v8, %s3701_s7  ;;  %1270 = vrot.lane.b32.xlu0 %v1266_v40, %s3701_s7  ;;  %v1335_v8 = vstv %s4372_s27  ;;  %v1439_v20 = vstv %s4433_s18  ;;  %s4472_s27 = sld [smem:[#allocation3 + $0xaa]] }
 0x1a7   : > { %v1336_v51 = vmul.f32 %v1335_v8, %v4313_v59  ;;  %s3353_s18 = sld [smem:[#allocation3 + $0x22]] }
 0x1a8   : > { %v806_v6 = vpop.permute.xlu1 %805  ;;  %v818_v7 = vpop.permute.xlu0 %817 }
 0x1a9   : > { %v823_v31 = vadd.f32 %v818_v7, %v781_v14  ;;  %v810_v61 = vadd.f32 %v806_v6, %v768_v50  ;;  %v1337_v6 = vmul.f32 %v1335_v8, %v4328_v63  ;;  %v1350_v7 = vmul.f32 %v1349_v13, %v4313_v59 }
 0x1aa   : > { %1272 = vrot.lane.b32.xlu1 %v1267_v55, %s3701_s7  ;;  %1284 = vrot.lane.b32.xlu0 %v1280_v26, %s3701_s7  ;;  %v1363_v55 = vstv %s3337_s26  ;;  %v1481_v13 = vstv %s4468_s16  ;;  %s4493_s26 = sld [smem:[#allocation3 + $0xb6]] }
 0x1ab   : > { %v4364_v11 = vadd.f32 %v857_v1, %v823_v31  ;;  %v1364_v25 = vmul.f32 %v1363_v55, %v4313_v59  ;;  %v1365_v2 = vmul.f32 %v1363_v55, %v4328_v63  ;;  %s4591_s16 = sld [smem:[#allocation3 + $0x19]] }
 0x1ac   : > { %v820_v37 = vpop.permute.xlu1 %819  ;;  %v832_v39 = vpop.permute.xlu0 %831 }
 0x1ad   : > { %v824_v21 = vadd.f32 %v820_v37, %v782_v35  ;;  %v837_v41 = vadd.f32 %v832_v39, %v795_v36  ;;  %v1379_v36 = vmul.f32 %v1377_v29, %v4328_v63  ;;  %v1392_v37 = vmul.f32 %v1391_v27, %v4313_v59 }
 0x1ae   : > { %1286 = vrot.lane.b32.xlu1 %v1281_v15, %s3701_s7  ;;  %1298 = vrot.lane.b32.xlu0 %v1294_v30, %s3702_s28  ;;  %v1393_v30 = vmul.f32 %v1391_v27, %v4328_v63 }
 0x1af   : > { %v4378_v52 = vadd.f32 %v858_v0, %v824_v21  ;;  %v4380_v57 = vadd.f32 %v863_v38, %v837_v41  ;;  %v1378_v0 = vmul.f32 %v1377_v29, %v4313_v59  ;;  %v1405_v38 = vstv %s4427_s24  ;;  %s3352_s24 = sld [smem:[#allocation3 + $0xb7]] }
 0x1b0   : > { %v834_v47 = vpop.permute.xlu1 %833  ;;  %v846_v33 = vpop.permute.xlu0 %845  ;;  %v1406_v43 = vmul.f32 %v1405_v38, %v4313_v59  ;;  %v1407_v18 = vmul.f32 %v1405_v38, %v4328_v63  ;;  %v1495_v29 = vstv %s4478_s29  ;;  %s4602_s29 = sld [smem:[#allocation3 + $0x64]] }
 0x1b1   : > { %v838_v49 = vadd.f32 %v834_v47, %v796_v32  ;;  %v851_v34 = vadd.f32 %v846_v33, %v809_v42  ;;  %v1440_v32 = vmul.f32 %v1439_v20, %v4454_v44  ;;  %v4465_v42 = vld [vmem:[#allocation2 + $0x21] sm:$0xff] }
 0x1b2   : > { %1300 = vrot.lane.b32.xlu1 %v1295_v54, %s3702_s28  ;;  %1312 = vrot.lane.b32.xlu0 %v1308_v60, %s3702_s28  ;;  %v1441_v54 = vmul.f32 %v1439_v20, %v4465_v42 }
 0x1b3   : > { %v4392_v62 = vadd.f32 %v864_v45, %v838_v49  ;;  %v4394_v16 = vadd.f32 %v869_v58, %v851_v34  ;;  %v1453_v45 = vstv %s4444_s22  ;;  %v1044_v49 = vstv %s4452_s5  ;;  %s3354_s22 = sld [smem:[#allocation3 + $0x6d]] }
 0x1b4   : > { %v848_v12 = vpop.permute.xlu1 %847  ;;  %v4396_v3 = vpop.permute.xlu0 %879  ;;  %v1454_v60 = vmul.f32 %v1453_v45, %v4454_v44  ;;  %v1467_v34 = vstv %s4457_s6  ;;  %s4566_s5 = sld [smem:[#allocation3 + $0xb8]] }
 0x1b5   : > { %v852_v17 = vadd.f32 %v848_v12, %v810_v61  ;;  %v885_v47 = vadd.f32 %v4396_v3, %v4364_v11  ;;  %v1045_v3 = vmul.f32 %v1044_v49, %v4174_v10  ;;  %s4572_s6 = sld [smem:[#allocation3 + $0x24]] }
 0x1b6   : > { %1314 = vrot.lane.b32.xlu1 %v1309_v48, %s3702_s28  ;;  %1326 = vrot.lane.b32.xlu0 %v1322_v4, %s3702_s28  ;;  %v1455_v4 = vmul.f32 %v1453_v45, %v4465_v42 }
 0x1b7   : > { %v4404_v40 = vadd.f32 %v870_v5, %v852_v17  ;;  %v1468_v5 = vmul.f32 %v1467_v34, %v4454_v44  ;;  %v1050_v17 = vstv %s4463_s8  ;;  %s4583_s8 = sld [smem:[#allocation3 + $0x6f]] }
 0x1b8   : > { %v4406_v53 = vpop.permute.xlu1 %881  ;;  %v4408_v9 = vpop.permute.xlu0 %893 }
 0x1b9   : > { %v886_v11 = vadd.f32 %v4406_v53, %v4378_v52  ;;  %v899_v46 = vadd.f32 %v4408_v9, %v4380_v57  ;;  %v1046_v57 = vmul.f32 %v1044_v49, %v4189_v19  ;;  %v1056_v53 = vstv %s4472_s27  ;;  %s4596_s27 = sld [smem:[#allocation3 + $0xba]] }
 0x1ba   : > { %1328 = vrot.lane.b32.xlu1 %v1323_v56, %s3702_s28  ;;  %1340 = vrot.lane.b32.xlu0 %v1336_v51, %s3703_s17  ;;  %v1057_v38 = vmul.f32 %v1056_v53, %v4174_v10 }
 0x1bc   : > { %v4415_v24 = vpop.permute.xlu1 %895  ;;  %v4417_v14 = vpop.permute.xlu0 %907 }
 0x1bd   : > { %v900_v52 = vadd.f32 %v4415_v24, %v4392_v62  ;;  %v913_v9 = vadd.f32 %v4417_v14, %v4394_v16  ;;  %v1469_v62 = vmul.f32 %v1467_v34, %v4465_v42  ;;  %v1482_v24 = vmul.f32 %v1481_v13, %v4454_v44 }
 0x1be   : > { %1342 = vrot.lane.b32.xlu1 %v1337_v6, %s3703_s17  ;;  %1354 = vrot.lane.b32.xlu0 %v1350_v7, %s3703_s17 }
 0x1c0   : > { %v4423_v26 = vpop.permute.xlu1 %909  ;;  %v922_v22 = vpop.permute.xlu0 %921 }
 0x1c1   : > { %v927_v50 = vadd.f32 %v922_v22, %v885_v47  ;;  %v914_v16 = vadd.f32 %v4423_v26, %v4404_v40  ;;  %v1496_v40 = vmul.f32 %v1495_v29, %v4454_v44 }
 0x1c2   : > { %1356 = vrot.lane.b32.xlu1 %v1351_v23, %s3703_s17  ;;  %1368 = vrot.lane.b32.xlu0 %v1364_v25, %s3703_s17  ;;  %v1051_v23 = vmul.f32 %v1050_v17, %v4174_v10 }
 0x1c4   : > { %v924_v1 = vpop.permute.xlu1 %923  ;;  %v936_v31 = vpop.permute.xlu0 %935 }
 0x1c5   : > { %v928_v8 = vadd.f32 %v924_v1, %v886_v11  ;;  %v941_v56 = vadd.f32 %v936_v31, %v899_v46  ;;  %v1537_v46 = vstv %s4527_s4  ;;  %s4617_s4 = sld [smem:[#allocation3 + $0x70]] }
 0x1c6   : > { %1370 = vrot.lane.b32.xlu1 %v1365_v2, %s3703_s17  ;;  %1382 = vrot.lane.b32.xlu0 %v1378_v0, %s3704_s19 }
 0x1c8   : > { %v4437_v28 = vpop.permute.xlu1 %937  ;;  %v4439_v35 = vpop.permute.xlu0 %949 }
 0x1c9   : > { %v942_v1 = vadd.f32 %v4437_v28, %v900_v52  ;;  %v955_v31 = vadd.f32 %v4439_v35, %v913_v9  ;;  %v1052_v28 = vmul.f32 %v1050_v17, %v4189_v19  ;;  %v1539_v17 = vmul.f32 %v1537_v46, %v4465_v42 }
 0x1ca   : > { %1384 = vrot.lane.b32.xlu1 %v1379_v36, %s3704_s19  ;;  %1396 = vrot.lane.b32.xlu0 %v1392_v37, %s3704_s19 }
 0x1cc   : > { %v4448_v39 = vpop.permute.xlu1 %951  ;;  %v964_v15 = vpop.permute.xlu0 %963 }
 0x1cd   : > { %v969_v61 = vadd.f32 %v964_v15, %v927_v50  ;;  %v956_v26 = vadd.f32 %v4448_v39, %v914_v16  ;;  %v1497_v39 = vmul.f32 %v1495_v29, %v4465_v42 }
 0x1ce   : > { %1398 = vrot.lane.b32.xlu1 %v1393_v30, %s3704_s19  ;;  %1410 = vrot.lane.b32.xlu0 %v1406_v43, %s3704_s19  ;;  %v1483_v30 = vmul.f32 %v1481_v13, %v4465_v42 }
 0x1d0   : > { %v966_v21 = vpop.permute.xlu1 %965  ;;  %v978_v41 = vpop.permute.xlu0 %977 }
 0x1d1   : > { %v970_v6 = vadd.f32 %v966_v21, %v928_v8  ;;  %v983_v7 = vadd.f32 %v978_v41, %v941_v56  ;;  %v1509_v21 = vstv %s4493_s26  ;;  %v1565_v56 = vstv %s3353_s18  ;;  %s4607_s26 = sld [smem:[#allocation3 + $0x25]] }
 0x1d2   : > { %1412 = vrot.lane.b32.xlu1 %v1407_v18, %s3704_s19  ;;  %1444 = vrot.lane.b32.xlu0 %v1440_v32, %s3701_s7  ;;  %v1510_v47 = vmul.f32 %v1509_v21, %v4454_v44  ;;  %v1511_v34 = vmul.f32 %v1509_v21, %v4465_v42  ;;  %s4650_s18 = sld [smem:[#allocation3 + $0x26]] }
 0x1d4   : > { %v980_v58 = vpop.permute.xlu1 %979  ;;  %v992_v33 = vpop.permute.xlu0 %991 }
 0x1d5   : > { %v984_v14 = vadd.f32 %v980_v58, %v942_v1  ;;  %v997_v27 = vadd.f32 %v992_v33, %v955_v31  ;;  %v1058_v58 = vmul.f32 %v1056_v53, %v4189_v19  ;;  %v1579_v53 = vstv %s3354_s22  ;;  %v4593_v1 = vld [vmem:[#allocation2 + $0x1a] sm:$0xff]  ;;  %s4666_s22 = sld [smem:[#allocation3 + $0x71]] }
 0x1d6   : > { %1446 = vrot.lane.b32.xlu1 %v1441_v54, %s3701_s7  ;;  %1458 = vrot.lane.b32.xlu0 %v1454_v60, %s3701_s7  ;;  %v1523_v54 = vstv %s4511_s30  ;;  %v1627_v31 = vstv %s4572_s6  ;;  %s4613_s30 = sld [smem:[#allocation3 + $0xaf]] }
 0x1d7   : > { %v1524_v11 = vmul.f32 %v1523_v54, %v4454_v44  ;;  %s3368_s6 = sld [smem:[#allocation3 + $0x27]] }
 0x1d8   : > { %v994_v12 = vpop.permute.xlu1 %993  ;;  %v1006_v48 = vpop.permute.xlu0 %1005 }
 0x1d9   : > { %v1011_v51 = vadd.f32 %v1006_v48, %v969_v61  ;;  %v998_v41 = vadd.f32 %v994_v12, %v956_v26  ;;  %v1525_v12 = vmul.f32 %v1523_v54, %v4465_v42  ;;  %v1551_v48 = vstv %s3352_s24  ;;  %s4632_s24 = sld [smem:[#allocation3 + $0xbb]] }
 0x1da   : > { %1460 = vrot.lane.b32.xlu1 %v1455_v4, %s3701_s7  ;;  %1472 = vrot.lane.b32.xlu0 %v1468_v5, %s3701_s7  ;;  %v1552_v8 = vmul.f32 %v1551_v48, %v4454_v44  ;;  %v1553_v52 = vmul.f32 %v1551_v48, %v4465_v42 }
 0x1db   : > { %v4503_v55 = vadd.f32 %v1045_v3, %v1011_v51  ;;  %v1538_v3 = vmul.f32 %v1537_v46, %v4454_v44  ;;  %v1669_v46 = vstv %s4607_s26  ;;  %s4730_s26 = sld [smem:[#allocation3 + $0x1e]] }
 0x1dc   : > { %v1008_v22 = vpop.permute.xlu1 %1007  ;;  %v1020_v25 = vpop.permute.xlu0 %1019 }
 0x1dd   : > { %v1012_v2 = vadd.f32 %v1008_v22, %v970_v6  ;;  %v1025_v0 = vadd.f32 %v1020_v25, %v983_v7  ;;  %v1567_v7 = vmul.f32 %v1565_v56, %v4465_v42  ;;  %v1580_v22 = vmul.f32 %v1579_v53, %v4454_v44 }
 0x1de   : > { %1474 = vrot.lane.b32.xlu1 %v1469_v62, %s3701_s7  ;;  %1486 = vrot.lane.b32.xlu0 %v1482_v24, %s3702_s28  ;;  %v1581_v24 = vmul.f32 %v1579_v53, %v4465_v42 }
 0x1df   : > { %v4517_v36 = vadd.f32 %v1046_v57, %v1012_v2  ;;  %v4519_v37 = vadd.f32 %v1051_v23, %v1025_v0  ;;  %v1566_v57 = vmul.f32 %v1565_v56, %v4454_v44  ;;  %v1593_v23 = vstv %s4566_s5  ;;  %s3367_s5 = sld [smem:[#allocation3 + $0xbc]] }
 0x1e0   : > { %v1022_v35 = vpop.permute.xlu1 %1021  ;;  %v1034_v15 = vpop.permute.xlu0 %1033  ;;  %v1594_v29 = vmul.f32 %v1593_v23, %v4454_v44  ;;  %v1595_v16 = vmul.f32 %v1593_v23, %v4465_v42  ;;  %v1683_v56 = vstv %s4617_s4  ;;  %s4741_s4 = sld [smem:[#allocation3 + $0x69]] }
 0x1e1   : > { %v1026_v43 = vadd.f32 %v1022_v35, %v984_v14  ;;  %v1039_v20 = vadd.f32 %v1034_v15, %v997_v27  ;;  %v1628_v14 = vmul.f32 %v1627_v31, %v4593_v1  ;;  %v4604_v27 = vld [vmem:[#allocation2 + $0x22] sm:$0xff] }
 0x1e2   : > { %1488 = vrot.lane.b32.xlu1 %v1483_v30, %s3702_s28  ;;  %1500 = vrot.lane.b32.xlu0 %v1496_v40, %s3702_s28  ;;  %v1629_v30 = vmul.f32 %v1627_v31, %v4604_v27 }
 0x1e3   : > { %v4531_v18 = vadd.f32 %v1052_v28, %v1026_v43  ;;  %v4533_v10 = vadd.f32 %v1057_v38, %v1039_v20  ;;  %v1641_v28 = vstv %s4583_s8  ;;  %v1233_v43 = vstv %s4591_s16  ;;  %s3369_s8 = sld [smem:[#allocation3 + $0x72]] }
 0x1e4   : > { %v1036_v32 = vpop.permute.xlu1 %1035  ;;  %v4535_v45 = vpop.permute.xlu0 %1067  ;;  %v1642_v40 = vmul.f32 %v1641_v28, %v4593_v1  ;;  %v1655_v20 = vstv %s4596_s27  ;;  %s4705_s16 = sld [smem:[#allocation3 + $0xbd]] }
 0x1e5   : > { %v1040_v33 = vadd.f32 %v1036_v32, %v998_v41  ;;  %v1073_v35 = vadd.f32 %v4535_v45, %v4503_v55  ;;  %v1234_v45 = vmul.f32 %v1233_v43, %v4313_v59  ;;  %s4711_s27 = sld [smem:[#allocation3 + $0x29]] }
 0x1e6   : > { %1502 = vrot.lane.b32.xlu1 %v1497_v39, %s3702_s28  ;;  %1514 = vrot.lane.b32.xlu0 %v1510_v47, %s3702_s28  ;;  %v1643_v47 = vmul.f32 %v1641_v28, %v4604_v27 }
 0x1e7   : > { %v4543_v60 = vadd.f32 %v1058_v58, %v1040_v33  ;;  %v1656_v58 = vmul.f32 %v1655_v20, %v4593_v1  ;;  %v1239_v33 = vstv %s4602_s29  ;;  %s4722_s29 = sld [smem:[#allocation3 + $0x74]] }
 0x1e8   : > { %v4545_v50 = vpop.permute.xlu1 %1069  ;;  %v4547_v49 = vpop.permute.xlu0 %1081 }
 0x1e9   : > { %v1074_v55 = vadd.f32 %v4545_v50, %v4517_v36  ;;  %v1087_v21 = vadd.f32 %v4547_v49, %v4519_v37  ;;  %v1235_v37 = vmul.f32 %v1233_v43, %v4328_v63  ;;  %v1657_v50 = vmul.f32 %v1655_v20, %v4604_v27 }
 0x1ea   : > { %1516 = vrot.lane.b32.xlu1 %v1511_v34, %s3702_s28  ;;  %1528 = vrot.lane.b32.xlu0 %v1524_v11, %s3703_s17 }
 0x1ec   : > { %v4554_v19 = vpop.permute.xlu1 %1083  ;;  %v4556_v61 = vpop.permute.xlu0 %1095 }
 0x1ed   : > { %v1088_v36 = vadd.f32 %v4554_v19, %v4531_v18  ;;  %v1101_v49 = vadd.f32 %v4556_v61, %v4533_v10  ;;  %v1670_v18 = vmul.f32 %v1669_v46, %v4593_v1  ;;  %v1245_v19 = vstv %s4613_s30  ;;  %s4735_s30 = sld [smem:[#allocation3 + $0xbf]] }
 0x1ee   : > { %1530 = vrot.lane.b32.xlu1 %v1525_v12, %s3703_s17  ;;  %1542 = vrot.lane.b32.xlu0 %v1538_v3, %s3703_s17  ;;  %v1246_v23 = vmul.f32 %v1245_v19, %v4313_v59 }
 0x1f0   : > { %v4562_v4 = vpop.permute.xlu1 %1097  ;;  %v1110_v5 = vpop.permute.xlu0 %1109 }
 0x1f1   : > { %v1115_v26 = vadd.f32 %v1110_v5, %v1073_v35  ;;  %v1102_v10 = vadd.f32 %v4562_v4, %v4543_v60  ;;  %v1684_v60 = vmul.f32 %v1683_v56, %v4593_v1 }
 0x1f2   : > { %1544 = vrot.lane.b32.xlu1 %v1539_v17, %s3703_s17  ;;  %1556 = vrot.lane.b32.xlu0 %v1552_v8, %s3703_s17  ;;  %v1240_v17 = vmul.f32 %v1239_v33, %v4313_v59 }
 0x1f4   : > { %v1112_v51 = vpop.permute.xlu1 %1111  ;;  %v1124_v13 = vpop.permute.xlu0 %1123 }
 0x1f5   : > { %v1116_v54 = vadd.f32 %v1112_v51, %v1074_v55  ;;  %v1129_v34 = vadd.f32 %v1124_v13, %v1087_v21  ;;  %v1725_v21 = vstv %s4666_s22  ;;  %s4756_s22 = sld [smem:[#allocation3 + $0x75]] }
 0x1f6   : > { %1558 = vrot.lane.b32.xlu1 %v1553_v52, %s3703_s17  ;;  %1570 = vrot.lane.b32.xlu0 %v1566_v57, %s3704_s19 }
 0x1f8   : > { %v4576_v9 = vpop.permute.xlu1 %1125  ;;  %v4578_v6 = vpop.permute.xlu0 %1137 }
 0x1f9   : > { %v1130_v51 = vadd.f32 %v4576_v9, %v1088_v36  ;;  %v1143_v13 = vadd.f32 %v4578_v6, %v1101_v49  ;;  %v1241_v9 = vmul.f32 %v1239_v33, %v4328_v63  ;;  %v1727_v33 = vmul.f32 %v1725_v21, %v4604_v27 }
 0x1fa   : > { %1572 = vrot.lane.b32.xlu1 %v1567_v7, %s3704_s19  ;;  %1584 = vrot.lane.b32.xlu0 %v1580_v22, %s3704_s19 }
 0x1fc   : > { %v4587_v25 = vpop.permute.xlu1 %1139  ;;  %v1152_v62 = vpop.permute.xlu0 %1151 }
 0x1fd   : > { %v1157_v41 = vadd.f32 %v1152_v62, %v1115_v26  ;;  %v1144_v4 = vadd.f32 %v4587_v25, %v1102_v10  ;;  %v1685_v25 = vmul.f32 %v1683_v56, %v4604_v27 }
 0x1fe   : > { %1586 = vrot.lane.b32.xlu1 %v1581_v24, %s3704_s19  ;;  %1598 = vrot.lane.b32.xlu0 %v1594_v29, %s3704_s19  ;;  %v1671_v24 = vmul.f32 %v1669_v46, %v4604_v27 }
 0x200   : > { %v1154_v2 = vpop.permute.xlu1 %1153  ;;  %v1166_v0 = vpop.permute.xlu0 %1165 }
 0x201   : > { %v1158_v12 = vadd.f32 %v1154_v2, %v1116_v54  ;;  %v1171_v3 = vadd.f32 %v1166_v0, %v1129_v34  ;;  %v1697_v2 = vstv %s4632_s24  ;;  %v1753_v34 = vstv %s3368_s6  ;;  %s4746_s24 = sld [smem:[#allocation3 + $0x2a]] }
 0x202   : > { %1600 = vrot.lane.b32.xlu1 %v1595_v16, %s3704_s19  ;;  %1632 = vrot.lane.b32.xlu0 %v1628_v14, %s3701_s7  ;;  %v1698_v35 = vmul.f32 %v1697_v2, %v4593_v1  ;;  %v1699_v20 = vmul.f32 %v1697_v2, %v4604_v27  ;;  %s4789_s6 = sld [smem:[#allocation3 + $0x2b]] }
 0x204   : > { %v1168_v38 = vpop.permute.xlu1 %1167  ;;  %v1180_v15 = vpop.permute.xlu0 %1179 }
 0x205   : > { %v1172_v61 = vadd.f32 %v1168_v38, %v1130_v51  ;;  %v1185_v53 = vadd.f32 %v1180_v15, %v1143_v13  ;;  %v1247_v38 = vmul.f32 %v1245_v19, %v4328_v63  ;;  %v4732_v51 = vld [vmem:[#allocation2 + $0x1b] sm:$0xff]  ;;  %v1815_v13 = vstv %s4711_s27  ;;  %s3383_s27 = sld [smem:[#allocation3 + $0x2c]] }
 0x206   : > { %1634 = vrot.lane.b32.xlu1 %v1629_v30, %s3701_s7  ;;  %1646 = vrot.lane.b32.xlu0 %v1642_v40, %s3701_s7  ;;  %v1711_v30 = vstv %s4650_s18  ;;  %s4752_s18 = sld [smem:[#allocation3 + $0xb4]] }
 0x207   : > { %v1712_v55 = vmul.f32 %v1711_v30, %v4593_v1 }
 0x208   : > { %v1182_v32 = vpop.permute.xlu1 %1181  ;;  %v1194_v39 = vpop.permute.xlu0 %1193 }
 0x209   : > { %v1199_v11 = vadd.f32 %v1194_v39, %v1157_v41  ;;  %v1186_v0 = vadd.f32 %v1182_v32, %v1144_v4  ;;  %v1713_v32 = vmul.f32 %v1711_v30, %v4604_v27  ;;  %v1739_v39 = vstv %s3367_s5  ;;  %s4771_s5 = sld [smem:[#allocation3 + $0xc0]] }
 0x20a   : > { %1648 = vrot.lane.b32.xlu1 %v1643_v47, %s3701_s7  ;;  %1660 = vrot.lane.b32.xlu0 %v1656_v58, %s3701_s7  ;;  %v1740_v54 = vmul.f32 %v1739_v39, %v4593_v1  ;;  %v1741_v36 = vmul.f32 %v1739_v39, %v4604_v27 }
 0x20b   : > { %v4642_v48 = vadd.f32 %v1234_v45, %v1199_v11  ;;  %v1726_v45 = vmul.f32 %v1725_v21, %v4593_v1  ;;  %v1857_v21 = vstv %s4746_s24  ;;  %s4869_s24 = sld [smem:[#allocation3 + $0x23]] }
 0x20c   : > { %v1196_v5 = vpop.permute.xlu1 %1195  ;;  %v1208_v8 = vpop.permute.xlu0 %1207 }
 0x20d   : > { %v1200_v52 = vadd.f32 %v1196_v5, %v1158_v12  ;;  %v1213_v57 = vadd.f32 %v1208_v8, %v1171_v3  ;;  %v1755_v3 = vmul.f32 %v1753_v34, %v4604_v27 }
 0x20e   : > { %1662 = vrot.lane.b32.xlu1 %v1657_v50, %s3701_s7  ;;  %1674 = vrot.lane.b32.xlu0 %v1670_v18, %s3702_s28  ;;  %v1767_v50 = vstv %s3369_s8  ;;  %s4805_s8 = sld [smem:[#allocation3 + $0x76]] }
 0x20f   : > { %v4656_v7 = vadd.f32 %v1235_v37, %v1200_v52  ;;  %v4658_v22 = vadd.f32 %v1240_v17, %v1213_v57  ;;  %v1754_v37 = vmul.f32 %v1753_v34, %v4593_v1  ;;  %v1768_v5 = vmul.f32 %v1767_v50, %v4593_v1 }
 0x210   : > { %v1210_v6 = vpop.permute.xlu1 %1209  ;;  %v1222_v62 = vpop.permute.xlu0 %1221  ;;  %v1781_v17 = vstv %s4705_s16  ;;  %v1769_v19 = vmul.f32 %v1767_v50, %v4604_v27  ;;  %v1871_v34 = vstv %s4756_s22  ;;  %s3382_s16 = sld [smem:[#allocation3 + $0xc1]] }
 0x211   : > { %v1214_v29 = vadd.f32 %v1210_v6, %v1172_v61  ;;  %v1227_v31 = vadd.f32 %v1222_v62, %v1185_v53  ;;  %v1782_v56 = vmul.f32 %v1781_v17, %v4593_v1  ;;  %v1783_v10 = vmul.f32 %v1781_v17, %v4604_v27  ;;  %v4743_v53 = vld [vmem:[#allocation2 + $0x23] sm:$0xff]  ;;  %s4878_s22 = sld [smem:[#allocation3 + $0x6e]] }
 0x212   : > { %1676 = vrot.lane.b32.xlu1 %v1671_v24, %s3702_s28  ;;  %1688 = vrot.lane.b32.xlu0 %v1684_v60, %s3702_s28  ;;  %v1816_v61 = vmul.f32 %v1815_v13, %v4732_v51  ;;  %v1817_v24 = vmul.f32 %v1815_v13, %v4743_v53 }
 0x213   : > { %v4670_v16 = vadd.f32 %v1241_v9, %v1214_v29  ;;  %v4672_v59 = vadd.f32 %v1246_v23, %v1227_v31  ;;  %v1829_v9 = vstv %s4722_s29  ;;  %v1421_v29 = vstv %s4730_s26  ;;  %s3384_s29 = sld [smem:[#allocation3 + $0x77]] }
 0x214   : > { %v1224_v14 = vpop.permute.xlu1 %1223  ;;  %v4674_v28 = vpop.permute.xlu0 %1256  ;;  %v1830_v60 = vmul.f32 %v1829_v9, %v4732_v51  ;;  %v1843_v31 = vstv %s4735_s30  ;;  %s4844_s26 = sld [smem:[#allocation3 + $0xc2]] }
 0x215   : > { %v1228_v15 = vadd.f32 %v1224_v14, %v1186_v0  ;;  %v1262_v6 = vadd.f32 %v4674_v28, %v4642_v48  ;;  %v1422_v28 = vmul.f32 %v1421_v29, %v4454_v44  ;;  %s4850_s30 = sld [smem:[#allocation3 + $0x2e]] }
 0x216   : > { %1690 = vrot.lane.b32.xlu1 %v1685_v25, %s3702_s28  ;;  %1702 = vrot.lane.b32.xlu0 %v1698_v35, %s3702_s28  ;;  %v1831_v35 = vmul.f32 %v1829_v9, %v4743_v53 }
 0x217   : > { %v4682_v40 = vadd.f32 %v1247_v38, %v1228_v15  ;;  %v1844_v38 = vmul.f32 %v1843_v31, %v4732_v51  ;;  %v1427_v15 = vstv %s4741_s4  ;;  %s4861_s4 = sld [smem:[#allocation3 + $0x79]] }
 0x218   : > { %v4684_v26 = vpop.permute.xlu1 %1258  ;;  %v4686_v43 = vpop.permute.xlu0 %1270 }
 0x219   : > { %v1263_v48 = vadd.f32 %v4684_v26, %v4656_v7  ;;  %v1276_v2 = vadd.f32 %v4686_v43, %v4658_v22  ;;  %v1423_v22 = vmul.f32 %v1421_v29, %v4465_v42  ;;  %v1845_v26 = vmul.f32 %v1843_v31, %v4743_v53 }
 0x21a   : > { %1704 = vrot.lane.b32.xlu1 %v1699_v20, %s3702_s28  ;;  %1716 = vrot.lane.b32.xlu0 %v1712_v55, %s3703_s17 }
 0x21c   : > { %v4693_v63 = vpop.permute.xlu1 %1272  ;;  %v4695_v41 = vpop.permute.xlu0 %1284 }
 0x21d   : > { %v1277_v7 = vadd.f32 %v4693_v63, %v4670_v16  ;;  %v1290_v43 = vadd.f32 %v4695_v41, %v4672_v59  ;;  %v1858_v16 = vmul.f32 %v1857_v21, %v4732_v51  ;;  %v1433_v63 = vstv %s4752_s18  ;;  %s4874_s18 = sld [smem:[#allocation3 + $0xc4]] }
 0x21e   : > { %1718 = vrot.lane.b32.xlu1 %v1713_v32, %s3703_s17  ;;  %1730 = vrot.lane.b32.xlu0 %v1726_v45, %s3703_s17  ;;  %v1434_v17 = vmul.f32 %v1433_v63, %v4454_v44 }
 0x220   : > { %v4701_v47 = vpop.permute.xlu1 %1286  ;;  %v1299_v58 = vpop.permute.xlu0 %1298 }
 0x221   : > { %v1304_v4 = vadd.f32 %v1299_v58, %v1262_v6  ;;  %v1291_v59 = vadd.f32 %v4701_v47, %v4682_v40  ;;  %v1872_v40 = vmul.f32 %v1871_v34, %v4732_v51 }
 0x222   : > { %1732 = vrot.lane.b32.xlu1 %v1727_v33, %s3703_s17  ;;  %1744 = vrot.lane.b32.xlu0 %v1740_v54, %s3703_s17  ;;  %v1428_v33 = vmul.f32 %v1427_v15, %v4454_v44 }
 0x224   : > { %v1301_v11 = vpop.permute.xlu1 %1300  ;;  %v1313_v46 = vpop.permute.xlu0 %1312 }
 0x225   : > { %v1305_v30 = vadd.f32 %v1301_v11, %v1263_v48  ;;  %v1318_v20 = vadd.f32 %v1313_v46, %v1276_v2  ;;  %v1913_v2 = vstv %s4805_s8  ;;  %s4895_s8 = sld [smem:[#allocation3 + $0x7a]] }
 0x226   : > { %1746 = vrot.lane.b32.xlu1 %v1741_v36, %s3703_s17  ;;  %1758 = vrot.lane.b32.xlu0 %v1754_v37, %s3704_s19 }
 0x228   : > { %v4715_v49 = vpop.permute.xlu1 %1314  ;;  %v4717_v12 = vpop.permute.xlu0 %1326 }
 0x229   : > { %v1319_v11 = vadd.f32 %v4715_v49, %v1277_v7  ;;  %v1332_v46 = vadd.f32 %v4717_v12, %v1290_v43  ;;  %v1429_v49 = vmul.f32 %v1427_v15, %v4465_v42  ;;  %v1915_v15 = vmul.f32 %v1913_v2, %v4743_v53 }
 0x22a   : > { %1760 = vrot.lane.b32.xlu1 %v1755_v3, %s3704_s19  ;;  %1772 = vrot.lane.b32.xlu0 %v1768_v5, %s3704_s19 }
 0x22c   : > { %v4726_v8 = vpop.permute.xlu1 %1328  ;;  %v1341_v18 = vpop.permute.xlu0 %1340 }
 0x22d   : > { %v1346_v0 = vadd.f32 %v1341_v18, %v1304_v4  ;;  %v1333_v47 = vadd.f32 %v4726_v8, %v1291_v59  ;;  %v1873_v8 = vmul.f32 %v1871_v34, %v4743_v53 }
 0x22e   : > { %1774 = vrot.lane.b32.xlu1 %v1769_v19, %s3704_s19  ;;  %1786 = vrot.lane.b32.xlu0 %v1782_v56, %s3704_s19  ;;  %v1859_v19 = vmul.f32 %v1857_v21, %v4743_v53 }
 0x230   : > { %v1343_v52 = vpop.permute.xlu1 %1342  ;;  %v1355_v57 = vpop.permute.xlu0 %1354 }
 0x231   : > { %v1347_v32 = vadd.f32 %v1343_v52, %v1305_v30  ;;  %v1360_v45 = vadd.f32 %v1355_v57, %v1318_v20  ;;  %v1885_v52 = vstv %s4771_s5  ;;  %v1941_v20 = vstv %s3383_s27  ;;  %s4885_s5 = sld [smem:[#allocation3 + $0x2f]] }
 0x232   : > { %1788 = vrot.lane.b32.xlu1 %v1783_v10, %s3704_s19  ;;  %1820 = vrot.lane.b32.xlu0 %v1816_v61, %s3701_s7  ;;  %v1886_v6 = vmul.f32 %v1885_v52, %v4732_v51  ;;  %v1887_v31 = vmul.f32 %v1885_v52, %v4743_v53  ;;  %s4928_s27 = sld [smem:[#allocation3 + $0x30]] }
 0x234   : > { %v1357_v23 = vpop.permute.xlu1 %1356  ;;  %v1369_v62 = vpop.permute.xlu0 %1368 }
 0x235   : > { %v1361_v41 = vadd.f32 %v1357_v23, %v1319_v11  ;;  %v1374_v50 = vadd.f32 %v1369_v62, %v1332_v46  ;;  %v1435_v23 = vmul.f32 %v1433_v63, %v4465_v42  ;;  %v4871_v11 = vld [vmem:[#allocation2 + $0x1c] sm:$0xff]  ;;  %v2003_v46 = vstv %s4850_s30  ;;  %s3398_s30 = sld [smem:[#allocation3 + $0x31]] }
 0x236   : > { %1822 = vrot.lane.b32.xlu1 %v1817_v24, %s3701_s7  ;;  %1834 = vrot.lane.b32.xlu0 %v1830_v60, %s3701_s7  ;;  %v1899_v24 = vstv %s4789_s6  ;;  %s4891_s6 = sld [smem:[#allocation3 + $0xb9]] }
 0x237   : > { %v1900_v48 = vmul.f32 %v1899_v24, %v4732_v51 }
 0x238   : > { %v1371_v14 = vpop.permute.xlu1 %1370  ;;  %v1383_v25 = vpop.permute.xlu0 %1382 }
 0x239   : > { %v1388_v55 = vadd.f32 %v1383_v25, %v1346_v0  ;;  %v1375_v57 = vadd.f32 %v1371_v14, %v1333_v47  ;;  %v1901_v14 = vmul.f32 %v1899_v24, %v4743_v53  ;;  %v1927_v25 = vstv %s3382_s16  ;;  %s4910_s16 = sld [smem:[#allocation3 + $0xc5]] }
 0x23a   : > { %1836 = vrot.lane.b32.xlu1 %v1831_v35, %s3701_s7  ;;  %1848 = vrot.lane.b32.xlu0 %v1844_v38, %s3701_s7  ;;  %v1928_v30 = vmul.f32 %v1927_v25, %v4732_v51  ;;  %v1929_v7 = vmul.f32 %v1927_v25, %v4743_v53 }
 0x23b   : > { %v4781_v39 = vadd.f32 %v1422_v28, %v1388_v55  ;;  %v1914_v28 = vmul.f32 %v1913_v2, %v4732_v51  ;;  %v2045_v2 = vstv %s4885_s5  ;;  %s5008_s5 = sld [smem:[#allocation3 + $0xc9]] }
 0x23c   : > { %v1385_v58 = vpop.permute.xlu1 %1384  ;;  %v1397_v54 = vpop.permute.xlu0 %1396 }
 0x23d   : > { %v1389_v36 = vadd.f32 %v1385_v58, %v1347_v32  ;;  %v1402_v37 = vadd.f32 %v1397_v54, %v1360_v45  ;;  %v1943_v45 = vmul.f32 %v1941_v20, %v4743_v53 }
 0x23e   : > { %1850 = vrot.lane.b32.xlu1 %v1845_v26, %s3701_s7  ;;  %1862 = vrot.lane.b32.xlu0 %v1858_v16, %s3702_s28  ;;  %v1955_v26 = vstv %s3384_s29  ;;  %s4944_s29 = sld [smem:[#allocation3 + $0x7b]] }
 0x23f   : > { %v4795_v3 = vadd.f32 %v1423_v22, %v1389_v36  ;;  %v4797_v5 = vadd.f32 %v1428_v33, %v1402_v37  ;;  %v1942_v22 = vmul.f32 %v1941_v20, %v4732_v51  ;;  %v1956_v58 = vmul.f32 %v1955_v26, %v4732_v51 }
 0x240   : > { %v1399_v12 = vpop.permute.xlu1 %1398  ;;  %v1411_v18 = vpop.permute.xlu0 %1410  ;;  %v1969_v33 = vstv %s4844_s26  ;;  %v1957_v63 = vmul.f32 %v1955_v26, %v4743_v53  ;;  %v2059_v20 = vstv %s4895_s8  ;;  %s3397_s26 = sld [smem:[#allocation3 + $0xc6]] }
 0x241   : > { %v1403_v56 = vadd.f32 %v1399_v12, %v1361_v41  ;;  %v1416_v13 = vadd.f32 %v1411_v18, %v1374_v50  ;;  %v1970_v34 = vmul.f32 %v1969_v33, %v4732_v51  ;;  %v1971_v59 = vmul.f32 %v1969_v33, %v4743_v53  ;;  %v4882_v50 = vld [vmem:[#allocation2 + $0x24] sm:$0xff]  ;;  %s5019_s8 = sld [smem:[#allocation3 + $0x34]] }
 0x242   : > { %1864 = vrot.lane.b32.xlu1 %v1859_v19, %s3702_s28  ;;  %1876 = vrot.lane.b32.xlu0 %v1872_v40, %s3702_s28  ;;  %v2004_v41 = vmul.f32 %v2003_v46, %v4871_v11  ;;  %v2005_v19 = vmul.f32 %v2003_v46, %v4882_v50 }
 0x243   : > { %v4809_v10 = vadd.f32 %v1429_v49, %v1403_v56  ;;  %v4811_v44 = vadd.f32 %v1434_v17, %v1416_v13  ;;  %v2017_v49 = vstv %s4861_s4  ;;  %v1609_v56 = vstv %s4869_s24  ;;  %s3399_s4 = sld [smem:[#allocation3 + $0x7c]] }
 0x244   : > { %v1413_v61 = vpop.permute.xlu1 %1412  ;;  %v4813_v9 = vpop.permute.xlu0 %1444  ;;  %v2018_v40 = vmul.f32 %v2017_v49, %v4871_v11  ;;  %v2031_v13 = vstv %s4874_s18  ;;  %s4983_s24 = sld [smem:[#allocation3 + $0xc7]] }
 0x245   : > { %v1417_v62 = vadd.f32 %v1413_v61, %v1375_v57  ;;  %v1450_v12 = vadd.f32 %v4813_v9, %v4781_v39  ;;  %v1615_v61 = vstv %s4878_s22  ;;  %s4989_s18 = sld [smem:[#allocation3 + $0x33]] }
 0x246   : > { %1878 = vrot.lane.b32.xlu1 %v1873_v8, %s3702_s28  ;;  %1890 = vrot.lane.b32.xlu0 %v1886_v6, %s3702_s28  ;;  %v1610_v8 = vmul.f32 %v1609_v56, %v4593_v1  ;;  %s5000_s22 = sld [smem:[#allocation3 + $0x7e]] }
 0x247   : > { %v4821_v60 = vadd.f32 %v1435_v23, %v1417_v62  ;;  %v2019_v23 = vmul.f32 %v2017_v49, %v4882_v50  ;;  %v2032_v62 = vmul.f32 %v2031_v13, %v4871_v11 }
 0x248   : > { %v4823_v4 = vpop.permute.xlu1 %1446  ;;  %v4825_v29 = vpop.permute.xlu0 %1458 }
 0x249   : > { %v1451_v39 = vadd.f32 %v4823_v4, %v4795_v3  ;;  %v1464_v52 = vadd.f32 %v4825_v29, %v4797_v5  ;;  %v1611_v5 = vmul.f32 %v1609_v56, %v4604_v27  ;;  %v1616_v4 = vmul.f32 %v1615_v61, %v4593_v1 }
 0x24a   : > { %1892 = vrot.lane.b32.xlu1 %v1887_v31, %s3702_s28  ;;  %1904 = vrot.lane.b32.xlu0 %v1900_v48, %s3703_s17 }
 0x24c   : > { %v4832_v42 = vpop.permute.xlu1 %1460  ;;  %v4834_v0 = vpop.permute.xlu0 %1472 }
 0x24d   : > { %v1465_v3 = vadd.f32 %v4832_v42, %v4809_v10  ;;  %v1478_v29 = vadd.f32 %v4834_v0, %v4811_v44  ;;  %v2046_v10 = vmul.f32 %v2045_v2, %v4871_v11  ;;  %v1621_v42 = vstv %s4891_s6  ;;  %s5013_s6 = sld [smem:[#allocation3 + $0x28]] }
 0x24e   : > { %1906 = vrot.lane.b32.xlu1 %v1901_v14, %s3703_s17  ;;  %1918 = vrot.lane.b32.xlu0 %v1914_v28, %s3703_s17  ;;  %v1622_v33 = vmul.f32 %v1621_v42, %v4593_v1 }
 0x250   : > { %v4840_v35 = vpop.permute.xlu1 %1474  ;;  %v1487_v38 = vpop.permute.xlu0 %1486 }
 0x251   : > { %v1492_v47 = vadd.f32 %v1487_v38, %v1450_v12  ;;  %v1479_v44 = vadd.f32 %v4840_v35, %v4821_v60  ;;  %v2060_v60 = vmul.f32 %v2059_v20, %v4871_v11 }
 0x252   : > { %1920 = vrot.lane.b32.xlu1 %v1915_v15, %s3703_s17  ;;  %1932 = vrot.lane.b32.xlu0 %v1928_v30, %s3703_s17  ;;  %v2033_v30 = vmul.f32 %v2031_v13, %v4882_v50 }
 0x254   : > { %v1489_v55 = vpop.permute.xlu1 %1488  ;;  %v1501_v21 = vpop.permute.xlu0 %1500 }
 0x255   : > { %v1493_v24 = vadd.f32 %v1489_v55, %v1451_v39  ;;  %v1506_v31 = vadd.f32 %v1501_v21, %v1464_v52  ;;  %v2101_v52 = vstv %s4944_s29  ;;  %s5038_s29 = sld [smem:[#allocation3 + $0xbe]] }
 0x256   : > { %1934 = vrot.lane.b32.xlu1 %v1929_v7, %s3703_s17  ;;  %1946 = vrot.lane.b32.xlu0 %v1942_v22, %s3704_s19 }
 0x258   : > { %v4854_v43 = vpop.permute.xlu1 %1502  ;;  %v4856_v32 = vpop.permute.xlu0 %1514 }
 0x259   : > { %v1507_v55 = vadd.f32 %v4854_v43, %v1465_v3  ;;  %v1520_v21 = vadd.f32 %v4856_v32, %v1478_v29  ;;  %v1617_v43 = vmul.f32 %v1615_v61, %v4604_v27 }
 0x25a   : > { %1948 = vrot.lane.b32.xlu1 %v1943_v45, %s3704_s19  ;;  %1960 = vrot.lane.b32.xlu0 %v1956_v58, %s3704_s19 }
 0x25c   : > { %v4865_v54 = vpop.permute.xlu1 %1516  ;;  %v1529_v16 = vpop.permute.xlu0 %1528 }
 0x25d   : > { %v1534_v57 = vadd.f32 %v1529_v16, %v1492_v47  ;;  %v1521_v35 = vadd.f32 %v4865_v54, %v1479_v44  ;;  %v2061_v54 = vmul.f32 %v2059_v20, %v4882_v50 }
 0x25e   : > { %1962 = vrot.lane.b32.xlu1 %v1957_v63, %s3704_s19  ;;  %1974 = vrot.lane.b32.xlu0 %v1970_v34, %s3704_s19  ;;  %v2047_v63 = vmul.f32 %v2045_v2, %v4882_v50 }
 0x260   : > { %v1531_v36 = vpop.permute.xlu1 %1530  ;;  %v1543_v37 = vpop.permute.xlu0 %1542 }
 0x261   : > { %v1535_v14 = vadd.f32 %v1531_v36, %v1493_v24  ;;  %v1548_v28 = vadd.f32 %v1543_v37, %v1506_v31  ;;  %v2073_v36 = vstv %s4910_s16  ;;  %v2129_v31 = vstv %s3398_s30  ;;  %s5024_s16 = sld [smem:[#allocation3 + $0x73]] }
 0x262   : > { %1976 = vrot.lane.b32.xlu1 %v1971_v59, %s3704_s19  ;;  %2008 = vrot.lane.b32.xlu0 %v2004_v41, %s3701_s7  ;;  %v2074_v12 = vmul.f32 %v2073_v36, %v4871_v11  ;;  %v2075_v13 = vmul.f32 %v2073_v36, %v4882_v50  ;;  %s5066_s30 = sld [smem:[#allocation3 + $0x35]] }
 0x264   : > { %v1545_v17 = vpop.permute.xlu1 %1544  ;;  %v1557_v18 = vpop.permute.xlu0 %1556 }
 0x265   : > { %v1549_v0 = vadd.f32 %v1545_v17, %v1507_v55  ;;  %v1562_v26 = vadd.f32 %v1557_v18, %v1520_v21  ;;  %v1623_v17 = vmul.f32 %v1621_v42, %v4604_v27  ;;  %v5010_v55 = vld [vmem:[#allocation2 + $0x30] sm:$0xff]  ;;  %v2192_v21 = vstv %s4989_s18  ;;  %s3413_s18 = sld [smem:[#allocation3 + $0x36]] }
 0x266   : > { %2010 = vrot.lane.b32.xlu1 %v2005_v19, %s3701_s7  ;;  %2022 = vrot.lane.b32.xlu0 %v2018_v40, %s3701_s7  ;;  %v2087_v19 = vstv %s4928_s27  ;;  %s5032_s27 = sld [smem:[#allocation3 + $0x7f]] }
 0x267   : > { %v2088_v39 = vmul.f32 %v2087_v19, %v4871_v11  ;;  %v2089_v61 = vmul.f32 %v2087_v19, %v4882_v50 }
 0x268   : > { %v1559_v9 = vpop.permute.xlu1 %1558  ;;  %v1571_v6 = vpop.permute.xlu0 %1570 }
 0x269   : > { %v1576_v48 = vadd.f32 %v1571_v6, %v1534_v57  ;;  %v1563_v37 = vadd.f32 %v1559_v9, %v1521_v35  ;;  %v2102_v9 = vmul.f32 %v2101_v52, %v4871_v11 }
 0x26a   : > { %2024 = vrot.lane.b32.xlu1 %v2019_v23, %s3701_s7  ;;  %2036 = vrot.lane.b32.xlu0 %v2032_v62, %s3701_s7  ;;  %v2103_v62 = vmul.f32 %v2101_v52, %v4882_v50 }
 0x26b   : > { %v4920_v25 = vadd.f32 %v1610_v8, %v1576_v48  ;;  %v2115_v8 = vstv %s3397_s26  ;;  %s5048_s26 = sld [smem:[#allocation3 + $0xca]] }
 0x26c   : > { %v1573_v38 = vpop.permute.xlu1 %1572  ;;  %v1585_v15 = vpop.permute.xlu0 %1584  ;;  %v2116_v24 = vmul.f32 %v2115_v8, %v4871_v11  ;;  %v2117_v3 = vmul.f32 %v2115_v8, %v4882_v50 }
 0x26d   : > { %v1577_v7 = vadd.f32 %v1573_v38, %v1535_v14  ;;  %v1590_v22 = vadd.f32 %v1585_v15, %v1548_v28  ;;  %v2131_v28 = vmul.f32 %v2129_v31, %v4882_v50  ;;  %v2157_v15 = vstv %s4983_s24  ;;  %s3412_s24 = sld [smem:[#allocation3 + $0xcb]] }
 0x26e   : > { %2038 = vrot.lane.b32.xlu1 %v2033_v30, %s3701_s7  ;;  %2050 = vrot.lane.b32.xlu0 %v2046_v10, %s3702_s28  ;;  %v2158_v20 = vmul.f32 %v2157_v15, %v4871_v11  ;;  %v2159_v44 = vmul.f32 %v2157_v15, %v4882_v50 }
 0x26f   : > { %v4934_v45 = vadd.f32 %v1611_v5, %v1577_v7  ;;  %v4936_v58 = vadd.f32 %v1616_v4, %v1590_v22  ;;  %v2130_v5 = vmul.f32 %v2129_v31, %v4871_v11  ;;  %v2143_v4 = vstv %s3399_s4  ;;  %s5083_s4 = sld [smem:[#allocation3 + $0x80]] }
 0x270   : > { %v1587_v32 = vpop.permute.xlu1 %1586  ;;  %v1599_v16 = vpop.permute.xlu0 %1598  ;;  %v2144_v38 = vmul.f32 %v2143_v4, %v4871_v11  ;;  %v2145_v42 = vmul.f32 %v2143_v4, %v4882_v50 }
 0x271   : > { %v1591_v34 = vadd.f32 %v1587_v32, %v1549_v0  ;;  %v1604_v46 = vadd.f32 %v1599_v16, %v1562_v26  ;;  %v2193_v0 = vmul.f32 %v2192_v21, %v5010_v55  ;;  %v5021_v26 = vld [vmem:[#allocation2 + $0x38] sm:$0xff] }
 0x272   : > { %2052 = vrot.lane.b32.xlu1 %v2047_v63, %s3702_s28  ;;  %2064 = vrot.lane.b32.xlu0 %v2060_v60, %s3702_s28  ;;  %v2194_v63 = vmul.f32 %v2192_v21, %v5021_v26 }
 0x273   : > { %v4948_v59 = vadd.f32 %v1617_v43, %v1591_v34  ;;  %v4950_v1 = vadd.f32 %v1622_v33, %v1604_v46  ;;  %v2206_v43 = vstv %s5000_s22  ;;  %v2220_v34 = vstv %s5008_s5  ;;  %s3414_s22 = sld [smem:[#allocation3 + $0x81]] }
 0x274   : > { %v1601_v41 = vpop.permute.xlu1 %1600  ;;  %v4952_v49 = vpop.permute.xlu0 %1632  ;;  %v2207_v60 = vmul.f32 %v2206_v43, %v5010_v55  ;;  %v1797_v46 = vstv %s5013_s6  ;;  %s5122_s5 = sld [smem:[#allocation3 + $0xcc]] }
 0x275   : > { %v1605_v18 = vadd.f32 %v1601_v41, %v1563_v37  ;;  %v1638_v32 = vadd.f32 %v4952_v49, %v4920_v25  ;;  %s5128_s6 = sld [smem:[#allocation3 + $0x38]] }
 0x276   : > { %2066 = vrot.lane.b32.xlu1 %v2061_v54, %s3702_s28  ;;  %2078 = vrot.lane.b32.xlu0 %v2074_v12, %s3702_s28  ;;  %v2208_v54 = vmul.f32 %v2206_v43, %v5021_v26  ;;  %v2221_v12 = vmul.f32 %v2220_v34, %v5010_v55 }
 0x277   : > { %v4960_v40 = vadd.f32 %v1623_v17, %v1605_v18  ;;  %v2234_v17 = vstv %s5019_s8  ;;  %v1798_v18 = vmul.f32 %v1797_v46, %v4732_v51  ;;  %s5139_s8 = sld [smem:[#allocation3 + $0x83]] }
 0x278   : > { %v4962_v47 = vpop.permute.xlu1 %1634  ;;  %v4964_v56 = vpop.permute.xlu0 %1646  ;;  %v2236_v15 = vmul.f32 %v2234_v17, %v5021_v26 }
 0x279   : > { %v1639_v25 = vadd.f32 %v4962_v47, %v4934_v45  ;;  %v1652_v36 = vadd.f32 %v4964_v56, %v4936_v58  ;;  %v1803_v45 = vstv %s5024_s16  ;;  %v2222_v47 = vmul.f32 %v2220_v34, %v5021_v26  ;;  %s5147_s16 = sld [smem:[#allocation3 + $0xce]] }
 0x27a   : > { %2080 = vrot.lane.b32.xlu1 %v2075_v13, %s3702_s28  ;;  %2092 = vrot.lane.b32.xlu0 %v2088_v39, %s3703_s17 }
 0x27c   : > { %v4971_v27 = vpop.permute.xlu1 %1648  ;;  %v4973_v57 = vpop.permute.xlu0 %1660 }
 0x27d   : > { %v1653_v58 = vadd.f32 %v4971_v27, %v4948_v59  ;;  %v1666_v56 = vadd.f32 %v4973_v57, %v4950_v1  ;;  %v1799_v59 = vmul.f32 %v1797_v46, %v4743_v53  ;;  %v1804_v27 = vmul.f32 %v1803_v45, %v4732_v51 }
 0x27e   : > { %2094 = vrot.lane.b32.xlu1 %v2089_v61, %s3703_s17  ;;  %2106 = vrot.lane.b32.xlu0 %v2102_v9, %s3703_s17 }
 0x280   : > { %v4979_v6 = vpop.permute.xlu1 %1662  ;;  %v1675_v23 = vpop.permute.xlu0 %1674 }
 0x281   : > { %v1680_v35 = vadd.f32 %v1675_v23, %v1638_v32 }
 0x282   : > { %2108 = vrot.lane.b32.xlu1 %v2103_v62, %s3703_s17  ;;  %2120 = vrot.lane.b32.xlu0 %v2116_v24, %s3703_s17  ;;  %v2235_v62 = vmul.f32 %v2234_v17, %v5010_v55  ;;  %v2248_v24 = vstv %s5032_s27  ;;  %s5152_s27 = sld [smem:[#allocation3 + $0x2d]] }
 0x284   : > { %v1677_v48 = vpop.permute.xlu1 %1676  ;;  %v1689_v2 = vpop.permute.xlu0 %1688 }
 0x285   : > { %v1681_v19 = vadd.f32 %v1677_v48, %v1639_v25  ;;  %v1694_v13 = vadd.f32 %v1689_v2, %v1652_v36  ;;  %v1667_v2 = vadd.f32 %v4979_v6, %v4960_v40  ;;  %v1805_v40 = vmul.f32 %v1803_v45, %v4743_v53 }
 0x286   : > { %2122 = vrot.lane.b32.xlu1 %v2117_v3, %s3703_s17  ;;  %2134 = vrot.lane.b32.xlu0 %v2130_v5, %s3704_s19  ;;  %v1809_v3 = vstv %s5038_s29  ;;  %v2290_v36 = vstv %s5083_s4  ;;  %s5158_s29 = sld [smem:[#allocation3 + $0x39]] }
 0x287   : > { %s5177_s4 = sld [smem:[#allocation3 + $0xc3]] }
 0x288   : > { %v4993_v29 = vpop.permute.xlu1 %1690  ;;  %v4995_v14 = vpop.permute.xlu0 %1702 }
 0x289   : > { %v1695_v31 = vadd.f32 %v4993_v29, %v1653_v58  ;;  %v1708_v48 = vadd.f32 %v4995_v14, %v1666_v56  ;;  %v2332_v56 = vstv %s3414_s22  ;;  %s5222_s22 = sld [smem:[#allocation3 + $0x85]] }
 0x28a   : > { %2136 = vrot.lane.b32.xlu1 %v2131_v28, %s3704_s19  ;;  %2148 = vrot.lane.b32.xlu0 %v2144_v38, %s3704_s19 }
 0x28c   : > { %v5004_v30 = vpop.permute.xlu1 %1704  ;;  %v1717_v10 = vpop.permute.xlu0 %1716 }
 0x28d   : > { %v1722_v37 = vadd.f32 %v1717_v10, %v1680_v35  ;;  %v2249_v10 = vmul.f32 %v2248_v24, %v5010_v55  ;;  %v1709_v6 = vadd.f32 %v5004_v30, %v1667_v2  ;;  %v2250_v30 = vmul.f32 %v2248_v24, %v5021_v26 }
 0x28e   : > { %2150 = vrot.lane.b32.xlu1 %v2145_v42, %s3704_s19  ;;  %2162 = vrot.lane.b32.xlu0 %v2158_v20, %s3704_s19  ;;  %v2262_v42 = vstv %s5048_s26  ;;  %s5163_s26 = sld [smem:[#allocation3 + $0x78]] }
 0x28f   : > { %v2264_v46 = vmul.f32 %v2262_v42, %v5021_v26 }
 0x290   : > { %v1719_v7 = vpop.permute.xlu1 %1718  ;;  %v1731_v22 = vpop.permute.xlu0 %1730 }
 0x291   : > { %v1723_v52 = vadd.f32 %v1719_v7, %v1681_v19  ;;  %v1736_v61 = vadd.f32 %v1731_v22, %v1694_v13  ;;  %v1810_v7 = vmul.f32 %v1809_v3, %v4732_v51  ;;  %v2318_v13 = vstv %s3413_s18  ;;  %s5205_s18 = sld [smem:[#allocation3 + $0x3a]] }
 0x292   : > { %2164 = vrot.lane.b32.xlu1 %v2159_v44, %s3704_s19  ;;  %2197 = vrot.lane.b32.xlu0 %v2193_v0, %s3701_s7 }
 0x294   : > { %v1733_v33 = vpop.permute.xlu1 %1732  ;;  %v1745_v16 = vpop.permute.xlu0 %1744 }
 0x295   : > { %v1737_v5 = vadd.f32 %v1733_v33, %v1695_v31  ;;  %v1750_v4 = vadd.f32 %v1745_v16, %v1708_v48  ;;  %v2263_v33 = vmul.f32 %v2262_v42, %v5010_v55  ;;  %v2276_v16 = vstv %s5066_s30  ;;  %v5149_v48 = vld [vmem:[#allocation2 + $0x31] sm:$0xff]  ;;  %s5171_s30 = sld [smem:[#allocation3 + $0x84]] }
 0x296   : > { %2199 = vrot.lane.b32.xlu1 %v2194_v63, %s3701_s7  ;;  %2211 = vrot.lane.b32.xlu0 %v2207_v60, %s3701_s7  ;;  %v1811_v63 = vmul.f32 %v1809_v3, %v4743_v53  ;;  %v2277_v25 = vmul.f32 %v2276_v16, %v5010_v55 }
 0x298   : > { %v1747_v41 = vpop.permute.xlu1 %1746  ;;  %v1759_v49 = vpop.permute.xlu0 %1758 }
 0x299   : > { %v1764_v39 = vadd.f32 %v1759_v49, %v1722_v37  ;;  %v1751_v22 = vadd.f32 %v1747_v41, %v1709_v6  ;;  %v2278_v41 = vmul.f32 %v2276_v16, %v5021_v26  ;;  %v2291_v49 = vmul.f32 %v2290_v36, %v5010_v55 }
 0x29a   : > { %2213 = vrot.lane.b32.xlu1 %v2208_v54, %s3701_s7  ;;  %2225 = vrot.lane.b32.xlu0 %v2221_v12, %s3701_s7  ;;  %v2304_v54 = vstv %s3412_s24  ;;  %s5187_s24 = sld [smem:[#allocation3 + $0xcf]] }
 0x29b   : > { %v5058_v9 = vadd.f32 %v1798_v18, %v1764_v39  ;;  %v2292_v18 = vmul.f32 %v2290_v36, %v5021_v26  ;;  %v2305_v19 = vmul.f32 %v2304_v54, %v5010_v55  ;;  %v2306_v58 = vmul.f32 %v2304_v54, %v5021_v26 }
 0x29c   : > { %v1761_v8 = vpop.permute.xlu1 %1760  ;;  %v1773_v23 = vpop.permute.xlu0 %1772 }
 0x29d   : > { %v1765_v1 = vadd.f32 %v1761_v8, %v1723_v52  ;;  %v1778_v57 = vadd.f32 %v1773_v23, %v1736_v61  ;;  %v2320_v8 = vmul.f32 %v2318_v13, %v5021_v26  ;;  %v2333_v23 = vmul.f32 %v2332_v56, %v5010_v55 }
 0x29e   : > { %2227 = vrot.lane.b32.xlu1 %v2222_v47, %s3701_s7  ;;  %2239 = vrot.lane.b32.xlu0 %v2235_v62, %s3702_s28  ;;  %v2319_v47 = vmul.f32 %v2318_v13, %v5010_v55  ;;  %v2346_v62 = vstv %s5122_s5  ;;  %s3427_s5 = sld [smem:[#allocation3 + $0xd0]] }
 0x29f   : > { %v5073_v28 = vadd.f32 %v1799_v59, %v1765_v1  ;;  %v5075_v29 = vadd.f32 %v1804_v27, %v1778_v57  ;;  %v2334_v27 = vmul.f32 %v2332_v56, %v5021_v26  ;;  %v2347_v31 = vmul.f32 %v2346_v62, %v5010_v55 }
 0x2a0   : > { %v1775_v14 = vpop.permute.xlu1 %1774  ;;  %v1787_v38 = vpop.permute.xlu0 %1786  ;;  %v2380_v1 = vstv %s5128_s6  ;;  %v2348_v3 = vmul.f32 %v2346_v62, %v5021_v26  ;;  %s3428_s6 = sld [smem:[#allocation3 + $0x3b]] }
 0x2a1   : > { %v1779_v20 = vadd.f32 %v1775_v14, %v1737_v5  ;;  %v1792_v21 = vadd.f32 %v1787_v38, %v1750_v4  ;;  %v2381_v5 = vmul.f32 %v2380_v1, %v5149_v48  ;;  %v5160_v4 = vld [vmem:[#allocation2 + $0x39] sm:$0xff]  ;;  %v2394_v14 = vstv %s5139_s8  ;;  %s3429_s8 = sld [smem:[#allocation3 + $0x86]] }
 0x2a2   : > { %2241 = vrot.lane.b32.xlu1 %v2236_v15, %s3702_s28  ;;  %2253 = vrot.lane.b32.xlu0 %v2249_v10, %s3702_s28  ;;  %v2382_v42 = vmul.f32 %v2380_v1, %v5160_v4 }
 0x2a3   : > { %v5087_v44 = vadd.f32 %v1805_v40, %v1779_v20  ;;  %v5089_v0 = vadd.f32 %v1810_v7, %v1792_v21  ;;  %v2395_v40 = vmul.f32 %v2394_v14, %v5149_v48  ;;  %v2408_v20 = vstv %s5147_s16  ;;  %s5261_s16 = sld [smem:[#allocation3 + $0xd1]] }
 0x2a4   : > { %v1789_v43 = vpop.permute.xlu1 %1788  ;;  %v5091_v32 = vpop.permute.xlu0 %1820  ;;  %v1985_v21 = vstv %s5152_s27  ;;  %s5267_s27 = sld [smem:[#allocation3 + $0x3d]] }
 0x2a5   : > { %v1793_v51 = vadd.f32 %v1789_v43, %v1751_v22  ;;  %v1826_v38 = vadd.f32 %v5091_v32, %v5058_v9  ;;  %v1986_v16 = vmul.f32 %v1985_v21, %v4871_v11 }
 0x2a6   : > { %2255 = vrot.lane.b32.xlu1 %v2250_v30, %s3702_s28  ;;  %2267 = vrot.lane.b32.xlu0 %v2263_v33, %s3702_s28  ;;  %v2396_v30 = vmul.f32 %v2394_v14, %v5160_v4  ;;  %v2409_v33 = vmul.f32 %v2408_v20, %v5149_v48 }
 0x2a7   : > { %v5099_v60 = vadd.f32 %v1811_v63, %v1793_v51  ;;  %v2422_v51 = vstv %s5158_s29  ;;  %s5278_s29 = sld [smem:[#allocation3 + $0x88]] }
 0x2a8   : > { %v5101_v35 = vpop.permute.xlu1 %1822  ;;  %v5103_v34 = vpop.permute.xlu0 %1834  ;;  %v2424_v62 = vmul.f32 %v2422_v51, %v5160_v4 }
 0x2a9   : > { %v1827_v9 = vadd.f32 %v5101_v35, %v5073_v28  ;;  %v1840_v7 = vadd.f32 %v5103_v34, %v5075_v29  ;;  %v1991_v28 = vstv %s5163_s26  ;;  %v2410_v35 = vmul.f32 %v2408_v20, %v5160_v4  ;;  %s5286_s26 = sld [smem:[#allocation3 + $0xd3]] }
 0x2aa   : > { %2269 = vrot.lane.b32.xlu1 %v2264_v46, %s3702_s28  ;;  %2281 = vrot.lane.b32.xlu0 %v2277_v25, %s3703_s17 }
 0x2ac   : > { %v5110_v53 = vpop.permute.xlu1 %1836  ;;  %v5112_v37 = vpop.permute.xlu0 %1848 }
 0x2ad   : > { %v1841_v29 = vadd.f32 %v5110_v53, %v5087_v44  ;;  %v1854_v34 = vadd.f32 %v5112_v37, %v5089_v0  ;;  %v1987_v44 = vmul.f32 %v1985_v21, %v4882_v50  ;;  %v1992_v53 = vmul.f32 %v1991_v28, %v4871_v11 }
 0x2ae   : > { %2283 = vrot.lane.b32.xlu1 %v2278_v41, %s3703_s17  ;;  %2295 = vrot.lane.b32.xlu0 %v2291_v49, %s3703_s17 }
 0x2b0   : > { %v5118_v12 = vpop.permute.xlu1 %1850  ;;  %v1863_v17 = vpop.permute.xlu0 %1862 }
 0x2b1   : > { %v1868_v6 = vadd.f32 %v1863_v17, %v1826_v38 }
 0x2b2   : > { %2297 = vrot.lane.b32.xlu1 %v2292_v18, %s3703_s17  ;;  %2309 = vrot.lane.b32.xlu0 %v2305_v19, %s3703_s17  ;;  %v2423_v18 = vmul.f32 %v2422_v51, %v5149_v48  ;;  %v2436_v19 = vstv %s5171_s30  ;;  %s5291_s30 = sld [smem:[#allocation3 + $0x32]] }
 0x2b4   : > { %v1865_v39 = vpop.permute.xlu1 %1864  ;;  %v1877_v45 = vpop.permute.xlu0 %1876 }
 0x2b5   : > { %v1869_v63 = vadd.f32 %v1865_v39, %v1827_v9  ;;  %v1882_v46 = vadd.f32 %v1877_v45, %v1840_v7  ;;  %v1855_v45 = vadd.f32 %v5118_v12, %v5099_v60  ;;  %v1993_v60 = vmul.f32 %v1991_v28, %v4882_v50 }
 0x2b6   : > { %2311 = vrot.lane.b32.xlu1 %v2306_v58, %s3703_s17  ;;  %2323 = vrot.lane.b32.xlu0 %v2319_v47, %s3704_s19  ;;  %v1997_v58 = vstv %s5177_s4  ;;  %v2478_v7 = vstv %s5222_s22  ;;  %s5297_s4 = sld [smem:[#allocation3 + $0x3e]] }
 0x2b7   : > { %s5316_s22 = sld [smem:[#allocation3 + $0xc8]] }
 0x2b8   : > { %v5132_v52 = vpop.permute.xlu1 %1878  ;;  %v5134_v61 = vpop.permute.xlu0 %1890 }
 0x2b9   : > { %v1883_v13 = vadd.f32 %v5132_v52, %v1841_v29  ;;  %v1896_v39 = vadd.f32 %v5134_v61, %v1854_v34  ;;  %v2520_v34 = vstv %s3429_s8  ;;  %s5361_s8 = sld [smem:[#allocation3 + $0x8a]] }
 0x2ba   : > { %2325 = vrot.lane.b32.xlu1 %v2320_v8, %s3704_s19  ;;  %2337 = vrot.lane.b32.xlu0 %v2333_v23, %s3704_s19 }
 0x2bc   : > { %v5143_v24 = vpop.permute.xlu1 %1892  ;;  %v1905_v59 = vpop.permute.xlu0 %1904 }
 0x2bd   : > { %v1910_v22 = vadd.f32 %v1905_v59, %v1868_v6  ;;  %v2437_v59 = vmul.f32 %v2436_v19, %v5149_v48  ;;  %v1897_v12 = vadd.f32 %v5143_v24, %v1855_v45  ;;  %v2438_v24 = vmul.f32 %v2436_v19, %v5160_v4 }
 0x2be   : > { %2339 = vrot.lane.b32.xlu1 %v2334_v27, %s3704_s19  ;;  %2351 = vrot.lane.b32.xlu0 %v2347_v31, %s3704_s19  ;;  %v2450_v27 = vstv %s5187_s24  ;;  %s5302_s24 = sld [smem:[#allocation3 + $0x7d]] }
 0x2bf   : > { %v2452_v21 = vmul.f32 %v2450_v27, %v5160_v4 }
 0x2c0   : > { %v1907_v57 = vpop.permute.xlu1 %1906  ;;  %v1919_v2 = vpop.permute.xlu0 %1918 }
 0x2c1   : > { %v1911_v36 = vadd.f32 %v1907_v57, %v1869_v63  ;;  %v1924_v41 = vadd.f32 %v1919_v2, %v1882_v46  ;;  %v1998_v57 = vmul.f32 %v1997_v58, %v4871_v11  ;;  %v2506_v46 = vstv %s3428_s6  ;;  %s5344_s6 = sld [smem:[#allocation3 + $0x3f]] }
 0x2c2   : > { %2353 = vrot.lane.b32.xlu1 %v2348_v3, %s3704_s19  ;;  %2385 = vrot.lane.b32.xlu0 %v2381_v5, %s3701_s7 }
 0x2c4   : > { %v1921_v15 = vpop.permute.xlu1 %1920  ;;  %v1933_v10 = vpop.permute.xlu0 %1932 }
 0x2c5   : > { %v1925_v47 = vadd.f32 %v1921_v15, %v1883_v13  ;;  %v1938_v56 = vadd.f32 %v1933_v10, %v1896_v39  ;;  %v2451_v15 = vmul.f32 %v2450_v27, %v5149_v48  ;;  %v2464_v10 = vstv %s5205_s18  ;;  %v5288_v39 = vld [vmem:[#allocation2 + $0x32] sm:$0xff]  ;;  %s5310_s18 = sld [smem:[#allocation3 + $0x89]] }
 0x2c6   : > { %2387 = vrot.lane.b32.xlu1 %v2382_v42, %s3701_s7  ;;  %2399 = vrot.lane.b32.xlu0 %v2395_v40, %s3701_s7  ;;  %v1999_v42 = vmul.f32 %v1997_v58, %v4882_v50  ;;  %v2465_v9 = vmul.f32 %v2464_v10, %v5149_v48 }
 0x2c8   : > { %v1935_v43 = vpop.permute.xlu1 %1934  ;;  %v1947_v32 = vpop.permute.xlu0 %1946 }
 0x2c9   : > { %v1952_v25 = vadd.f32 %v1947_v32, %v1910_v22  ;;  %v1939_v2 = vadd.f32 %v1935_v43, %v1897_v12  ;;  %v2466_v43 = vmul.f32 %v2464_v10, %v5160_v4  ;;  %v2479_v32 = vmul.f32 %v2478_v7, %v5149_v48 }
 0x2ca   : > { %2401 = vrot.lane.b32.xlu1 %v2396_v30, %s3701_s7  ;;  %2413 = vrot.lane.b32.xlu0 %v2409_v33, %s3701_s7  ;;  %v2492_v30 = vstv %s3427_s5  ;;  %s5326_s5 = sld [smem:[#allocation3 + $0xd4]] }
 0x2cb   : > { %v5197_v49 = vadd.f32 %v1986_v16, %v1952_v25  ;;  %v2480_v16 = vmul.f32 %v2478_v7, %v5160_v4  ;;  %v2493_v63 = vmul.f32 %v2492_v30, %v5149_v48  ;;  %v2494_v29 = vmul.f32 %v2492_v30, %v5160_v4 }
 0x2cc   : > { %v1949_v54 = vpop.permute.xlu1 %1948  ;;  %v1961_v17 = vpop.permute.xlu0 %1960 }
 0x2cd   : > { %v1953_v0 = vadd.f32 %v1949_v54, %v1911_v36  ;;  %v1966_v37 = vadd.f32 %v1961_v17, %v1924_v41  ;;  %v2508_v54 = vmul.f32 %v2506_v46, %v5160_v4  ;;  %v2521_v17 = vmul.f32 %v2520_v34, %v5149_v48 }
 0x2ce   : > { %2415 = vrot.lane.b32.xlu1 %v2410_v35, %s3701_s7  ;;  %2427 = vrot.lane.b32.xlu0 %v2423_v18, %s3702_s28  ;;  %v2507_v35 = vmul.f32 %v2506_v46, %v5149_v48  ;;  %v2534_v18 = vstv %s5261_s16  ;;  %s3442_s16 = sld [smem:[#allocation3 + $0xd5]] }
 0x2cf   : > { %v5212_v8 = vadd.f32 %v1987_v44, %v1953_v0  ;;  %v5214_v52 = vadd.f32 %v1992_v53, %v1966_v37  ;;  %v2522_v53 = vmul.f32 %v2520_v34, %v5160_v4  ;;  %v2535_v13 = vmul.f32 %v2534_v18, %v5149_v48 }
 0x2d0   : > { %v1963_v61 = vpop.permute.xlu1 %1962  ;;  %v1975_v23 = vpop.permute.xlu0 %1974  ;;  %v2568_v0 = vstv %s5267_s27  ;;  %v2536_v58 = vmul.f32 %v2534_v18, %v5160_v4  ;;  %s3443_s27 = sld [smem:[#allocation3 + $0x40]] }
 0x2d1   : > { %v1967_v31 = vadd.f32 %v1963_v61, %v1925_v47  ;;  %v1980_v1 = vadd.f32 %v1975_v23, %v1938_v56  ;;  %v2569_v47 = vmul.f32 %v2568_v0, %v5288_v39  ;;  %v5299_v56 = vld [vmem:[#allocation2 + $0x3a] sm:$0xff]  ;;  %v2582_v61 = vstv %s5278_s29  ;;  %s3444_s29 = sld [smem:[#allocation3 + $0x8b]] }
 0x2d2   : > { %2429 = vrot.lane.b32.xlu1 %v2424_v62, %s3702_s28  ;;  %2441 = vrot.lane.b32.xlu0 %v2437_v59, %s3702_s28  ;;  %v2570_v27 = vmul.f32 %v2568_v0, %v5299_v56 }
 0x2d3   : > { %v5226_v3 = vadd.f32 %v1993_v60, %v1967_v31  ;;  %v5228_v5 = vadd.f32 %v1998_v57, %v1980_v1  ;;  %v2583_v60 = vmul.f32 %v2582_v61, %v5288_v39  ;;  %v2596_v31 = vstv %s5286_s26  ;;  %s5400_s26 = sld [smem:[#allocation3 + $0xd6]] }
 0x2d4   : > { %v1977_v14 = vpop.permute.xlu1 %1976  ;;  %v5230_v38 = vpop.permute.xlu0 %2008  ;;  %v2174_v1 = vstv %s5291_s30  ;;  %s5406_s30 = sld [smem:[#allocation3 + $0x42]] }
 0x2d5   : > { %v1981_v11 = vadd.f32 %v1977_v14, %v1939_v2  ;;  %v2014_v23 = vadd.f32 %v5230_v38, %v5197_v49  ;;  %v2175_v10 = vmul.f32 %v2174_v1, %v5010_v55 }
 0x2d6   : > { %2443 = vrot.lane.b32.xlu1 %v2438_v24, %s3702_s28  ;;  %2455 = vrot.lane.b32.xlu0 %v2451_v15, %s3702_s28  ;;  %v2584_v24 = vmul.f32 %v2582_v61, %v5299_v56  ;;  %v2597_v15 = vmul.f32 %v2596_v31, %v5288_v39 }
 0x2d7   : > { %v5238_v40 = vadd.f32 %v1999_v42, %v1981_v11  ;;  %v2610_v11 = vstv %s5297_s4  ;;  %s5417_s4 = sld [smem:[#allocation3 + $0x8d]] }
 0x2d8   : > { %v5240_v6 = vpop.permute.xlu1 %2010  ;;  %v5242_v20 = vpop.permute.xlu0 %2022  ;;  %v2612_v18 = vmul.f32 %v2610_v11, %v5299_v56 }
 0x2d9   : > { %v2015_v49 = vadd.f32 %v5240_v6, %v5212_v8  ;;  %v2028_v57 = vadd.f32 %v5242_v20, %v5214_v52  ;;  %v2180_v8 = vstv %s5302_s24  ;;  %v2598_v6 = vmul.f32 %v2596_v31, %v5299_v56  ;;  %s5425_s24 = sld [smem:[#allocation3 + $0xd8]] }
 0x2da   : > { %2457 = vrot.lane.b32.xlu1 %v2452_v21, %s3702_s28  ;;  %2469 = vrot.lane.b32.xlu0 %v2465_v9, %s3703_s17 }
 0x2dc   : > { %v5249_v50 = vpop.permute.xlu1 %2024  ;;  %v5251_v22 = vpop.permute.xlu0 %2036 }
 0x2dd   : > { %v2029_v52 = vadd.f32 %v5249_v50, %v5226_v3  ;;  %v2042_v20 = vadd.f32 %v5251_v22, %v5228_v5  ;;  %v2176_v3 = vmul.f32 %v2174_v1, %v5021_v26  ;;  %v2181_v50 = vmul.f32 %v2180_v8, %v5010_v55 }
 0x2de   : > { %2471 = vrot.lane.b32.xlu1 %v2466_v43, %s3703_s17  ;;  %2483 = vrot.lane.b32.xlu0 %v2479_v32, %s3703_s17 }
 0x2e0   : > { %v5257_v33 = vpop.permute.xlu1 %2038  ;;  %v2051_v51 = vpop.permute.xlu0 %2050 }
 0x2e1   : > { %v2056_v12 = vadd.f32 %v2051_v51, %v2014_v23 }
 0x2e2   : > { %2485 = vrot.lane.b32.xlu1 %v2480_v16, %s3703_s17  ;;  %2497 = vrot.lane.b32.xlu0 %v2493_v63, %s3703_s17  ;;  %v2611_v16 = vmul.f32 %v2610_v11, %v5288_v39  ;;  %v2624_v63 = vstv %s5310_s18  ;;  %s5430_s18 = sld [smem:[#allocation3 + $0x37]] }
 0x2e4   : > { %v2053_v25 = vpop.permute.xlu1 %2052  ;;  %v2065_v28 = vpop.permute.xlu0 %2064 }
 0x2e5   : > { %v2057_v42 = vadd.f32 %v2053_v25, %v2015_v49  ;;  %v2070_v21 = vadd.f32 %v2065_v28, %v2028_v57  ;;  %v2043_v28 = vadd.f32 %v5257_v33, %v5238_v40  ;;  %v2182_v40 = vmul.f32 %v2180_v8, %v5021_v26 }
 0x2e6   : > { %2499 = vrot.lane.b32.xlu1 %v2494_v29, %s3703_s17  ;;  %2511 = vrot.lane.b32.xlu0 %v2507_v35, %s3704_s19  ;;  %v2186_v29 = vstv %s5316_s22  ;;  %v2666_v57 = vstv %s5361_s8  ;;  %s5436_s22 = sld [smem:[#allocation3 + $0x43]] }
 0x2e7   : > { %s5455_s8 = sld [smem:[#allocation3 + $0xcd]] }
 0x2e8   : > { %v5271_v36 = vpop.permute.xlu1 %2066  ;;  %v5273_v41 = vpop.permute.xlu0 %2078 }
 0x2e9   : > { %v2071_v46 = vadd.f32 %v5271_v36, %v2029_v52  ;;  %v2084_v25 = vadd.f32 %v5273_v41, %v2042_v20  ;;  %v2708_v20 = vstv %s3444_s29  ;;  %s5494_s29 = sld [smem:[#allocation3 + $0x8f]] }
 0x2ea   : > { %2513 = vrot.lane.b32.xlu1 %v2508_v54, %s3704_s19  ;;  %2525 = vrot.lane.b32.xlu0 %v2521_v17, %s3704_s19 }
 0x2ec   : > { %v5282_v19 = vpop.permute.xlu1 %2080  ;;  %v2093_v44 = vpop.permute.xlu0 %2092 }
 0x2ed   : > { %v2098_v2 = vadd.f32 %v2093_v44, %v2056_v12  ;;  %v2625_v44 = vmul.f32 %v2624_v63, %v5288_v39  ;;  %v2085_v33 = vadd.f32 %v5282_v19, %v2043_v28  ;;  %v2626_v19 = vmul.f32 %v2624_v63, %v5299_v56 }
 0x2ee   : > { %2527 = vrot.lane.b32.xlu1 %v2522_v53, %s3704_s19  ;;  %2539 = vrot.lane.b32.xlu0 %v2535_v13, %s3704_s19  ;;  %v2638_v53 = vstv %s5326_s5  ;;  %s5441_s5 = sld [smem:[#allocation3 + $0x82]] }
 0x2ef   : > { %v2640_v1 = vmul.f32 %v2638_v53, %v5299_v56 }
 0x2f0   : > { %v2095_v37 = vpop.permute.xlu1 %2094  ;;  %v2107_v45 = vpop.permute.xlu0 %2106 }
 0x2f1   : > { %v2099_v7 = vadd.f32 %v2095_v37, %v2057_v42  ;;  %v2112_v43 = vadd.f32 %v2107_v45, %v2070_v21  ;;  %v2187_v37 = vmul.f32 %v2186_v29, %v5010_v55  ;;  %v2694_v21 = vstv %s3443_s27  ;;  %s5481_s27 = sld [smem:[#allocation3 + $0x44]] }
 0x2f2   : > { %2541 = vrot.lane.b32.xlu1 %v2536_v58, %s3704_s19  ;;  %2573 = vrot.lane.b32.xlu0 %v2569_v47, %s3701_s7 }
 0x2f4   : > { %v2109_v62 = vpop.permute.xlu1 %2108  ;;  %v2121_v59 = vpop.permute.xlu0 %2120 }
 0x2f5   : > { %v2113_v35 = vadd.f32 %v2109_v62, %v2071_v46  ;;  %v2126_v34 = vadd.f32 %v2121_v59, %v2084_v25  ;;  %v2639_v62 = vmul.f32 %v2638_v53, %v5288_v39  ;;  %v2652_v59 = vstv %s5344_s6  ;;  %v5427_v25 = vld [vmem:[#allocation2 + $0x33] sm:$0xff]  ;;  %s5449_s6 = sld [smem:[#allocation3 + $0x8e]] }
 0x2f6   : > { %2575 = vrot.lane.b32.xlu1 %v2570_v27, %s3701_s7  ;;  %2587 = vrot.lane.b32.xlu0 %v2583_v60, %s3701_s7  ;;  %v2188_v27 = vmul.f32 %v2186_v29, %v5021_v26  ;;  %v2653_v49 = vmul.f32 %v2652_v59, %v5288_v39 }
 0x2f8   : > { %v2123_v14 = vpop.permute.xlu1 %2122  ;;  %v2135_v38 = vpop.permute.xlu0 %2134 }
 0x2f9   : > { %v2140_v9 = vadd.f32 %v2135_v38, %v2098_v2  ;;  %v2127_v45 = vadd.f32 %v2123_v14, %v2085_v33  ;;  %v2654_v14 = vmul.f32 %v2652_v59, %v5299_v56  ;;  %v2667_v38 = vmul.f32 %v2666_v57, %v5288_v39 }
 0x2fa   : > { %2589 = vrot.lane.b32.xlu1 %v2584_v24, %s3701_s7  ;;  %2601 = vrot.lane.b32.xlu0 %v2597_v15, %s3701_s7  ;;  %v2680_v24 = vstv %s3442_s16  ;;  %s5465_s16 = sld [smem:[#allocation3 + $0xd9]] }
 0x2fb   : > { %v5336_v32 = vadd.f32 %v2175_v10, %v2140_v9  ;;  %v2668_v10 = vmul.f32 %v2666_v57, %v5299_v56  ;;  %v2681_v42 = vmul.f32 %v2680_v24, %v5288_v39  ;;  %v2682_v52 = vmul.f32 %v2680_v24, %v5299_v56 }
 0x2fc   : > { %v2137_v30 = vpop.permute.xlu1 %2136  ;;  %v2149_v51 = vpop.permute.xlu0 %2148 }
 0x2fd   : > { %v2141_v5 = vadd.f32 %v2137_v30, %v2099_v7  ;;  %v2154_v22 = vadd.f32 %v2149_v51, %v2112_v43  ;;  %v2696_v30 = vmul.f32 %v2694_v21, %v5299_v56  ;;  %v2709_v51 = vmul.f32 %v2708_v20, %v5288_v39 }
 0x2fe   : > { %2603 = vrot.lane.b32.xlu1 %v2598_v6, %s3701_s7  ;;  %2615 = vrot.lane.b32.xlu0 %v2611_v16, %s3702_s28  ;;  %v2695_v6 = vmul.f32 %v2694_v21, %v5288_v39  ;;  %v2722_v16 = vstv %s5400_s26  ;;  %s5502_s26 = sld [smem:[#allocation3 + $0xda]] }
 0x2ff   : > { %v5351_v54 = vadd.f32 %v2176_v3, %v2141_v5  ;;  %v5353_v36 = vadd.f32 %v2181_v50, %v2154_v22  ;;  %v2710_v50 = vmul.f32 %v2708_v20, %v5299_v56  ;;  %v2723_v46 = vmul.f32 %v2722_v16, %v5288_v39 }
 0x300   : > { %v2151_v41 = vpop.permute.xlu1 %2150  ;;  %v2163_v17 = vpop.permute.xlu0 %2162  ;;  %v2756_v5 = vstv %s5406_s30  ;;  %v2724_v29 = vmul.f32 %v2722_v16, %v5299_v56  ;;  %s5509_s30 = sld [smem:[#allocation3 + $0x45]] }
 0x301   : > { %v2155_v13 = vadd.f32 %v2151_v41, %v2113_v35  ;;  %v2168_v0 = vadd.f32 %v2163_v17, %v2126_v34  ;;  %v2757_v35 = vmul.f32 %v2756_v5, %v5427_v25  ;;  %v5438_v34 = vld [vmem:[#allocation2 + $0x3b] sm:$0xff]  ;;  %v2770_v41 = vstv %s5417_s4  ;;  %s5516_s4 = sld [smem:[#allocation3 + $0x90]] }
 0x302   : > { %2617 = vrot.lane.b32.xlu1 %v2612_v18, %s3702_s28  ;;  %2629 = vrot.lane.b32.xlu0 %v2625_v44, %s3702_s28  ;;  %v2758_v53 = vmul.f32 %v2756_v5, %v5438_v34 }
 0x303   : > { %v5365_v58 = vadd.f32 %v2182_v40, %v2155_v13  ;;  %v5367_v47 = vadd.f32 %v2187_v37, %v2168_v0  ;;  %v2771_v40 = vmul.f32 %v2770_v41, %v5427_v25  ;;  %v2784_v13 = vstv %s5425_s24  ;;  %s5523_s24 = sld [smem:[#allocation3 + $0xdb]] }
 0x304   : > { %v2165_v61 = vpop.permute.xlu1 %2164  ;;  %v5369_v23 = vpop.permute.xlu0 %2197  ;;  %v2362_v0 = vstv %s5430_s18  ;;  %s5530_s18 = sld [smem:[#allocation3 + $0x47]] }
 0x305   : > { %v2169_v55 = vadd.f32 %v2165_v61, %v2127_v45  ;;  %v2203_v17 = vadd.f32 %v5369_v23, %v5336_v32  ;;  %v2363_v59 = vmul.f32 %v2362_v0, %v5149_v48 }
 0x306   : > { %2631 = vrot.lane.b32.xlu1 %v2626_v19, %s3702_s28  ;;  %2643 = vrot.lane.b32.xlu0 %v2639_v62, %s3702_s28  ;;  %v2772_v19 = vmul.f32 %v2770_v41, %v5438_v34  ;;  %v2785_v62 = vmul.f32 %v2784_v13, %v5427_v25 }
 0x307   : > { %v5377_v60 = vadd.f32 %v2188_v27, %v2169_v55  ;;  %v2798_v55 = vstv %s5436_s22  ;;  %s5537_s22 = sld [smem:[#allocation3 + $0x92]] }
 0x308   : > { %v5379_v12 = vpop.permute.xlu1 %2199  ;;  %v5381_v31 = vpop.permute.xlu0 %2211 }
 0x309   : > { %v2204_v32 = vadd.f32 %v5379_v12, %v5351_v54  ;;  %v2217_v37 = vadd.f32 %v5381_v31, %v5353_v36  ;;  %v2368_v54 = vstv %s5441_s5  ;;  %v2786_v12 = vmul.f32 %v2784_v13, %v5438_v34  ;;  %s5546_s5 = sld [smem:[#allocation3 + $0xdd]] }
 0x30a   : > { %2645 = vrot.lane.b32.xlu1 %v2640_v1, %s3702_s28  ;;  %2657 = vrot.lane.b32.xlu0 %v2653_v49, %s3703_s17 }
 0x30c   : > { %v5388_v26 = vpop.permute.xlu1 %2213  ;;  %v5390_v2 = vpop.permute.xlu0 %2225 }
 0x30d   : > { %v2218_v36 = vadd.f32 %v5388_v26, %v5365_v58  ;;  %v2231_v31 = vadd.f32 %v5390_v2, %v5367_v47  ;;  %v2364_v58 = vmul.f32 %v2362_v0, %v5160_v4  ;;  %v2369_v26 = vmul.f32 %v2368_v54, %v5149_v48 }
 0x30e   : > { %2659 = vrot.lane.b32.xlu1 %v2654_v14, %s3703_s17  ;;  %2671 = vrot.lane.b32.xlu0 %v2667_v38, %s3703_s17 }
 0x310   : > { %v5396_v15 = vpop.permute.xlu1 %2227  ;;  %v2240_v11 = vpop.permute.xlu0 %2239 }
 0x311   : > { %v2245_v33 = vadd.f32 %v2240_v11, %v2203_v17  ;;  %v2232_v2 = vadd.f32 %v5396_v15, %v5377_v60 }
 0x312   : > { %2673 = vrot.lane.b32.xlu1 %v2668_v10, %s3703_s17  ;;  %2685 = vrot.lane.b32.xlu0 %v2681_v42, %s3703_s17  ;;  %v2799_v10 = vmul.f32 %v2798_v55, %v5427_v25  ;;  %v2812_v42 = vstv %s5449_s6  ;;  %s5550_s6 = sld [smem:[#allocation3 + $0x3c]] }
 0x314   : > { %v2242_v9 = vpop.permute.xlu1 %2241  ;;  %v2254_v8 = vpop.permute.xlu0 %2253 }
 0x315   : > { %v2246_v27 = vadd.f32 %v2242_v9, %v2204_v32  ;;  %v2259_v1 = vadd.f32 %v2254_v8, %v2217_v37 }
 0x316   : > { %2687 = vrot.lane.b32.xlu1 %v2682_v52, %s3703_s17  ;;  %2699 = vrot.lane.b32.xlu0 %v2695_v6, %s3704_s19  ;;  %v2374_v52 = vstv %s5455_s8  ;;  %s5557_s8 = sld [smem:[#allocation3 + $0x48]] }
 0x318   : > { %v5410_v7 = vpop.permute.xlu1 %2255  ;;  %v5412_v43 = vpop.permute.xlu0 %2267 }
 0x319   : > { %v2260_v21 = vadd.f32 %v5410_v7, %v2218_v36  ;;  %v2273_v9 = vadd.f32 %v5412_v43, %v2231_v31  ;;  %v2800_v43 = vmul.f32 %v2798_v55, %v5438_v34 }
 0x31a   : > { %2701 = vrot.lane.b32.xlu1 %v2696_v30, %s3704_s19  ;;  %2713 = vrot.lane.b32.xlu0 %v2709_v51, %s3704_s19 }
 0x31c   : > { %v5421_v63 = vpop.permute.xlu1 %2269  ;;  %v2282_v3 = vpop.permute.xlu0 %2281 }
 0x31d   : > { %v2287_v45 = vadd.f32 %v2282_v3, %v2245_v33  ;;  %v2813_v3 = vmul.f32 %v2812_v42, %v5427_v25  ;;  %v2274_v60 = vadd.f32 %v5421_v63, %v2232_v2 }
 0x31e   : > { %2715 = vrot.lane.b32.xlu1 %v2710_v50, %s3704_s19  ;;  %2727 = vrot.lane.b32.xlu0 %v2723_v46, %s3704_s19  ;;  %v2826_v50 = vstv %s5465_s16  ;;  %v2370_v46 = vmul.f32 %v2368_v54, %v5160_v4  ;;  %s5561_s16 = sld [smem:[#allocation3 + $0x87]] }
 0x31f   : > { %v2827_v63 = vmul.f32 %v2826_v50, %v5427_v25  ;;  %v2828_v32 = vmul.f32 %v2826_v50, %v5438_v34  ;;  %v2944_v50 = vstv %s5530_s18  ;;  %s5619_s18 = sld [smem:[#allocation3 + $0x95]] }
 0x320   : > { %v2284_v22 = vpop.permute.xlu1 %2283  ;;  %v2296_v28 = vpop.permute.xlu0 %2295 }
 0x321   : > { %v2288_v57 = vadd.f32 %v2284_v22, %v2246_v27  ;;  %v2301_v14 = vadd.f32 %v2296_v28, %v2259_v1  ;;  %v2375_v22 = vmul.f32 %v2374_v52, %v5149_v48  ;;  %v2376_v48 = vmul.f32 %v2374_v52, %v5160_v4 }
 0x322   : > { %2729 = vrot.lane.b32.xlu1 %v2724_v29, %s3704_s19  ;;  %2761 = vrot.lane.b32.xlu0 %v2757_v35, %s3701_s7  ;;  %v2868_v1 = vstv %s5502_s26  ;;  %s5575_s26 = sld [smem:[#allocation3 + $0xde]] }
 0x324   : > { %v2298_v18 = vpop.permute.xlu1 %2297  ;;  %v2310_v44 = vpop.permute.xlu0 %2309 }
 0x325   : > { %v2302_v6 = vadd.f32 %v2298_v18, %v2260_v21  ;;  %v2315_v20 = vadd.f32 %v2310_v44, %v2273_v9  ;;  %v2814_v18 = vmul.f32 %v2812_v42, %v5438_v34 }
 0x326   : > { %2763 = vrot.lane.b32.xlu1 %v2758_v53, %s3701_s7  ;;  %2775 = vrot.lane.b32.xlu0 %v2771_v40, %s3701_s7  ;;  %v2840_v40 = vstv %s5481_s27  ;;  %s5565_s27 = sld [smem:[#allocation3 + $0x93]] }
 0x327   : > { %v2841_v37 = vmul.f32 %v2840_v40, %v5427_v25 }
 0x328   : > { %v2312_v61 = vpop.permute.xlu1 %2311  ;;  %v2324_v23 = vpop.permute.xlu0 %2323 }
 0x329   : > { %v2329_v49 = vadd.f32 %v2324_v23, %v2287_v45  ;;  %v2316_v28 = vadd.f32 %v2312_v61, %v2274_v60  ;;  %v2854_v23 = vstv %s5494_s29  ;;  %s5571_s29 = sld [smem:[#allocation3 + $0xd2]] }
 0x32a   : > { %2777 = vrot.lane.b32.xlu1 %v2772_v19, %s3701_s7  ;;  %2789 = vrot.lane.b32.xlu0 %v2785_v62, %s3701_s7  ;;  %v2842_v62 = vmul.f32 %v2840_v40, %v5438_v34  ;;  %v2855_v55 = vmul.f32 %v2854_v23, %v5427_v25  ;;  %v2856_v36 = vmul.f32 %v2854_v23, %v5438_v34  ;;  %v2972_v40 = vstv %s5546_s5  ;;  %s3448_s5 = sld [smem:[#allocation3 + $0xd7]] }
 0x32b   : > { %v2365_v38 = vadd.f32 %v2363_v59, %v2329_v49 }
 0x32c   : > { %v2326_v24 = vpop.permute.xlu1 %2325  ;;  %v2338_v11 = vpop.permute.xlu0 %2337 }
 0x32d   : > { %v2330_v8 = vadd.f32 %v2326_v24, %v2288_v57  ;;  %v2343_v47 = vadd.f32 %v2338_v11, %v2301_v14  ;;  %v2882_v14 = vstv %s5509_s30  ;;  %v2870_v11 = vmul.f32 %v2868_v1, %v5438_v34  ;;  %s5587_s30 = sld [smem:[#allocation3 + $0x49]] }
 0x32e   : > { %2791 = vrot.lane.b32.xlu1 %v2786_v12, %s3701_s7  ;;  %2803 = vrot.lane.b32.xlu0 %v2799_v10, %s3702_s28  ;;  %v2869_v12 = vmul.f32 %v2868_v1, %v5427_v25  ;;  %v2883_v10 = vmul.f32 %v2882_v14, %v5427_v25  ;;  %v3000_v1 = vstv %s5565_s27  ;;  %s3486_s27 = smul.u32 768, %s3685_s12  ;;  %s3121_s12 = scalar_lea.sflag [#allocation5], %s3824_s23 }
 0x32f   : > { %v2366_v30 = vadd.f32 %v2364_v58, %v2330_v8  ;;  %v2371_v51 = vadd.f32 %v2369_v26, %v2343_v47  ;;  %v2896_v26 = vstv %s5516_s4  ;;  %v2884_v8 = vmul.f32 %v2882_v14, %v5438_v34  ;;  %s5605_s4 = sld [smem:[#allocation3 + $0xdf]] }
 0x330   : > { %v2340_v7 = vpop.permute.xlu1 %2339  ;;  %v2352_v16 = vpop.permute.xlu0 %2351  ;;  %v2897_v47 = vmul.f32 %v2896_v26, %v5427_v25 }
 0x331   : > { %v2344_v15 = vadd.f32 %v2340_v7, %v2302_v6  ;;  %v2357_v5 = vadd.f32 %v2352_v16, %v2315_v20  ;;  %v2910_v6 = vstv %s5523_s24  ;;  %v5543_v16 = vld [vmem:[#allocation2 + $0x34] sm:$0xff]  ;;  %s5612_s24 = sld [smem:[#allocation3 + $0x4a]] }
 0x332   : > { %2805 = vrot.lane.b32.xlu1 %v2800_v43, %s3702_s28  ;;  %2817 = vrot.lane.b32.xlu0 %v2813_v3, %s3702_s28  ;;  %v2911_v7 = vmul.f32 %v2910_v6, %v5427_v25 }
 0x333   : > { %v2372_v29 = vadd.f32 %v2370_v46, %v2344_v15  ;;  %v2377_v35 = vadd.f32 %v2375_v22, %v2357_v5  ;;  %v2912_v15 = vmul.f32 %v2910_v6, %v5438_v34  ;;  %v2945_v5 = vmul.f32 %v2944_v50, %v5543_v16  ;;  %v5554_v22 = vld [vmem:[#allocation2 + $0x3c] sm:$0xff] }
 0x334   : > { %v2354_v41 = vpop.permute.xlu1 %2353  ;;  %v2386_v17 = vpop.permute.xlu0 %2385  ;;  %v3002_v6 = vmul.f32 %v3000_v1, %v5554_v22 }
 0x335   : > { %v2358_v44 = vadd.f32 %v2354_v41, %v2316_v28  ;;  %v2391_v53 = vadd.f32 %v2386_v17, %v2365_v38 }
 0x336   : > { %2819 = vrot.lane.b32.xlu1 %v2814_v18, %s3702_s28  ;;  %2831 = vrot.lane.b32.xlu0 %v2827_v63, %s3702_s28  ;;  %v2946_v18 = vmul.f32 %v2944_v50, %v5554_v22 }
 0x337   : > { %v2378_v33 = vadd.f32 %v2376_v48, %v2358_v44  ;;  %v2550_v48 = vstv %s5550_s6  ;;  %s5652_s6 = sld [smem:[#allocation3 + $0x91]] }
 0x338   : > { %v2388_v13 = vpop.permute.xlu1 %2387  ;;  %v2400_v0 = vpop.permute.xlu0 %2399  ;;  %v2551_v23 = vmul.f32 %v2550_v48, %v5288_v39 }
 0x339   : > { %v2392_v45 = vadd.f32 %v2388_v13, %v2366_v30  ;;  %v2405_v61 = vadd.f32 %v2400_v0, %v2371_v51  ;;  %v2898_v51 = vmul.f32 %v2896_v26, %v5438_v34 }
 0x33a   : > { %2833 = vrot.lane.b32.xlu1 %v2828_v32, %s3702_s28  ;;  %2845 = vrot.lane.b32.xlu0 %v2841_v37, %s3703_s17  ;;  %v2973_v32 = vmul.f32 %v2972_v40, %v5543_v16 }
 0x33c   : > { %v2402_v4 = vpop.permute.xlu1 %2401  ;;  %v2414_v19 = vpop.permute.xlu0 %2413 }
 0x33d   : > { %v2406_v59 = vadd.f32 %v2402_v4, %v2372_v29  ;;  %v2419_v27 = vadd.f32 %v2414_v19, %v2377_v35  ;;  %v2958_v35 = vstv %s5537_s22  ;;  %v2556_v4 = vstv %s5561_s16  ;;  %s3447_s22 = sld [smem:[#allocation3 + $0x8c]]  ;;  %s187_s16 = scalar_lea.vmem [#allocation8], %s3485_s3 }
 0x33e   : > { %2847 = vrot.lane.b32.xlu1 %v2842_v62, %s3703_s17  ;;  %2859 = vrot.lane.b32.xlu0 %v2855_v55, %s3703_s17  ;;  %v2959_v63 = vmul.f32 %v2958_v35, %v5543_v16  ;;  %v2960_v0 = vmul.f32 %v2958_v35, %v5554_v22  ;;  %s3136_s3 = sshll.u32 %s187_s16, 4  ;;  %s5672_s3 = int_to_ptr.vmem [resolvable:$true] %s3136_s3 }
 0x340   : > { %v2416_v49 = vpop.permute.xlu1 %2415  ;;  %v2428_v54 = vpop.permute.xlu0 %2427 }
 0x341   : > { %v2420_v31 = vadd.f32 %v2416_v49, %v2378_v33  ;;  %v2433_v57 = vadd.f32 %v2428_v54, %v2391_v53 }
 0x342   : > { %2861 = vrot.lane.b32.xlu1 %v2856_v36, %s3703_s17  ;;  %2873 = vrot.lane.b32.xlu0 %v2869_v12, %s3703_s17  ;;  %v2552_v36 = vmul.f32 %v2550_v48, %v5299_v56  ;;  %v2557_v12 = vmul.f32 %v2556_v4, %v5288_v39 }
 0x344   : > { %v2430_v38 = vpop.permute.xlu1 %2429  ;;  %v2442_v24 = vpop.permute.xlu0 %2441 }
 0x345   : > { %v2434_v42 = vadd.f32 %v2430_v38, %v2392_v45  ;;  %v2447_v58 = vadd.f32 %v2442_v24, %v2405_v61  ;;  %v2986_v61 = vstv %s5557_s8  ;;  %s5654_s8 = sld [smem:[#allocation3 + $0xdc]] }
 0x346   : > { %2875 = vrot.lane.b32.xlu1 %v2870_v11, %s3703_s17  ;;  %2887 = vrot.lane.b32.xlu0 %v2883_v10, %s3704_s19  ;;  %v2988_v11 = vmul.f32 %v2986_v61, %v5554_v22  ;;  %v3001_v10 = vmul.f32 %v3000_v1, %v5543_v16 }
 0x348   : > { %v2444_v21 = vpop.permute.xlu1 %2443  ;;  %v2456_v9 = vpop.permute.xlu0 %2455 }
 0x349   : > { %v2448_v2 = vadd.f32 %v2444_v21, %v2406_v59  ;;  %v2461_v52 = vadd.f32 %v2456_v9, %v2419_v27  ;;  %v2974_v59 = vmul.f32 %v2972_v40, %v5554_v22  ;;  %v2987_v27 = vmul.f32 %v2986_v61, %v5543_v16 }
 0x34a   : > { %2889 = vrot.lane.b32.xlu1 %v2884_v8, %s3704_s19  ;;  %2901 = vrot.lane.b32.xlu0 %v2897_v47, %s3704_s19  ;;  %v2558_v21 = vmul.f32 %v2556_v4, %v5299_v56 }
 0x34c   : > { %v2458_v20 = vpop.permute.xlu1 %2457  ;;  %v2470_v30 = vpop.permute.xlu0 %2469 }
 0x34d   : > { %v2462_v43 = vadd.f32 %v2458_v20, %v2420_v31  ;;  %v2475_v3 = vadd.f32 %v2470_v30, %v2433_v57  ;;  %v2562_v31 = vstv %s5571_s29 }
 0x34e   : > { %2903 = vrot.lane.b32.xlu1 %v2898_v51, %s3704_s19  ;;  %2915 = vrot.lane.b32.xlu0 %v2911_v7, %s3704_s19  ;;  %v2563_v9 = vmul.f32 %v2562_v31, %v5288_v39  ;;  %v3028_v7 = vstv %s5587_s30  ;;  %v2564_v39 = vmul.f32 %v2562_v31, %v5299_v56  ;;  %s5677_s30 = scalar_lea.hbm %s5728_s2, %s3486_s27 }
 0x34f   : > { %v3030_v35 = vmul.f32 %v3028_v7, %v5554_v22 }
 0x350   : > { %v2472_v46 = vpop.permute.xlu1 %2471  ;;  %v2484_v60 = vpop.permute.xlu0 %2483 }
 0x351   : > { %v2476_v28 = vadd.f32 %v2472_v46, %v2434_v42  ;;  %v2489_v29 = vadd.f32 %v2484_v60, %v2447_v58  ;;  %v3014_v42 = vstv %s5575_s26  ;;  %v3029_v60 = vmul.f32 %v3028_v7, %v5543_v16 }
 0x352   : > { %2917 = vrot.lane.b32.xlu1 %v2912_v15, %s3704_s19  ;;  %2949 = vrot.lane.b32.xlu0 %v2945_v5, %s3701_s7  ;;  %v3015_v20 = vmul.f32 %v3014_v42, %v5543_v16  ;;  %v3016_v46 = vmul.f32 %v3014_v42, %v5554_v22 }
 0x354   : > { %v2486_v41 = vpop.permute.xlu1 %2485  ;;  %v2498_v17 = vpop.permute.xlu0 %2497 }
 0x355   : > { %v2490_v44 = vadd.f32 %v2486_v41, %v2448_v2  ;;  %v2503_v53 = vadd.f32 %v2498_v17, %v2461_v52 }
 0x356   : > { %2951 = vrot.lane.b32.xlu1 %v2946_v18, %s3701_s7  ;;  %2963 = vrot.lane.b32.xlu0 %v2959_v63, %s3701_s7  ;;  %v3056_v63 = vstv %s5605_s4  ;;  %s3705_s4 = smov [#allocation8]  }
 0x357   : > { %v3057_v48 = vmul.f32 %v3056_v63, %v5543_v16 }
 0x358   : > { %v2500_v33 = vpop.permute.xlu1 %2499  ;;  %v2512_v13 = vpop.permute.xlu0 %2511 }
 0x359   : > { %v2504_v37 = vadd.f32 %v2500_v33, %v2462_v43  ;;  %v2517_v45 = vadd.f32 %v2512_v13, %v2475_v3 }
 0x35a   : > { %2965 = vrot.lane.b32.xlu1 %v2960_v0, %s3701_s7  ;;  %2977 = vrot.lane.b32.xlu0 %v2973_v32, %s3701_s7  ;;  %v3070_v0 = vstv %s5612_s24  ;;  %s3613_s24 = sshll.u32 %s3705_s4, 4  ;;  %s3614_s24 = int_to_ptr.vmem [resolvable:$false] %s3613_s24 }
 0x35b   : > { %v2553_v19 = vadd.f32 %v2551_v23, %v2517_v45  ;;  %v3058_v45 = vmul.f32 %v3056_v63, %v5554_v22  ;;  %v3071_v61 = vmul.f32 %v3070_v0, %v5543_v16  ;;  %p3616_p12 = scmp.lt.s32.totalorder %s5672_s3, %s3614_s24 }
 0x35c   : > { %v2514_v62 = vpop.permute.xlu1 %2513  ;;  %v2526_v55 = vpop.permute.xlu0 %2525 }
 0x35d   : > { %v2518_v49 = vadd.f32 %v2514_v62, %v2476_v28  ;;  %v2531_v54 = vadd.f32 %v2526_v55, %v2489_v29 }
 0x35e   : > { %2979 = vrot.lane.b32.xlu1 %v2974_v59, %s3701_s7  ;;  %2991 = vrot.lane.b32.xlu0 %v2987_v27, %s3702_s28  ;;  %s5597_s7 = sld [smem:[#allocation3 + $0x94]]  ;;  %v3072_v59 = vmul.f32 %v3070_v0, %v5554_v22 }
 0x35f   : > { %v2554_v57 = vadd.f32 %v2552_v36, %v2518_v49  ;;  %v2559_v14 = vadd.f32 %v2557_v12, %v2531_v54 }
 0x360   : > { %v2528_v38 = vpop.permute.xlu1 %2527  ;;  %v2540_v24 = vpop.permute.xlu0 %2539 }
 0x361   : > { %v2532_v58 = vadd.f32 %v2528_v38, %v2490_v44  ;;  %v2545_v26 = vadd.f32 %v2540_v24, %v2503_v53 }
 0x362   : > { %2993 = vrot.lane.b32.xlu1 %v2988_v11, %s3702_s28  ;;  %3005 = vrot.lane.b32.xlu0 %v3001_v10, %s3702_s28 }
 0x363   : > { %v2560_v8 = vadd.f32 %v2558_v21, %v2532_v58  ;;  %v2565_v47 = vadd.f32 %v2563_v9, %v2545_v26 }
 0x364   : > { %v2542_v2 = vpop.permute.xlu1 %2541  ;;  %v2574_v52 = vpop.permute.xlu0 %2573  ;;  %v3042_v28 = vstv %s5597_s7  ;;  %s3609_s7 = scalar_lea.vmem %s5672_s3, 768 }
 0x365   : > { %v2546_v30 = vadd.f32 %v2542_v2, %v2504_v37  ;;  %v2579_v51 = vadd.f32 %v2574_v52, %v2553_v19  ;;  %v3043_v41 = vmul.f32 %v3042_v28, %v5543_v16  ;;  %v3044_v40 = vmul.f32 %v3042_v28, %v5554_v22  ;;  %p3610_p3 = scmp.ne.s32.totalorder %s5672_s3, %s3609_s7 }
 0x366   : > { %3007 = vrot.lane.b32.xlu1 %v3002_v6, %s3702_s28  ;;  %3019 = vrot.lane.b32.xlu0 %v3015_v20, %s3702_s28  ;;  %v3084_v19 = vstv %s5619_s18  ;;  %s3615_s18 = scalar_lea.vmem %s3614_s24, 1536 }
 0x367   : > { %v2566_v43 = vadd.f32 %v2564_v39, %v2546_v30  ;;  %v3085_v27 = vmul.f32 %v3084_v19, %v5543_v16  ;;  %v3086_v31 = vmul.f32 %v3084_v19, %v5554_v22  ;;  %p3611_p7 = pnand %p3610_p3, %p3771_p8  ;;  %p3617_p13 = scmp.lt.s32.totalorder %s3615_s18, %s3609_s7 }
 0x368   : > { %v2576_v3 = vpop.permute.xlu1 %2575  ;;  %v2588_v50 = vpop.permute.xlu0 %2587 }
 0x369   : > { %v2580_v15 = vadd.f32 %v2576_v3, %v2554_v57  ;;  %v2593_v5 = vadd.f32 %v2588_v50, %v2559_v14  ;;  %p3612_p9 = pneg %p3611_p7  ;;  %p3618_p2 = por %p3617_p13, %p3616_p12 }
 0x36a   : > { %3021 = vrot.lane.b32.xlu1 %v3016_v46, %s3702_s28  ;;  %3033 = vrot.lane.b32.xlu0 %v3029_v60, %s3703_s17  ;;  %s5626_s28 = sld [smem:[#allocation3 + $0xe0]] }
 0x36b   : > { %p3619_p5 = pnand %p3618_p2, %p3612_p9 }
 0x36c   : > { %v2590_v56 = vpop.permute.xlu1 %2589  ;;  %v2602_v29 = vpop.permute.xlu0 %2601 }
 0x36d   : > { %v2594_v17 = vadd.f32 %v2590_v56, %v2560_v8  ;;  %v2607_v18 = vadd.f32 %v2602_v29, %v2565_v47 }
 0x36e   : > { %3035 = vrot.lane.b32.xlu1 %v3030_v35, %s3703_s17  ;;  %3047 = vrot.lane.b32.xlu0 %v3043_v41, %s3703_s17 }
 0x370   : > { %v2604_v44 = vpop.permute.xlu1 %2603  ;;  %v2616_v53 = vpop.permute.xlu0 %2615  ;;  %v3098_v54 = vstv %s5626_s28 }
 0x371   : > { %v2608_v33 = vadd.f32 %v2604_v44, %v2566_v43  ;;  %v2621_v13 = vadd.f32 %v2616_v53, %v2579_v51  ;;  %v3099_v57 = vmul.f32 %v3098_v54, %v5543_v16  ;;  %v3100_v10 = vmul.f32 %v3098_v54, %v5554_v22 }
 0x372   : > { %3049 = vrot.lane.b32.xlu1 %v3044_v40, %s3703_s17  ;;  %3061 = vrot.lane.b32.xlu0 %v3057_v48, %s3703_s17  ;;  %v2744_v51 = vstv %s3447_s22 }
 0x373   : > { %v2745_v60 = vmul.f32 %v2744_v51, %v5427_v25 }
 0x374   : > { %v2618_v32 = vpop.permute.xlu1 %2617  ;;  %v2630_v37 = vpop.permute.xlu0 %2629 }
 0x375   : > { %v2622_v23 = vadd.f32 %v2618_v32, %v2580_v15  ;;  %v2635_v4 = vadd.f32 %v2630_v37, %v2593_v5  ;;  %v2750_v15 = vstv %s3448_s5 }
 0x376   : > { %3063 = vrot.lane.b32.xlu1 %v3058_v45, %s3703_s17  ;;  %3075 = vrot.lane.b32.xlu0 %v3071_v61, %s3704_s19  ;;  %s3446_s17 = sld [smem:[#allocation3 + $0x41]] }
 0x378   : > { %v2632_v62 = vpop.permute.xlu1 %2631  ;;  %v2644_v55 = vpop.permute.xlu0 %2643 }
 0x379   : > { %v2636_v1 = vadd.f32 %v2632_v62, %v2594_v17  ;;  %v2649_v49 = vadd.f32 %v2644_v55, %v2607_v18  ;;  %v2746_v17 = vmul.f32 %v2744_v51, %v5438_v34  ;;  %v2751_v18 = vmul.f32 %v2750_v15, %v5427_v25 }
 0x37a   : > { %3077 = vrot.lane.b32.xlu1 %v3072_v59, %s3704_s19  ;;  %3089 = vrot.lane.b32.xlu0 %v3085_v27, %s3704_s19 }
 0x37c   : > { %v2646_v36 = vpop.permute.xlu1 %2645  ;;  %v2658_v12 = vpop.permute.xlu0 %2657  ;;  %v2738_v47 = vstv %s3446_s17 }
 0x37d   : > { %v2650_v14 = vadd.f32 %v2646_v36, %v2608_v33  ;;  %v2663_v38 = vadd.f32 %v2658_v12, %v2621_v13  ;;  %v2739_v30 = vmul.f32 %v2738_v47, %v5427_v25  ;;  %v2740_v46 = vmul.f32 %v2738_v47, %v5438_v34 }
 0x37e   : > { %3091 = vrot.lane.b32.xlu1 %v3086_v31, %s3704_s19  ;;  %3103 = vrot.lane.b32.xlu0 %v3099_v57, %s3704_s19  ;;  %v2752_v13 = vmul.f32 %v2750_v15, %v5438_v34 }
 0x380   : > { %v2660_v24 = vpop.permute.xlu1 %2659  ;;  %v2672_v11 = vpop.permute.xlu0 %2671 }
 0x381   : > { %v2664_v42 = vadd.f32 %v2660_v24, %v2622_v23  ;;  %v2677_v58 = vadd.f32 %v2672_v11, %v2635_v4 }
 0x382   : > { %3105 = vrot.lane.b32.xlu1 %v3100_v10, %s3704_s19  ;;  %s3461_s19 = sld [smem:[#allocation3 + $0x46]] }
 0x384   : > { %v2674_v26 = vpop.permute.xlu1 %2673  ;;  %v2686_v21 = vpop.permute.xlu0 %2685 }
 0x385   : > { %v2678_v9 = vadd.f32 %v2674_v26, %v2636_v1  ;;  %v2691_v8 = vadd.f32 %v2686_v21, %v2649_v49 }
 0x388   : > { %v2688_v2 = vpop.permute.xlu1 %2687  ;;  %v2700_v52 = vpop.permute.xlu0 %2699  ;;  %v2926_v24 = vstv %s3461_s19 }
 0x389   : > { %v2692_v6 = vadd.f32 %v2688_v2, %v2650_v14  ;;  %v2705_v20 = vadd.f32 %v2700_v52, %v2663_v38 }
 0x38b   : > { %v2741_v7 = vadd.f32 %v2739_v30, %v2705_v20  ;;  %v2928_v30 = vmul.f32 %v2926_v24, %v5554_v22 }
 0x38c   : > { %v2702_v39 = vpop.permute.xlu1 %2701  ;;  %v2714_v43 = vpop.permute.xlu0 %2713 }
 0x38d   : > { %v2706_v3 = vadd.f32 %v2702_v39, %v2664_v42  ;;  %v2719_v50 = vadd.f32 %v2714_v43, %v2677_v58  ;;  %v2932_v58 = vstv %s5652_s6 }
 0x38e   : > { %v2933_v51 = vmul.f32 %v2932_v58, %v5543_v16 }
 0x38f   : > { %v2742_v5 = vadd.f32 %v2740_v46, %v2706_v3  ;;  %v2747_v28 = vadd.f32 %v2745_v60, %v2719_v50  ;;  %v2938_v50 = vstv %s5654_s8 }
 0x390   : > { %v2716_v56 = vpop.permute.xlu1 %2715  ;;  %v2728_v29 = vpop.permute.xlu0 %2727 }
 0x391   : > { %v2720_v35 = vadd.f32 %v2716_v56, %v2678_v9  ;;  %v2733_v41 = vadd.f32 %v2728_v29, %v2691_v8  ;;  %v2927_v8 = vmul.f32 %v2926_v24, %v5543_v16  ;;  %v2934_v29 = vmul.f32 %v2932_v58, %v5554_v22 }
 0x393   : > { %v2748_v63 = vadd.f32 %v2746_v17, %v2720_v35  ;;  %v2753_v44 = vadd.f32 %v2751_v18, %v2733_v41  ;;  %v2939_v18 = vmul.f32 %v2938_v50, %v5543_v16 }
 0x394   : > { %v2730_v53 = vpop.permute.xlu1 %2729  ;;  %v2762_v40 = vpop.permute.xlu0 %2761 }
 0x395   : > { %v2734_v48 = vadd.f32 %v2730_v53, %v2692_v6  ;;  %v2767_v33 = vadd.f32 %v2762_v40, %v2741_v7 }
 0x397   : > { %v2754_v0 = vadd.f32 %v2752_v13, %v2734_v48  ;;  %v2940_v13 = vmul.f32 %v2938_v50, %v5554_v22 }
 0x398   : > { %v2764_v32 = vpop.permute.xlu1 %2763  ;;  %v2776_v37 = vpop.permute.xlu0 %2775 }
 0x399   : > { %v2768_v45 = vadd.f32 %v2764_v32, %v2742_v5  ;;  %v2781_v61 = vadd.f32 %v2776_v37, %v2747_v28 }
 0x39c   : > { %v2778_v23 = vpop.permute.xlu1 %2777  ;;  %v2790_v4 = vpop.permute.xlu0 %2789 }
 0x39d   : > { %v2782_v19 = vadd.f32 %v2778_v23, %v2748_v63  ;;  %v2795_v62 = vadd.f32 %v2790_v4, %v2753_v44 }
 0x3a0   : > { %v2792_v55 = vpop.permute.xlu1 %2791  ;;  %v2804_v59 = vpop.permute.xlu0 %2803 }
 0x3a1   : > { %v2796_v25 = vadd.f32 %v2792_v55, %v2754_v0  ;;  %v2809_v38 = vadd.f32 %v2804_v59, %v2767_v33 }
 0x3a4   : > { %v2806_v27 = vpop.permute.xlu1 %2805  ;;  %v2818_v1 = vpop.permute.xlu0 %2817 }
 0x3a5   : > { %v2810_v26 = vadd.f32 %v2806_v27, %v2768_v45  ;;  %v2823_v21 = vadd.f32 %v2818_v1, %v2781_v61 }
 0x3a8   : > { %v2820_v49 = vpop.permute.xlu1 %2819  ;;  %v2832_v54 = vpop.permute.xlu0 %2831 }
 0x3a9   : > { %v2824_v7 = vadd.f32 %v2820_v49, %v2782_v19  ;;  %v2837_v39 = vadd.f32 %v2832_v54, %v2795_v62 }
 0x3ac   : > { %v2834_v36 = vpop.permute.xlu1 %2833  ;;  %v2846_v12 = vpop.permute.xlu0 %2845 }
 0x3ad   : > { %v2851_v11 = vadd.f32 %v2846_v12, %v2809_v38  ;;  %v2838_v35 = vadd.f32 %v2834_v36, %v2796_v25 }
 0x3b0   : > { %v2848_v34 = vpop.permute.xlu1 %2847  ;;  %v2860_v31 = vpop.permute.xlu0 %2859 }
 0x3b1   : > { %v2852_v47 = vadd.f32 %v2848_v34, %v2810_v26  ;;  %v2865_v2 = vadd.f32 %v2860_v31, %v2823_v21 }
 0x3b4   : > { %v2862_v57 = vpop.permute.xlu1 %2861  ;;  %v2874_v14 = vpop.permute.xlu0 %2873 }
 0x3b5   : > { %v2866_v46 = vadd.f32 %v2862_v57, %v2824_v7  ;;  %v2879_v60 = vadd.f32 %v2874_v14, %v2837_v39 }
 0x3b8   : > { %v2876_v10 = vpop.permute.xlu1 %2875  ;;  %v2888_v42 = vpop.permute.xlu0 %2887 }
 0x3b9   : > { %v2893_v9 = vadd.f32 %v2888_v42, %v2851_v11  ;;  %v2880_v63 = vadd.f32 %v2876_v10, %v2838_v35 }
 0x3bb   : > { %v2929_v52 = vadd.f32 %v2927_v8, %v2893_v9 }
 0x3bc   : > { %v2890_v6 = vpop.permute.xlu1 %2889  ;;  %v2902_v20 = vpop.permute.xlu0 %2901 }
 0x3bd   : > { %v2894_v43 = vadd.f32 %v2890_v6, %v2852_v47  ;;  %v2907_v3 = vadd.f32 %v2902_v20, %v2865_v2 }
 0x3bf   : > { %v2930_v15 = vadd.f32 %v2928_v30, %v2894_v43  ;;  %v2935_v5 = vadd.f32 %v2933_v51, %v2907_v3 }
 0x3c0   : > { %v2904_v28 = vpop.permute.xlu1 %2903  ;;  %v2916_v56 = vpop.permute.xlu0 %2915 }
 0x3c1   : > { %v2908_v41 = vadd.f32 %v2904_v28, %v2866_v46  ;;  %v2921_v17 = vadd.f32 %v2916_v56, %v2879_v60 }
 0x3c3   : > { %v2936_v44 = vadd.f32 %v2934_v29, %v2908_v41  ;;  %v2941_v53 = vadd.f32 %v2939_v18, %v2921_v17 }
 0x3c4   : > { %v2918_v40 = vpop.permute.xlu1 %2917  ;;  %v2950_v48 = vpop.permute.xlu0 %2949 }
 0x3c5   : > { %v2922_v33 = vadd.f32 %v2918_v40, %v2880_v63  ;;  %v2955_v49 = vadd.f32 %v2950_v48, %v2929_v52 }
 0x3c7   : > { %v2942_v0 = vadd.f32 %v2940_v13, %v2922_v33 }
 0x3c8   : > { %v2952_v32 = vpop.permute.xlu1 %2951  ;;  %v2964_v37 = vpop.permute.xlu0 %2963 }
 0x3c9   : > { %v2956_v12 = vadd.f32 %v2952_v32, %v2930_v15  ;;  %v2969_v34 = vadd.f32 %v2964_v37, %v2935_v5 }
 0x3cc   : > { %v2966_v45 = vpop.permute.xlu1 %2965  ;;  %v2978_v61 = vpop.permute.xlu0 %2977 }
 0x3cd   : > { %v2970_v10 = vadd.f32 %v2966_v45, %v2936_v44  ;;  %v2983_v42 = vadd.f32 %v2978_v61, %v2941_v53 }
 0x3d0   : > { %v2980_v23 = vpop.permute.xlu1 %2979  ;;  %v2992_v4 = vpop.permute.xlu0 %2991 }
 0x3d1   : > { %v2997_v22 = vadd.f32 %v2992_v4, %v2955_v49  ;;  %v2984_v6 = vadd.f32 %v2980_v23, %v2942_v0 }
 0x3d4   : > { %v2994_v19 = vpop.permute.xlu1 %2993  ;;  %v3006_v62 = vpop.permute.xlu0 %3005 }
 0x3d5   : > { %v2998_v38 = vadd.f32 %v2994_v19, %v2956_v12  ;;  %v3011_v24 = vadd.f32 %v3006_v62, %v2969_v34 }
 0x3d8   : > { %v3008_v55 = vpop.permute.xlu1 %3007  ;;  %v3020_v59 = vpop.permute.xlu0 %3019 }
 0x3d9   : > { %v3012_v8 = vadd.f32 %v3008_v55, %v2970_v10  ;;  %v3025_v47 = vadd.f32 %v3020_v59, %v2983_v42 }
 0x3dc   : > { %v3022_v16 = vpop.permute.xlu1 %3021  ;;  %v3034_v25 = vpop.permute.xlu0 %3033 }
 0x3dd   : > { %v3039_v31 = vadd.f32 %v3034_v25, %v2997_v22  ;;  %v3026_v39 = vadd.f32 %v3022_v16, %v2984_v6 }
 0x3e0   : > { %v3036_v27 = vpop.permute.xlu1 %3035  ;;  %v3048_v1 = vpop.permute.xlu0 %3047 }
 0x3e1   : > { %v3040_v58 = vadd.f32 %v3036_v27, %v2998_v38  ;;  %v3053_v26 = vadd.f32 %v3048_v1, %v3011_v24 }
 0x3e4   : > { %v3050_v54 = vpop.permute.xlu1 %3049  ;;  %v3062_v36 = vpop.permute.xlu0 %3061 }
 0x3e5   : > { %v3054_v20 = vadd.f32 %v3050_v54, %v3012_v8  ;;  %v3067_v30 = vadd.f32 %v3062_v36, %v3025_v47 }
 0x3e8   : > { %v3064_v57 = vpop.permute.xlu1 %3063  ;;  %v3076_v14 = vpop.permute.xlu0 %3075 }
 0x3e9   : > { %v3081_v11 = vadd.f32 %v3076_v14, %v3039_v31  ;;  %v3068_v50 = vadd.f32 %v3064_v57, %v3026_v39 }
 0x3eb   : > { %3112 = vst.msk [vmem:[%s187_s16] sm:$0xff] %vm3111_vm3, %v3081_v11 }
 0x3ec   : > { %v3078_v21 = vpop.permute.xlu1 %3077  ;;  %v3090_v9 = vpop.permute.xlu0 %3089 }
 0x3ed   : > { %v3082_v2 = vadd.f32 %v3078_v21, %v3040_v58  ;;  %v3095_v52 = vadd.f32 %v3090_v9, %v3053_v26 }
 0x3ef   : > { %3113 = vst.msk [vmem:[%s187_s16 + $0x8] sm:$0xff] %vm3111_vm3, %v3082_v2  ;;  %3476 = vst.msk [vmem:[%s187_s16 + $0x10] sm:$0xff] %vm3111_vm3, %v3095_v52 }
 0x3f0   : > { %v3092_v51 = vpop.permute.xlu1 %3091  ;;  %v3104_v7 = vpop.permute.xlu0 %3103 }
 0x3f1   : > { %v3096_v43 = vadd.f32 %v3092_v51, %v3054_v20  ;;  %v3109_v3 = vadd.f32 %v3104_v7, %v3067_v30 }
 0x3f3   : > { %3477 = vst.msk [vmem:[%s187_s16 + $0x18] sm:$0xff] %vm3111_vm3, %v3096_v43  ;;  %3478 = vst.msk [vmem:[%s187_s16 + $0x20] sm:$0xff] %vm3111_vm3, %v3109_v3 }
 0x3f4   : > { %v3106_v46 = vpop.permute.xlu1 %3105 }
 0x3f5   : > { %v3110_v60 = vadd.f32 %v3106_v46, %v3068_v50 }
 0x3f7   : > { %3479 = vst.msk [vmem:[%s187_s16 + $0x28] sm:$0xff] %vm3111_vm3, %v3110_v60 }
 0x3f8   : > { %3622 = shalt.err (!%p3619_p5)
}
 0x3f9   : > { %s3623_s28 = scalar_lea.hbm %s5677_s30, 768  ;;  %s3627_s5 = scalar_lea.hbm %s5728_s2, 1536 }
 0x3fa   : > { %p3624_p10 = scmp.ne.s32.totalorder %s5677_s30, %s3623_s28  ;;  %p3628_p0 = scmp.lt.s32.totalorder %s5677_s30, %s5728_s2 }
 0x3fb   : > { %p3629_p4 = scmp.lt.s32.totalorder %s3627_s5, %s3623_s28 }
 0x3fc   : > { %p3625_p11 = pnand %p3624_p10, %p3771_p8 }
 0x3fd   : > { %p3630_p6 = por %p3629_p4, %p3628_p0 }
 0x3fe   : > { %p3626_p1 = pneg %p3625_p11 }
 0x400   : > { %p3631_p3 = pnand %p3630_p6, %p3626_p1 }
 0x402   : > { %3634 = shalt.err (!%p3631_p3)
}
 0x403   : > { %s3706_s8 = smov 128   ;;  %s3707_s16 = smov 8  }
 0x404   : > { %3493 = dma.vmem_to_hbm [thread:$0]  (%p3771_p8), %s5672_s3, 768, %s5677_s30, %s3121_s12, %s3706_s8, %s3706_s8, %s3707_s16  }
 0x405 PF: > { %s3151_s27 = sand.u32 1, %s3673_s9   ;;  %p5735_p7 = scmp.ne.s32.totalorder %s5732_s21, 0 }
 0x406   : > { %p5736_p9 = scmp.ge.s32.totalorder %s3693_s14, 2  ;;  %s3152_s29 = scalar_lea.sflag [#allocation5], %s3151_s27 }
 0x408   : > { %p3504_p12 = pnand %p5736_p9, %p5735_p7 }
 0x40a   : > { %p3505_p13 = pneg %p3504_p12 }
 0x40c   : > { %3668 = dma.done.wait (%p3505_p13), %s3152_s29, 768  }
 0x40d   : > { %3670 = vsyncadd (%p3505_p13), %s3152_s29, 4294966528  ;;  %s19_s14 = sadd.s32 1, %s3693_s14   ;;  %s5737_s9 = smov %s3677_s10 }
 0x40e   : > { %p16_p2 = scmp.ge.s32.totalorder %s19_s14, 4   ;;  %s5738_s10 = smov %s3681_s11 }
 0x40f   : > { %s5739_s11 = smov %s3811_s15  ;;  %s5740_s12 = smov %s3689_s13 }
 0x410   : > { %s5741_s13 = smov %s5743_s25  ;;  %18 = sbr.rel (!%p16_p2) target bundleno = 7 (0x7), region = 93 }
 0x415   :  { %3157 = vsyncpa [#allocation4], 1 }
 0x416   :  { %3159 = vsyncpa [#allocation4 + $0x1], 1 }
 0x417   :  { %3160 = vsyncpa [#allocation5], 1 }
 0x418   :  { %3162 = vsyncpa [#allocation5 + $0x1], 1 }
 0x419   :  { %3163 = vsyncpa [#allocation6], 1 }
 0x41a   :  { %3165 = vsyncpa [#allocation6 + $0x1], 1 }

</bundles_post_ra>
